<compile_context>
chip_gen: v7x
topology: tpu7x:2x2x1
jax: 0.10.0
libtpu: 0.0.40
codegen_flags: <defaults>
</compile_context>

<pallas_src>
import functools

import jax
import jax.numpy as jnp
import numpy as np
from jax.experimental import pallas as pl
from jax.experimental.pallas import tpu as pltpu


def _round_up(x, m):
    return ((x + m - 1) // m) * m


def _roi_pool_kernel(bi_ref, hs_ref, he_ref, ws_ref, we_ref,
                     feat_ref, out_ref, colmax_ref, binmax_ref,
                     *, pooled_h, pooled_w, chunk_w, chunk_h):
    """Separable per-bin max with bounded, statically-aligned W/H chunks."""
    del bi_ref  # consumed only by the feature index_map
    r = pl.program_id(0)
    H, W, C = feat_ref.shape
    fdt = feat_ref.dtype

    # -inf accumulators. Empty bins stay -inf; the wrapper zeroes them from the
    # scalar emptiness mask, so literal -inf feature values survive correctly.
    colmax_ref[...] = jnp.full(colmax_ref.shape, -jnp.inf, dtype=fdt)
    binmax_ref[...] = jnp.full(binmax_ref.shape, -jnp.inf, dtype=jnp.float32)

    n_wc = -(-W // chunk_w)
    n_hc = -(-H // chunk_h)

    # ---- Pass 1: per output column pw, max over its W window -> colmax (PW,H,C).
    # Static 8-aligned chunks over W; pl.when skips non-overlapping chunks, so we
    # stream roughly one slab pass per ROI instead of PW full-slab passes.
    for pw in range(pooled_w):
        ws = ws_ref[r * pooled_w + pw]
        we = we_ref[r * pooled_w + pw]
        for j in range(n_wc):
            c0 = j * chunk_w
            c1 = min(W, c0 + chunk_w)

            @pl.when((we > c0) & (ws < c1))
            def _(pw=pw, c0=c0, c1=c1, ws=ws, we=we):
                cols = jax.lax.broadcasted_iota(jnp.int32, (1, c1 - c0, 1), 1) + c0
                m = (cols >= ws) & (cols < we)
                chunk = feat_ref[:, c0:c1, :]                 # (H, cw, C) native dtype
                cmax = jnp.max(jnp.where(m, chunk, -jnp.inf), axis=1)   # (H, C)
                colmax_ref[pw] = jnp.maximum(colmax_ref[pw], cmax)

    # ---- Pass 2: per output row ph, max over its H window -> binmax (PH*PW, C).
    for ph in range(pooled_h):
        hs = hs_ref[r * pooled_h + ph]
        he = he_ref[r * pooled_h + ph]
        for j in range(n_hc):
            c0 = j * chunk_h
            c1 = min(H, c0 + chunk_h)

            @pl.when((he > c0) & (hs < c1))
            def _(ph=ph, c0=c0, c1=c1, hs=hs, he=he):
                rows = jax.lax.broadcasted_iota(jnp.int32, (1, c1 - c0, 1), 1) + c0
                m = (rows >= hs) & (rows < he)
                seg = colmax_ref[:, c0:c1, :]                 # (PW, ch, C)
                bmax = jnp.max(jnp.where(m, seg, -jnp.inf), axis=1)     # (PW, C)
                lo = ph * pooled_w
                cur = binmax_ref[pl.ds(lo, pooled_w)]
                binmax_ref[pl.ds(lo, pooled_w)] = jnp.maximum(
                    cur, bmax.astype(jnp.float32))

    # Single dense store of the whole ROI output block.
    out_ref[...] = binmax_ref[...]


def roi_pool(features, rois, pooled_height, pooled_width, spatial_scale,
             channels_last=False):
    if channels_last:
        B, H, W, C = features.shape
        feats_nhwc = features
    else:
        B, C, H, W = features.shape
        # One full HBM read+write; pass channels_last=True (or pre-transpose once
        # outside and reuse) to avoid paying this on every call.
        feats_nhwc = jnp.transpose(features, (0, 2, 3, 1))    # (B, H, W, C)
    if not jnp.issubdtype(feats_nhwc.dtype, jnp.floating):
        feats_nhwc = feats_nhwc.astype(jnp.float32)

    num_rois = rois.shape[0]
    PH, PW = int(pooled_height), int(pooled_width)

    # ---- sort ROIs by batch index so consecutive grid steps reuse the slab ----
    # (out-of-range batch indices are clipped rather than erroring, like before)
    batch_inds_all = jnp.clip(rois[:, 0].astype(jnp.int32), 0, B - 1)
    order = jnp.argsort(batch_inds_all)
    rois_s = rois[order]
    batch_inds = batch_inds_all[order]

    # ---- per-ROI, per-bin integer boundaries (matches the PyTorch reference) ---
    coords = jnp.round(rois_s[:, 1:5] * jnp.float32(spatial_scale)).astype(jnp.int32)
    roi_start_w, roi_start_h = coords[:, 0], coords[:, 1]
    roi_end_w, roi_end_h = coords[:, 2], coords[:, 3]
    roi_width = jnp.maximum(roi_end_w - roi_start_w + 1, 1).astype(jnp.float32)
    roi_height = jnp.maximum(roi_end_h - roi_start_h + 1, 1).astype(jnp.float32)
    bin_w = roi_width / PW
    bin_h = roi_height / PH

    ph_idx = jnp.arange(PH, dtype=jnp.float32)
    pw_idx = jnp.arange(PW, dtype=jnp.float32)

    hs2 = jnp.clip(jnp.floor(ph_idx[None, :] * bin_h[:, None]).astype(jnp.int32)
                   + roi_start_h[:, None], 0, H)               # (R, PH)
    he2 = jnp.clip(jnp.ceil((ph_idx[None, :] + 1.0) * bin_h[:, None]).astype(jnp.int32)
                   + roi_start_h[:, None], 0, H)
    ws2 = jnp.clip(jnp.floor(pw_idx[None, :] * bin_w[:, None]).astype(jnp.int32)
                   + roi_start_w[:, None], 0, W)               # (R, PW)
    we2 = jnp.clip(jnp.ceil((pw_idx[None, :] + 1.0) * bin_w[:, None]).astype(jnp.int32)
                   + roi_start_w[:, None], 0, W)

    # Exact empty-bin mask, applied after the kernel (no -inf==x fixup inside).
    empty = (he2 <= hs2)[:, :, None] | (we2 <= ws2)[:, None, :]  # (R, PH, PW)

    # Flattened 1D SMEM tables (tiny padding footprint).
    hstarts, hends = hs2.reshape(-1), he2.reshape(-1)
    wstarts, wends = ws2.reshape(-1), we2.reshape(-1)

    # Static, 8-aligned chunk sizes, roughly one pooled bin wide / tall.
    chunk_w = min(_round_up(max(-(-W // PW), 1), 8), _round_up(W, 8))
    chunk_h = min(_round_up(max(-(-H // PH), 1), 8), _round_up(H, 8))

    kernel = functools.partial(_roi_pool_kernel, pooled_h=PH, pooled_w=PW,
                               chunk_w=chunk_w, chunk_h=chunk_h)

    # ---- generation-aware VMEM budgeting / feature-slab buffering ----
    def padded_bytes(shape, itemsize):
        s = list(shape)
        s[-1] = _round_up(s[-1], 128)
        if len(s) >= 2:
            s[-2] = _round_up(s[-2], 8)
        n = 1
        for d in s:
            n *= d
        return n * itemsize

    try:
        vmem_cap = int(pltpu.get_tpu_info().vmem_capacity_bytes)
    except Exception:
        vmem_cap = 64 << 20  # conservative fallback (v7x-sized)

    fsize = feats_nhwc.dtype.itemsize
    feat_blk = padded_bytes((H, W, C), fsize)
    out_blk = padded_bytes((PH * PW, C), 4)
    colmax_b = padded_bytes((PW, H, C), fsize)
    binmax_b = padded_bytes((PH * PW, C), 4)

    # Single-buffer the slab only when double-buffering it would hog VMEM
    # (e.g. v7x 64 MiB): with batch-sorted ROIs its block index rarely changes,
    # so the lost pipelining is negligible while the footprint halves.
    feat_buffers = 1 if 2 * feat_blk > vmem_cap // 2 else 2
    feat_spec_kwargs = {}
    if feat_buffers == 1:
        feat_spec_kwargs["pipeline_mode"] = pl.Buffered(1)

    needed = feat_buffers * feat_blk + 2 * out_blk + colmax_b + binmax_b
    vmem_limit = int(min(max(needed + (8 << 20), 32 << 20), vmem_cap - (4 << 20)))
    # TODO(synk): for slabs that still exceed VMEM (e.g. 256x200x200 f32 on v7x),
    # DMA only the ROI's row range (pl.BoundedSlice on H, or pl.ANY + manual
    # make_async_copy) instead of the full (H, W, C) block.

    grid_spec = pltpu.PrefetchScalarGridSpec(
        num_scalar_prefetch=5,
        grid=(num_rois,),
        in_specs=[
            # Feature slab for this ROI's batch element (data-dependent block).
            pl.BlockSpec((None, H, W, C),
                         lambda r, bi, hs, he, ws, we: (bi[r], 0, 0, 0),
                         **feat_spec_kwargs),
        ],
        out_specs=pl.BlockSpec((None, PH * PW, C),
                               lambda r, bi, hs, he, ws, we: (r, 0, 0)),
        scratch_shapes=[pltpu.VMEM((PW, H, C), feats_nhwc.dtype),
                        pltpu.VMEM((PH * PW, C), jnp.float32)],
    )

    out_sorted = pl.pallas_call(
        kernel,
        out_shape=jax.ShapeDtypeStruct((num_rois, PH * PW, C), jnp.float32),
        grid_spec=grid_spec,
        compiler_params=pltpu.CompilerParams(
            # "parallel" lets v7x shard the ROI axis across its 2 TensorCores;
            # the batch-sorted order still yields slab reuse within each shard.
            dimension_semantics=("parallel",),
            vmem_limit_bytes=vmem_limit),
    )(batch_inds, hstarts, hends, wstarts, wends, feats_nhwc)

    # Zero empty bins exactly as the reference does (scalar-driven, preserves
    # legitimate -inf maxima from -inf inputs).
    out_sorted = jnp.where(empty.reshape(num_rois, PH * PW, 1),
                           jnp.float32(0.0), out_sorted)

    # (R, PH*PW, C) -> (R, C, PH, PW), then undo the batch sort.
    out = jnp.transpose(out_sorted.reshape(num_rois, PH, PW, C), (0, 3, 1, 2))
    inv_order = jnp.argsort(order)
    return out[inv_order]


def roi_pool_reference(features, rois, pooled_height, pooled_width, spatial_scale):
    """Direct numpy transcription of the PyTorch RoIPool.forward."""
    batch_size, num_channels, data_height, data_width = features.shape
    num_rois = rois.shape[0]
    outputs = np.zeros((num_rois, num_channels, pooled_height, pooled_width),
                       dtype=np.float32)
    for roi_ind, roi in enumerate(rois):
        batch_ind = int(roi[0])
        roi_start_w, roi_start_h, roi_end_w, roi_end_h = np.round(
            roi[1:] * spatial_scale).astype(int)
        roi_width = max(roi_end_w - roi_start_w + 1, 1)
        roi_height = max(roi_end_h - roi_start_h + 1, 1)
        bin_size_w = float(roi_width) / float(pooled_width)
        bin_size_h = float(roi_height) / float(pooled_height)
        for ph in range(pooled_height):
            hstart = int(np.floor(ph * bin_size_h))
            hend = int(np.ceil((ph + 1) * bin_size_h))
            hstart = min(data_height, max(0, hstart + roi_start_h))
            hend = min(data_height, max(0, hend + roi_start_h))
            for pw in range(pooled_width):
                wstart = int(np.floor(pw * bin_size_w))
                wend = int(np.ceil((pw + 1) * bin_size_w))
                wstart = min(data_width, max(0, wstart + roi_start_w))
                wend = min(data_width, max(0, wend + roi_start_w))
                if hend <= hstart or wend <= wstart:
                    outputs[roi_ind, :, ph, pw] = 0
                else:
                    data = features[batch_ind]
                    outputs[roi_ind, :, ph, pw] = data[
                        :, hstart:hend, wstart:wend].max(axis=(1, 2))
    return outputs


if __name__ == "__main__":
    key = jax.random.PRNGKey(0)
    B, C, H, W = 2, 4, 16, 16
    PH, PW = 4, 4
    spatial_scale = 0.25  # image coords -> 16x16 feature-map coords

    kf, _ = jax.random.split(key)
    features = jax.random.normal(kf, (B, C, H, W), dtype=jnp.float32)

    # rois: [batch_idx, x1, y1, x2, y2] in image coordinates.
    # Includes ROIs extending past the feature map (wide bins, empty bins).
    rois = jnp.array([
        [0.0,  0.0,  0.0,  32.0,  32.0],
        [1.0,  8.0,  4.0,  60.0,  56.0],
        [0.0, 16.0, 20.0,  48.0,  40.0],
        [1.0,  2.0,  2.0,  10.0,  62.0],
        [0.0,  0.0, 80.0,   8.0, 100.0],   # fully below the map -> all-empty bins
        [1.0,  0.0,  0.0, 120.0,   8.0],   # extends past W -> wide + empty w-bins
    ], dtype=jnp.float32)

    out = roi_pool(features, rois, PH, PW, spatial_scale)
    out = jax.block_until_ready(out)

    ref = roi_pool_reference(np.asarray(features), np.asarray(rois),
                             PH, PW, spatial_scale)
    assert out.shape == (rois.shape[0], C, PH, PW)
    np.testing.assert_allclose(np.asarray(out), ref, rtol=1e-6, atol=1e-6)

    print("KERNEL_OK")
</pallas_src>

<mosaic_0001>
module attributes {stable_mosaic.version = 11 : i64} {
  func.func @_roi_pool_kernel(%arg0: i32, %arg1: memref<6xi32, #tpu.memory_space<smem>>, %arg2: memref<24xi32, #tpu.memory_space<smem>>, %arg3: memref<24xi32, #tpu.memory_space<smem>>, %arg4: memref<24xi32, #tpu.memory_space<smem>>, %arg5: memref<24xi32, #tpu.memory_space<smem>>, %arg6: memref<1x16x16x4xf32, #tpu.memory_space<vmem>>, %arg7: memref<1x16x4xf32, #tpu.memory_space<vmem>>, %arg8: memref<4x16x4xf32, #tpu.memory_space<vmem>>, %arg9: memref<16x4xf32, #tpu.memory_space<vmem>>) attributes {dimension_semantics = [#tpu.dimension_semantics<parallel>], iteration_bounds = array<i64: 6>, scalar_prefetch = 5 : i64, scratch_operands = 2 : i64, tpu.core_type = #tpu.core_type<tc>, window_params = [{transform_indices = @transform_0, window_bounds = array<i64: 1, 16, 16, 4>}, {transform_indices = @transform_1, window_bounds = array<i64: 1, 16, 4>}]} {
    %cst = arith.constant 0xFF800000 : f32
    %0 = vector.broadcast %cst : f32 to vector<4x16x4xf32>
    %c0 = arith.constant 0 : index
    %c0_0 = arith.constant 0 : index
    %c0_1 = arith.constant 0 : index
    %1 = vector.load %arg8[%c0, %c0_0, %c0_1] : memref<4x16x4xf32, #tpu.memory_space<vmem>>, vector<4x16x4xf32>
    tpu.vector_store %arg8[%c0, %c0_0, %c0_1], %0 {strides = array<i32>} : memref<4x16x4xf32, #tpu.memory_space<vmem>>, vector<4x16x4xf32>,
    %cst_2 = arith.constant 0xFF800000 : f32
    %2 = vector.broadcast %cst_2 : f32 to vector<16x4xf32>
    %c0_3 = arith.constant 0 : index
    %c0_4 = arith.constant 0 : index
    %3 = vector.load %arg9[%c0_3, %c0_4] : memref<16x4xf32, #tpu.memory_space<vmem>>, vector<16x4xf32>
    tpu.vector_store %arg9[%c0_3, %c0_4], %2 {strides = array<i32>} : memref<16x4xf32, #tpu.memory_space<vmem>>, vector<16x4xf32>,
    %c4_i32 = arith.constant 4 : i32
    %4 = arith.muli %arg0, %c4_i32 : i32
    %c0_i32 = arith.constant 0 : i32
    %5 = arith.addi %4, %c0_i32 : i32
    %6 = arith.index_cast %5 : i32 to index
    %7 = memref.load %arg4[%6] : memref<24xi32, #tpu.memory_space<smem>>
    %c4_i32_5 = arith.constant 4 : i32
    %8 = arith.muli %arg0, %c4_i32_5 : i32
    %c0_i32_6 = arith.constant 0 : i32
    %9 = arith.addi %8, %c0_i32_6 : i32
    %10 = arith.index_cast %9 : i32 to index
    %11 = memref.load %arg5[%10] : memref<24xi32, #tpu.memory_space<smem>>
    %c0_i32_7 = arith.constant 0 : i32
    %12 = arith.cmpi sgt, %11, %c0_i32_7 : i32
    %c8_i32 = arith.constant 8 : i32
    %13 = arith.cmpi slt, %7, %c8_i32 : i32
    %14 = arith.andi %12, %13 : i1
    %15 = arith.extui %14 : i1 to i32
    %c0_i32_8 = arith.constant 0 : i32
    %16 = arith.cmpi ne, %15, %c0_i32_8 : i32
    scf.if %16 {
      %152 = tpu.iota {dimensions = array<i32: 1>} : vector<1x8x1xi32>
      %c0_i32_83 = arith.constant 0 : i32
      %153 = vector.broadcast %c0_i32_83 : i32 to vector<1x8x1xi32>
      %154 = arith.addi %152, %153 : vector<1x8x1xi32>
      %155 = vector.broadcast %7 : i32 to vector<1x8x1xi32>
      %156 = arith.cmpi sge, %154, %155 : vector<1x8x1xi32>
      %157 = vector.broadcast %11 : i32 to vector<1x8x1xi32>
      %158 = arith.cmpi slt, %154, %157 : vector<1x8x1xi32>
      %159 = arith.andi %156, %158 : vector<1x8x1xi1>
      %c0_84 = arith.constant 0 : index
      %c0_85 = arith.constant 0 : index
      %c0_86 = arith.constant 0 : index
      %c0_87 = arith.constant 0 : index
      %160 = vector.load %arg6[%c0_84, %c0_85, %c0_86, %c0_87] : memref<1x16x16x4xf32, #tpu.memory_space<vmem>>, vector<1x16x8x4xf32>
      %161 = vector.shape_cast %160 : vector<1x16x8x4xf32> to vector<16x8x4xf32>
      %cst_88 = arith.constant 0xFF800000 : f32
      %162 = vector.shape_cast %159 : vector<1x8x1xi1> to vector<1x8x1xi1>
      %163 = vector.broadcast %162 : vector<1x8x1xi1> to vector<16x8x4xi1>
      %164 = vector.broadcast %cst_88 : f32 to vector<16x8x4xf32>
      %165 = arith.select %163, %161, %164 : vector<16x8x4xi1>, vector<16x8x4xf32>
      %cst_89 = arith.constant dense<0xFF800000> : vector<16x4xf32>
      %166 = vector.multi_reduction <maximumf>, %165, %cst_89 [1] : vector<16x8x4xf32> to vector<16x4xf32>
      %c0_90 = arith.constant 0 : index
      %c0_91 = arith.constant 0 : index
      %c0_92 = arith.constant 0 : index
      %167 = vector.load %arg8[%c0_90, %c0_91, %c0_92] : memref<4x16x4xf32, #tpu.memory_space<vmem>>, vector<1x16x4xf32>
      %168 = vector.shape_cast %167 : vector<1x16x4xf32> to vector<16x4xf32>
      %169 = arith.maximumf %168, %166 : vector<16x4xf32>
      %c0_93 = arith.constant 0 : index
      %c0_94 = arith.constant 0 : index
      %c0_95 = arith.constant 0 : index
      %170 = vector.load %arg8[%c0_93, %c0_94, %c0_95] : memref<4x16x4xf32, #tpu.memory_space<vmem>>, vector<1x16x4xf32>
      %171 = vector.shape_cast %170 : vector<1x16x4xf32> to vector<16x4xf32>
      %172 = vector.shape_cast %169 : vector<16x4xf32> to vector<1x16x4xf32>
      tpu.vector_store %arg8[%c0_93, %c0_94, %c0_95], %172 {strides = array<i32>} : memref<4x16x4xf32, #tpu.memory_space<vmem>>, vector<1x16x4xf32>,
    } else {
    }
    %c8_i32_9 = arith.constant 8 : i32
    %17 = arith.cmpi sgt, %11, %c8_i32_9 : i32
    %c16_i32 = arith.constant 16 : i32
    %18 = arith.cmpi slt, %7, %c16_i32 : i32
    %19 = arith.andi %17, %18 : i1
    %20 = arith.extui %19 : i1 to i32
    %c0_i32_10 = arith.constant 0 : i32
    %21 = arith.cmpi ne, %20, %c0_i32_10 : i32
    scf.if %21 {
      %152 = tpu.iota {dimensions = array<i32: 1>} : vector<1x8x1xi32>
      %c8_i32_83 = arith.constant 8 : i32
      %153 = vector.broadcast %c8_i32_83 : i32 to vector<1x8x1xi32>
      %154 = arith.addi %152, %153 : vector<1x8x1xi32>
      %155 = vector.broadcast %7 : i32 to vector<1x8x1xi32>
      %156 = arith.cmpi sge, %154, %155 : vector<1x8x1xi32>
      %157 = vector.broadcast %11 : i32 to vector<1x8x1xi32>
      %158 = arith.cmpi slt, %154, %157 : vector<1x8x1xi32>
      %159 = arith.andi %156, %158 : vector<1x8x1xi1>
      %c0_84 = arith.constant 0 : index
      %c0_85 = arith.constant 0 : index
      %c8 = arith.constant 8 : index
      %c0_86 = arith.constant 0 : index
      %160 = vector.load %arg6[%c0_84, %c0_85, %c8, %c0_86] : memref<1x16x16x4xf32, #tpu.memory_space<vmem>>, vector<1x16x8x4xf32>
      %161 = vector.shape_cast %160 : vector<1x16x8x4xf32> to vector<16x8x4xf32>
      %cst_87 = arith.constant 0xFF800000 : f32
      %162 = vector.shape_cast %159 : vector<1x8x1xi1> to vector<1x8x1xi1>
      %163 = vector.broadcast %162 : vector<1x8x1xi1> to vector<16x8x4xi1>
      %164 = vector.broadcast %cst_87 : f32 to vector<16x8x4xf32>
      %165 = arith.select %163, %161, %164 : vector<16x8x4xi1>, vector<16x8x4xf32>
      %cst_88 = arith.constant dense<0xFF800000> : vector<16x4xf32>
      %166 = vector.multi_reduction <maximumf>, %165, %cst_88 [1] : vector<16x8x4xf32> to vector<16x4xf32>
      %c0_89 = arith.constant 0 : index
      %c0_90 = arith.constant 0 : index
      %c0_91 = arith.constant 0 : index
      %167 = vector.load %arg8[%c0_89, %c0_90, %c0_91] : memref<4x16x4xf32, #tpu.memory_space<vmem>>, vector<1x16x4xf32>
      %168 = vector.shape_cast %167 : vector<1x16x4xf32> to vector<16x4xf32>
      %169 = arith.maximumf %168, %166 : vector<16x4xf32>
      %c0_92 = arith.constant 0 : index
      %c0_93 = arith.constant 0 : index
      %c0_94 = arith.constant 0 : index
      %170 = vector.load %arg8[%c0_92, %c0_93, %c0_94] : memref<4x16x4xf32, #tpu.memory_space<vmem>>, vector<1x16x4xf32>
      %171 = vector.shape_cast %170 : vector<1x16x4xf32> to vector<16x4xf32>
      %172 = vector.shape_cast %169 : vector<16x4xf32> to vector<1x16x4xf32>
      tpu.vector_store %arg8[%c0_92, %c0_93, %c0_94], %172 {strides = array<i32>} : memref<4x16x4xf32, #tpu.memory_space<vmem>>, vector<1x16x4xf32>,
    } else {
    }
    %c4_i32_11 = arith.constant 4 : i32
    %22 = arith.muli %arg0, %c4_i32_11 : i32
    %c1_i32 = arith.constant 1 : i32
    %23 = arith.addi %22, %c1_i32 : i32
    %24 = arith.index_cast %23 : i32 to index
    %25 = memref.load %arg4[%24] : memref<24xi32, #tpu.memory_space<smem>>
    %c4_i32_12 = arith.constant 4 : i32
    %26 = arith.muli %arg0, %c4_i32_12 : i32
    %c1_i32_13 = arith.constant 1 : i32
    %27 = arith.addi %26, %c1_i32_13 : i32
    %28 = arith.index_cast %27 : i32 to index
    %29 = memref.load %arg5[%28] : memref<24xi32, #tpu.memory_space<smem>>
    %c0_i32_14 = arith.constant 0 : i32
    %30 = arith.cmpi sgt, %29, %c0_i32_14 : i32
    %c8_i32_15 = arith.constant 8 : i32
    %31 = arith.cmpi slt, %25, %c8_i32_15 : i32
    %32 = arith.andi %30, %31 : i1
    %33 = arith.extui %32 : i1 to i32
    %c0_i32_16 = arith.constant 0 : i32
    %34 = arith.cmpi ne, %33, %c0_i32_16 : i32
    scf.if %34 {
      %152 = tpu.iota {dimensions = array<i32: 1>} : vector<1x8x1xi32>
      %c0_i32_83 = arith.constant 0 : i32
      %153 = vector.broadcast %c0_i32_83 : i32 to vector<1x8x1xi32>
      %154 = arith.addi %152, %153 : vector<1x8x1xi32>
      %155 = vector.broadcast %25 : i32 to vector<1x8x1xi32>
      %156 = arith.cmpi sge, %154, %155 : vector<1x8x1xi32>
      %157 = vector.broadcast %29 : i32 to vector<1x8x1xi32>
      %158 = arith.cmpi slt, %154, %157 : vector<1x8x1xi32>
      %159 = arith.andi %156, %158 : vector<1x8x1xi1>
      %c0_84 = arith.constant 0 : index
      %c0_85 = arith.constant 0 : index
      %c0_86 = arith.constant 0 : index
      %c0_87 = arith.constant 0 : index
      %160 = vector.load %arg6[%c0_84, %c0_85, %c0_86, %c0_87] : memref<1x16x16x4xf32, #tpu.memory_space<vmem>>, vector<1x16x8x4xf32>
      %161 = vector.shape_cast %160 : vector<1x16x8x4xf32> to vector<16x8x4xf32>
      %cst_88 = arith.constant 0xFF800000 : f32
      %162 = vector.shape_cast %159 : vector<1x8x1xi1> to vector<1x8x1xi1>
      %163 = vector.broadcast %162 : vector<1x8x1xi1> to vector<16x8x4xi1>
      %164 = vector.broadcast %cst_88 : f32 to vector<16x8x4xf32>
      %165 = arith.select %163, %161, %164 : vector<16x8x4xi1>, vector<16x8x4xf32>
      %cst_89 = arith.constant dense<0xFF800000> : vector<16x4xf32>
      %166 = vector.multi_reduction <maximumf>, %165, %cst_89 [1] : vector<16x8x4xf32> to vector<16x4xf32>
      %c1 = arith.constant 1 : index
      %c0_90 = arith.constant 0 : index
      %c0_91 = arith.constant 0 : index
      %167 = vector.load %arg8[%c1, %c0_90, %c0_91] : memref<4x16x4xf32, #tpu.memory_space<vmem>>, vector<1x16x4xf32>
      %168 = vector.shape_cast %167 : vector<1x16x4xf32> to vector<16x4xf32>
      %169 = arith.maximumf %168, %166 : vector<16x4xf32>
      %c1_92 = arith.constant 1 : index
      %c0_93 = arith.constant 0 : index
      %c0_94 = arith.constant 0 : index
      %170 = vector.load %arg8[%c1_92, %c0_93, %c0_94] : memref<4x16x4xf32, #tpu.memory_space<vmem>>, vector<1x16x4xf32>
      %171 = vector.shape_cast %170 : vector<1x16x4xf32> to vector<16x4xf32>
      %172 = vector.shape_cast %169 : vector<16x4xf32> to vector<1x16x4xf32>
      tpu.vector_store %arg8[%c1_92, %c0_93, %c0_94], %172 {strides = array<i32>} : memref<4x16x4xf32, #tpu.memory_space<vmem>>, vector<1x16x4xf32>,
    } else {
    }
    %c8_i32_17 = arith.constant 8 : i32
    %35 = arith.cmpi sgt, %29, %c8_i32_17 : i32
    %c16_i32_18 = arith.constant 16 : i32
    %36 = arith.cmpi slt, %25, %c16_i32_18 : i32
    %37 = arith.andi %35, %36 : i1
    %38 = arith.extui %37 : i1 to i32
    %c0_i32_19 = arith.constant 0 : i32
    %39 = arith.cmpi ne, %38, %c0_i32_19 : i32
    scf.if %39 {
      %152 = tpu.iota {dimensions = array<i32: 1>} : vector<1x8x1xi32>
      %c8_i32_83 = arith.constant 8 : i32
      %153 = vector.broadcast %c8_i32_83 : i32 to vector<1x8x1xi32>
      %154 = arith.addi %152, %153 : vector<1x8x1xi32>
      %155 = vector.broadcast %25 : i32 to vector<1x8x1xi32>
      %156 = arith.cmpi sge, %154, %155 : vector<1x8x1xi32>
      %157 = vector.broadcast %29 : i32 to vector<1x8x1xi32>
      %158 = arith.cmpi slt, %154, %157 : vector<1x8x1xi32>
      %159 = arith.andi %156, %158 : vector<1x8x1xi1>
      %c0_84 = arith.constant 0 : index
      %c0_85 = arith.constant 0 : index
      %c8 = arith.constant 8 : index
      %c0_86 = arith.constant 0 : index
      %160 = vector.load %arg6[%c0_84, %c0_85, %c8, %c0_86] : memref<1x16x16x4xf32, #tpu.memory_space<vmem>>, vector<1x16x8x4xf32>
      %161 = vector.shape_cast %160 : vector<1x16x8x4xf32> to vector<16x8x4xf32>
      %cst_87 = arith.constant 0xFF800000 : f32
      %162 = vector.shape_cast %159 : vector<1x8x1xi1> to vector<1x8x1xi1>
      %163 = vector.broadcast %162 : vector<1x8x1xi1> to vector<16x8x4xi1>
      %164 = vector.broadcast %cst_87 : f32 to vector<16x8x4xf32>
      %165 = arith.select %163, %161, %164 : vector<16x8x4xi1>, vector<16x8x4xf32>
      %cst_88 = arith.constant dense<0xFF800000> : vector<16x4xf32>
      %166 = vector.multi_reduction <maximumf>, %165, %cst_88 [1] : vector<16x8x4xf32> to vector<16x4xf32>
      %c1 = arith.constant 1 : index
      %c0_89 = arith.constant 0 : index
      %c0_90 = arith.constant 0 : index
      %167 = vector.load %arg8[%c1, %c0_89, %c0_90] : memref<4x16x4xf32, #tpu.memory_space<vmem>>, vector<1x16x4xf32>
      %168 = vector.shape_cast %167 : vector<1x16x4xf32> to vector<16x4xf32>
      %169 = arith.maximumf %168, %166 : vector<16x4xf32>
      %c1_91 = arith.constant 1 : index
      %c0_92 = arith.constant 0 : index
      %c0_93 = arith.constant 0 : index
      %170 = vector.load %arg8[%c1_91, %c0_92, %c0_93] : memref<4x16x4xf32, #tpu.memory_space<vmem>>, vector<1x16x4xf32>
      %171 = vector.shape_cast %170 : vector<1x16x4xf32> to vector<16x4xf32>
      %172 = vector.shape_cast %169 : vector<16x4xf32> to vector<1x16x4xf32>
      tpu.vector_store %arg8[%c1_91, %c0_92, %c0_93], %172 {strides = array<i32>} : memref<4x16x4xf32, #tpu.memory_space<vmem>>, vector<1x16x4xf32>,
    } else {
    }
    %c4_i32_20 = arith.constant 4 : i32
    %40 = arith.muli %arg0, %c4_i32_20 : i32
    %c2_i32 = arith.constant 2 : i32
    %41 = arith.addi %40, %c2_i32 : i32
    %42 = arith.index_cast %41 : i32 to index
    %43 = memref.load %arg4[%42] : memref<24xi32, #tpu.memory_space<smem>>
    %c4_i32_21 = arith.constant 4 : i32
    %44 = arith.muli %arg0, %c4_i32_21 : i32
    %c2_i32_22 = arith.constant 2 : i32
    %45 = arith.addi %44, %c2_i32_22 : i32
    %46 = arith.index_cast %45 : i32 to index
    %47 = memref.load %arg5[%46] : memref<24xi32, #tpu.memory_space<smem>>
    %c0_i32_23 = arith.constant 0 : i32
    %48 = arith.cmpi sgt, %47, %c0_i32_23 : i32
    %c8_i32_24 = arith.constant 8 : i32
    %49 = arith.cmpi slt, %43, %c8_i32_24 : i32
    %50 = arith.andi %48, %49 : i1
    %51 = arith.extui %50 : i1 to i32
    %c0_i32_25 = arith.constant 0 : i32
    %52 = arith.cmpi ne, %51, %c0_i32_25 : i32
    scf.if %52 {
      %152 = tpu.iota {dimensions = array<i32: 1>} : vector<1x8x1xi32>
      %c0_i32_83 = arith.constant 0 : i32
      %153 = vector.broadcast %c0_i32_83 : i32 to vector<1x8x1xi32>
      %154 = arith.addi %152, %153 : vector<1x8x1xi32>
      %155 = vector.broadcast %43 : i32 to vector<1x8x1xi32>
      %156 = arith.cmpi sge, %154, %155 : vector<1x8x1xi32>
      %157 = vector.broadcast %47 : i32 to vector<1x8x1xi32>
      %158 = arith.cmpi slt, %154, %157 : vector<1x8x1xi32>
      %159 = arith.andi %156, %158 : vector<1x8x1xi1>
      %c0_84 = arith.constant 0 : index
      %c0_85 = arith.constant 0 : index
      %c0_86 = arith.constant 0 : index
      %c0_87 = arith.constant 0 : index
      %160 = vector.load %arg6[%c0_84, %c0_85, %c0_86, %c0_87] : memref<1x16x16x4xf32, #tpu.memory_space<vmem>>, vector<1x16x8x4xf32>
      %161 = vector.shape_cast %160 : vector<1x16x8x4xf32> to vector<16x8x4xf32>
      %cst_88 = arith.constant 0xFF800000 : f32
      %162 = vector.shape_cast %159 : vector<1x8x1xi1> to vector<1x8x1xi1>
      %163 = vector.broadcast %162 : vector<1x8x1xi1> to vector<16x8x4xi1>
      %164 = vector.broadcast %cst_88 : f32 to vector<16x8x4xf32>
      %165 = arith.select %163, %161, %164 : vector<16x8x4xi1>, vector<16x8x4xf32>
      %cst_89 = arith.constant dense<0xFF800000> : vector<16x4xf32>
      %166 = vector.multi_reduction <maximumf>, %165, %cst_89 [1] : vector<16x8x4xf32> to vector<16x4xf32>
      %c2 = arith.constant 2 : index
      %c0_90 = arith.constant 0 : index
      %c0_91 = arith.constant 0 : index
      %167 = vector.load %arg8[%c2, %c0_90, %c0_91] : memref<4x16x4xf32, #tpu.memory_space<vmem>>, vector<1x16x4xf32>
      %168 = vector.shape_cast %167 : vector<1x16x4xf32> to vector<16x4xf32>
      %169 = arith.maximumf %168, %166 : vector<16x4xf32>
      %c2_92 = arith.constant 2 : index
      %c0_93 = arith.constant 0 : index
      %c0_94 = arith.constant 0 : index
      %170 = vector.load %arg8[%c2_92, %c0_93, %c0_94] : memref<4x16x4xf32, #tpu.memory_space<vmem>>, vector<1x16x4xf32>
      %171 = vector.shape_cast %170 : vector<1x16x4xf32> to vector<16x4xf32>
      %172 = vector.shape_cast %169 : vector<16x4xf32> to vector<1x16x4xf32>
      tpu.vector_store %arg8[%c2_92, %c0_93, %c0_94], %172 {strides = array<i32>} : memref<4x16x4xf32, #tpu.memory_space<vmem>>, vector<1x16x4xf32>,
    } else {
    }
    %c8_i32_26 = arith.constant 8 : i32
    %53 = arith.cmpi sgt, %47, %c8_i32_26 : i32
    %c16_i32_27 = arith.constant 16 : i32
    %54 = arith.cmpi slt, %43, %c16_i32_27 : i32
    %55 = arith.andi %53, %54 : i1
    %56 = arith.extui %55 : i1 to i32
    %c0_i32_28 = arith.constant 0 : i32
    %57 = arith.cmpi ne, %56, %c0_i32_28 : i32
    scf.if %57 {
      %152 = tpu.iota {dimensions = array<i32: 1>} : vector<1x8x1xi32>
      %c8_i32_83 = arith.constant 8 : i32
      %153 = vector.broadcast %c8_i32_83 : i32 to vector<1x8x1xi32>
      %154 = arith.addi %152, %153 : vector<1x8x1xi32>
      %155 = vector.broadcast %43 : i32 to vector<1x8x1xi32>
      %156 = arith.cmpi sge, %154, %155 : vector<1x8x1xi32>
      %157 = vector.broadcast %47 : i32 to vector<1x8x1xi32>
      %158 = arith.cmpi slt, %154, %157 : vector<1x8x1xi32>
      %159 = arith.andi %156, %158 : vector<1x8x1xi1>
      %c0_84 = arith.constant 0 : index
      %c0_85 = arith.constant 0 : index
      %c8 = arith.constant 8 : index
      %c0_86 = arith.constant 0 : index
      %160 = vector.load %arg6[%c0_84, %c0_85, %c8, %c0_86] : memref<1x16x16x4xf32, #tpu.memory_space<vmem>>, vector<1x16x8x4xf32>
      %161 = vector.shape_cast %160 : vector<1x16x8x4xf32> to vector<16x8x4xf32>
      %cst_87 = arith.constant 0xFF800000 : f32
      %162 = vector.shape_cast %159 : vector<1x8x1xi1> to vector<1x8x1xi1>
      %163 = vector.broadcast %162 : vector<1x8x1xi1> to vector<16x8x4xi1>
      %164 = vector.broadcast %cst_87 : f32 to vector<16x8x4xf32>
      %165 = arith.select %163, %161, %164 : vector<16x8x4xi1>, vector<16x8x4xf32>
      %cst_88 = arith.constant dense<0xFF800000> : vector<16x4xf32>
      %166 = vector.multi_reduction <maximumf>, %165, %cst_88 [1] : vector<16x8x4xf32> to vector<16x4xf32>
      %c2 = arith.constant 2 : index
      %c0_89 = arith.constant 0 : index
      %c0_90 = arith.constant 0 : index
      %167 = vector.load %arg8[%c2, %c0_89, %c0_90] : memref<4x16x4xf32, #tpu.memory_space<vmem>>, vector<1x16x4xf32>
      %168 = vector.shape_cast %167 : vector<1x16x4xf32> to vector<16x4xf32>
      %169 = arith.maximumf %168, %166 : vector<16x4xf32>
      %c2_91 = arith.constant 2 : index
      %c0_92 = arith.constant 0 : index
      %c0_93 = arith.constant 0 : index
      %170 = vector.load %arg8[%c2_91, %c0_92, %c0_93] : memref<4x16x4xf32, #tpu.memory_space<vmem>>, vector<1x16x4xf32>
      %171 = vector.shape_cast %170 : vector<1x16x4xf32> to vector<16x4xf32>
      %172 = vector.shape_cast %169 : vector<16x4xf32> to vector<1x16x4xf32>
      tpu.vector_store %arg8[%c2_91, %c0_92, %c0_93], %172 {strides = array<i32>} : memref<4x16x4xf32, #tpu.memory_space<vmem>>, vector<1x16x4xf32>,
    } else {
    }
    %c4_i32_29 = arith.constant 4 : i32
    %58 = arith.muli %arg0, %c4_i32_29 : i32
    %c3_i32 = arith.constant 3 : i32
    %59 = arith.addi %58, %c3_i32 : i32
    %60 = arith.index_cast %59 : i32 to index
    %61 = memref.load %arg4[%60] : memref<24xi32, #tpu.memory_space<smem>>
    %c4_i32_30 = arith.constant 4 : i32
    %62 = arith.muli %arg0, %c4_i32_30 : i32
    %c3_i32_31 = arith.constant 3 : i32
    %63 = arith.addi %62, %c3_i32_31 : i32
    %64 = arith.index_cast %63 : i32 to index
    %65 = memref.load %arg5[%64] : memref<24xi32, #tpu.memory_space<smem>>
    %c0_i32_32 = arith.constant 0 : i32
    %66 = arith.cmpi sgt, %65, %c0_i32_32 : i32
    %c8_i32_33 = arith.constant 8 : i32
    %67 = arith.cmpi slt, %61, %c8_i32_33 : i32
    %68 = arith.andi %66, %67 : i1
    %69 = arith.extui %68 : i1 to i32
    %c0_i32_34 = arith.constant 0 : i32
    %70 = arith.cmpi ne, %69, %c0_i32_34 : i32
    scf.if %70 {
      %152 = tpu.iota {dimensions = array<i32: 1>} : vector<1x8x1xi32>
      %c0_i32_83 = arith.constant 0 : i32
      %153 = vector.broadcast %c0_i32_83 : i32 to vector<1x8x1xi32>
      %154 = arith.addi %152, %153 : vector<1x8x1xi32>
      %155 = vector.broadcast %61 : i32 to vector<1x8x1xi32>
      %156 = arith.cmpi sge, %154, %155 : vector<1x8x1xi32>
      %157 = vector.broadcast %65 : i32 to vector<1x8x1xi32>
      %158 = arith.cmpi slt, %154, %157 : vector<1x8x1xi32>
      %159 = arith.andi %156, %158 : vector<1x8x1xi1>
      %c0_84 = arith.constant 0 : index
      %c0_85 = arith.constant 0 : index
      %c0_86 = arith.constant 0 : index
      %c0_87 = arith.constant 0 : index
      %160 = vector.load %arg6[%c0_84, %c0_85, %c0_86, %c0_87] : memref<1x16x16x4xf32, #tpu.memory_space<vmem>>, vector<1x16x8x4xf32>
      %161 = vector.shape_cast %160 : vector<1x16x8x4xf32> to vector<16x8x4xf32>
      %cst_88 = arith.constant 0xFF800000 : f32
      %162 = vector.shape_cast %159 : vector<1x8x1xi1> to vector<1x8x1xi1>
      %163 = vector.broadcast %162 : vector<1x8x1xi1> to vector<16x8x4xi1>
      %164 = vector.broadcast %cst_88 : f32 to vector<16x8x4xf32>
      %165 = arith.select %163, %161, %164 : vector<16x8x4xi1>, vector<16x8x4xf32>
      %cst_89 = arith.constant dense<0xFF800000> : vector<16x4xf32>
      %166 = vector.multi_reduction <maximumf>, %165, %cst_89 [1] : vector<16x8x4xf32> to vector<16x4xf32>
      %c3 = arith.constant 3 : index
      %c0_90 = arith.constant 0 : index
      %c0_91 = arith.constant 0 : index
      %167 = vector.load %arg8[%c3, %c0_90, %c0_91] : memref<4x16x4xf32, #tpu.memory_space<vmem>>, vector<1x16x4xf32>
      %168 = vector.shape_cast %167 : vector<1x16x4xf32> to vector<16x4xf32>
      %169 = arith.maximumf %168, %166 : vector<16x4xf32>
      %c3_92 = arith.constant 3 : index
      %c0_93 = arith.constant 0 : index
      %c0_94 = arith.constant 0 : index
      %170 = vector.load %arg8[%c3_92, %c0_93, %c0_94] : memref<4x16x4xf32, #tpu.memory_space<vmem>>, vector<1x16x4xf32>
      %171 = vector.shape_cast %170 : vector<1x16x4xf32> to vector<16x4xf32>
      %172 = vector.shape_cast %169 : vector<16x4xf32> to vector<1x16x4xf32>
      tpu.vector_store %arg8[%c3_92, %c0_93, %c0_94], %172 {strides = array<i32>} : memref<4x16x4xf32, #tpu.memory_space<vmem>>, vector<1x16x4xf32>,
    } else {
    }
    %c8_i32_35 = arith.constant 8 : i32
    %71 = arith.cmpi sgt, %65, %c8_i32_35 : i32
    %c16_i32_36 = arith.constant 16 : i32
    %72 = arith.cmpi slt, %61, %c16_i32_36 : i32
    %73 = arith.andi %71, %72 : i1
    %74 = arith.extui %73 : i1 to i32
    %c0_i32_37 = arith.constant 0 : i32
    %75 = arith.cmpi ne, %74, %c0_i32_37 : i32
    scf.if %75 {
      %152 = tpu.iota {dimensions = array<i32: 1>} : vector<1x8x1xi32>
      %c8_i32_83 = arith.constant 8 : i32
      %153 = vector.broadcast %c8_i32_83 : i32 to vector<1x8x1xi32>
      %154 = arith.addi %152, %153 : vector<1x8x1xi32>
      %155 = vector.broadcast %61 : i32 to vector<1x8x1xi32>
      %156 = arith.cmpi sge, %154, %155 : vector<1x8x1xi32>
      %157 = vector.broadcast %65 : i32 to vector<1x8x1xi32>
      %158 = arith.cmpi slt, %154, %157 : vector<1x8x1xi32>
      %159 = arith.andi %156, %158 : vector<1x8x1xi1>
      %c0_84 = arith.constant 0 : index
      %c0_85 = arith.constant 0 : index
      %c8 = arith.constant 8 : index
      %c0_86 = arith.constant 0 : index
      %160 = vector.load %arg6[%c0_84, %c0_85, %c8, %c0_86] : memref<1x16x16x4xf32, #tpu.memory_space<vmem>>, vector<1x16x8x4xf32>
      %161 = vector.shape_cast %160 : vector<1x16x8x4xf32> to vector<16x8x4xf32>
      %cst_87 = arith.constant 0xFF800000 : f32
      %162 = vector.shape_cast %159 : vector<1x8x1xi1> to vector<1x8x1xi1>
      %163 = vector.broadcast %162 : vector<1x8x1xi1> to vector<16x8x4xi1>
      %164 = vector.broadcast %cst_87 : f32 to vector<16x8x4xf32>
      %165 = arith.select %163, %161, %164 : vector<16x8x4xi1>, vector<16x8x4xf32>
      %cst_88 = arith.constant dense<0xFF800000> : vector<16x4xf32>
      %166 = vector.multi_reduction <maximumf>, %165, %cst_88 [1] : vector<16x8x4xf32> to vector<16x4xf32>
      %c3 = arith.constant 3 : index
      %c0_89 = arith.constant 0 : index
      %c0_90 = arith.constant 0 : index
      %167 = vector.load %arg8[%c3, %c0_89, %c0_90] : memref<4x16x4xf32, #tpu.memory_space<vmem>>, vector<1x16x4xf32>
      %168 = vector.shape_cast %167 : vector<1x16x4xf32> to vector<16x4xf32>
      %169 = arith.maximumf %168, %166 : vector<16x4xf32>
      %c3_91 = arith.constant 3 : index
      %c0_92 = arith.constant 0 : index
      %c0_93 = arith.constant 0 : index
      %170 = vector.load %arg8[%c3_91, %c0_92, %c0_93] : memref<4x16x4xf32, #tpu.memory_space<vmem>>, vector<1x16x4xf32>
      %171 = vector.shape_cast %170 : vector<1x16x4xf32> to vector<16x4xf32>
      %172 = vector.shape_cast %169 : vector<16x4xf32> to vector<1x16x4xf32>
      tpu.vector_store %arg8[%c3_91, %c0_92, %c0_93], %172 {strides = array<i32>} : memref<4x16x4xf32, #tpu.memory_space<vmem>>, vector<1x16x4xf32>,
    } else {
    }
    %c4_i32_38 = arith.constant 4 : i32
    %76 = arith.muli %arg0, %c4_i32_38 : i32
    %c0_i32_39 = arith.constant 0 : i32
    %77 = arith.addi %76, %c0_i32_39 : i32
    %78 = arith.index_cast %77 : i32 to index
    %79 = memref.load %arg2[%78] : memref<24xi32, #tpu.memory_space<smem>>
    %c4_i32_40 = arith.constant 4 : i32
    %80 = arith.muli %arg0, %c4_i32_40 : i32
    %c0_i32_41 = arith.constant 0 : i32
    %81 = arith.addi %80, %c0_i32_41 : i32
    %82 = arith.index_cast %81 : i32 to index
    %83 = memref.load %arg3[%82] : memref<24xi32, #tpu.memory_space<smem>>
    %c0_i32_42 = arith.constant 0 : i32
    %84 = arith.cmpi sgt, %83, %c0_i32_42 : i32
    %c8_i32_43 = arith.constant 8 : i32
    %85 = arith.cmpi slt, %79, %c8_i32_43 : i32
    %86 = arith.andi %84, %85 : i1
    %87 = arith.extui %86 : i1 to i32
    %c0_i32_44 = arith.constant 0 : i32
    %88 = arith.cmpi ne, %87, %c0_i32_44 : i32
    scf.if %88 {
      %152 = tpu.iota {dimensions = array<i32: 1>} : vector<1x8x1xi32>
      %c0_i32_83 = arith.constant 0 : i32
      %153 = vector.broadcast %c0_i32_83 : i32 to vector<1x8x1xi32>
      %154 = arith.addi %152, %153 : vector<1x8x1xi32>
      %155 = vector.broadcast %79 : i32 to vector<1x8x1xi32>
      %156 = arith.cmpi sge, %154, %155 : vector<1x8x1xi32>
      %157 = vector.broadcast %83 : i32 to vector<1x8x1xi32>
      %158 = arith.cmpi slt, %154, %157 : vector<1x8x1xi32>
      %159 = arith.andi %156, %158 : vector<1x8x1xi1>
      %c0_84 = arith.constant 0 : index
      %c0_85 = arith.constant 0 : index
      %c0_86 = arith.constant 0 : index
      %160 = vector.load %arg8[%c0_84, %c0_85, %c0_86] : memref<4x16x4xf32, #tpu.memory_space<vmem>>, vector<4x8x4xf32>
      %cst_87 = arith.constant 0xFF800000 : f32
      %161 = vector.shape_cast %159 : vector<1x8x1xi1> to vector<1x8x1xi1>
      %162 = vector.broadcast %161 : vector<1x8x1xi1> to vector<4x8x4xi1>
      %163 = vector.broadcast %cst_87 : f32 to vector<4x8x4xf32>
      %164 = arith.select %162, %160, %163 : vector<4x8x4xi1>, vector<4x8x4xf32>
      %cst_88 = arith.constant dense<0xFF800000> : vector<4x4xf32>
      %165 = vector.multi_reduction <maximumf>, %164, %cst_88 [1] : vector<4x8x4xf32> to vector<4x4xf32>
      %c0_89 = arith.constant 0 : index
      %c0_90 = arith.constant 0 : index
      %166 = vector.load %arg9[%c0_89, %c0_90] : memref<16x4xf32, #tpu.memory_space<vmem>>, vector<4x4xf32>
      %167 = arith.maximumf %166, %165 : vector<4x4xf32>
      %c0_91 = arith.constant 0 : index
      %c0_92 = arith.constant 0 : index
      %168 = vector.load %arg9[%c0_91, %c0_92] : memref<16x4xf32, #tpu.memory_space<vmem>>, vector<4x4xf32>
      tpu.vector_store %arg9[%c0_91, %c0_92], %167 {strides = array<i32>} : memref<16x4xf32, #tpu.memory_space<vmem>>, vector<4x4xf32>,
    } else {
    }
    %c8_i32_45 = arith.constant 8 : i32
    %89 = arith.cmpi sgt, %83, %c8_i32_45 : i32
    %c16_i32_46 = arith.constant 16 : i32
    %90 = arith.cmpi slt, %79, %c16_i32_46 : i32
    %91 = arith.andi %89, %90 : i1
    %92 = arith.extui %91 : i1 to i32
    %c0_i32_47 = arith.constant 0 : i32
    %93 = arith.cmpi ne, %92, %c0_i32_47 : i32
    scf.if %93 {
      %152 = tpu.iota {dimensions = array<i32: 1>} : vector<1x8x1xi32>
      %c8_i32_83 = arith.constant 8 : i32
      %153 = vector.broadcast %c8_i32_83 : i32 to vector<1x8x1xi32>
      %154 = arith.addi %152, %153 : vector<1x8x1xi32>
      %155 = vector.broadcast %79 : i32 to vector<1x8x1xi32>
      %156 = arith.cmpi sge, %154, %155 : vector<1x8x1xi32>
      %157 = vector.broadcast %83 : i32 to vector<1x8x1xi32>
      %158 = arith.cmpi slt, %154, %157 : vector<1x8x1xi32>
      %159 = arith.andi %156, %158 : vector<1x8x1xi1>
      %c0_84 = arith.constant 0 : index
      %c8 = arith.constant 8 : index
      %c0_85 = arith.constant 0 : index
      %160 = vector.load %arg8[%c0_84, %c8, %c0_85] : memref<4x16x4xf32, #tpu.memory_space<vmem>>, vector<4x8x4xf32>
      %cst_86 = arith.constant 0xFF800000 : f32
      %161 = vector.shape_cast %159 : vector<1x8x1xi1> to vector<1x8x1xi1>
      %162 = vector.broadcast %161 : vector<1x8x1xi1> to vector<4x8x4xi1>
      %163 = vector.broadcast %cst_86 : f32 to vector<4x8x4xf32>
      %164 = arith.select %162, %160, %163 : vector<4x8x4xi1>, vector<4x8x4xf32>
      %cst_87 = arith.constant dense<0xFF800000> : vector<4x4xf32>
      %165 = vector.multi_reduction <maximumf>, %164, %cst_87 [1] : vector<4x8x4xf32> to vector<4x4xf32>
      %c0_88 = arith.constant 0 : index
      %c0_89 = arith.constant 0 : index
      %166 = vector.load %arg9[%c0_88, %c0_89] : memref<16x4xf32, #tpu.memory_space<vmem>>, vector<4x4xf32>
      %167 = arith.maximumf %166, %165 : vector<4x4xf32>
      %c0_90 = arith.constant 0 : index
      %c0_91 = arith.constant 0 : index
      %168 = vector.load %arg9[%c0_90, %c0_91] : memref<16x4xf32, #tpu.memory_space<vmem>>, vector<4x4xf32>
      tpu.vector_store %arg9[%c0_90, %c0_91], %167 {strides = array<i32>} : memref<16x4xf32, #tpu.memory_space<vmem>>, vector<4x4xf32>,
    } else {
    }
    %c4_i32_48 = arith.constant 4 : i32
    %94 = arith.muli %arg0, %c4_i32_48 : i32
    %c1_i32_49 = arith.constant 1 : i32
    %95 = arith.addi %94, %c1_i32_49 : i32
    %96 = arith.index_cast %95 : i32 to index
    %97 = memref.load %arg2[%96] : memref<24xi32, #tpu.memory_space<smem>>
    %c4_i32_50 = arith.constant 4 : i32
    %98 = arith.muli %arg0, %c4_i32_50 : i32
    %c1_i32_51 = arith.constant 1 : i32
    %99 = arith.addi %98, %c1_i32_51 : i32
    %100 = arith.index_cast %99 : i32 to index
    %101 = memref.load %arg3[%100] : memref<24xi32, #tpu.memory_space<smem>>
    %c0_i32_52 = arith.constant 0 : i32
    %102 = arith.cmpi sgt, %101, %c0_i32_52 : i32
    %c8_i32_53 = arith.constant 8 : i32
    %103 = arith.cmpi slt, %97, %c8_i32_53 : i32
    %104 = arith.andi %102, %103 : i1
    %105 = arith.extui %104 : i1 to i32
    %c0_i32_54 = arith.constant 0 : i32
    %106 = arith.cmpi ne, %105, %c0_i32_54 : i32
    scf.if %106 {
      %152 = tpu.iota {dimensions = array<i32: 1>} : vector<1x8x1xi32>
      %c0_i32_83 = arith.constant 0 : i32
      %153 = vector.broadcast %c0_i32_83 : i32 to vector<1x8x1xi32>
      %154 = arith.addi %152, %153 : vector<1x8x1xi32>
      %155 = vector.broadcast %97 : i32 to vector<1x8x1xi32>
      %156 = arith.cmpi sge, %154, %155 : vector<1x8x1xi32>
      %157 = vector.broadcast %101 : i32 to vector<1x8x1xi32>
      %158 = arith.cmpi slt, %154, %157 : vector<1x8x1xi32>
      %159 = arith.andi %156, %158 : vector<1x8x1xi1>
      %c0_84 = arith.constant 0 : index
      %c0_85 = arith.constant 0 : index
      %c0_86 = arith.constant 0 : index
      %160 = vector.load %arg8[%c0_84, %c0_85, %c0_86] : memref<4x16x4xf32, #tpu.memory_space<vmem>>, vector<4x8x4xf32>
      %cst_87 = arith.constant 0xFF800000 : f32
      %161 = vector.shape_cast %159 : vector<1x8x1xi1> to vector<1x8x1xi1>
      %162 = vector.broadcast %161 : vector<1x8x1xi1> to vector<4x8x4xi1>
      %163 = vector.broadcast %cst_87 : f32 to vector<4x8x4xf32>
      %164 = arith.select %162, %160, %163 : vector<4x8x4xi1>, vector<4x8x4xf32>
      %cst_88 = arith.constant dense<0xFF800000> : vector<4x4xf32>
      %165 = vector.multi_reduction <maximumf>, %164, %cst_88 [1] : vector<4x8x4xf32> to vector<4x4xf32>
      %c4 = arith.constant 4 : index
      %c0_89 = arith.constant 0 : index
      %166 = vector.load %arg9[%c4, %c0_89] : memref<16x4xf32, #tpu.memory_space<vmem>>, vector<4x4xf32>
      %167 = arith.maximumf %166, %165 : vector<4x4xf32>
      %c4_90 = arith.constant 4 : index
      %c0_91 = arith.constant 0 : index
      %168 = vector.load %arg9[%c4_90, %c0_91] : memref<16x4xf32, #tpu.memory_space<vmem>>, vector<4x4xf32>
      tpu.vector_store %arg9[%c4_90, %c0_91], %167 {strides = array<i32>} : memref<16x4xf32, #tpu.memory_space<vmem>>, vector<4x4xf32>,
    } else {
    }
    %c8_i32_55 = arith.constant 8 : i32
    %107 = arith.cmpi sgt, %101, %c8_i32_55 : i32
    %c16_i32_56 = arith.constant 16 : i32
    %108 = arith.cmpi slt, %97, %c16_i32_56 : i32
    %109 = arith.andi %107, %108 : i1
    %110 = arith.extui %109 : i1 to i32
    %c0_i32_57 = arith.constant 0 : i32
    %111 = arith.cmpi ne, %110, %c0_i32_57 : i32
    scf.if %111 {
      %152 = tpu.iota {dimensions = array<i32: 1>} : vector<1x8x1xi32>
      %c8_i32_83 = arith.constant 8 : i32
      %153 = vector.broadcast %c8_i32_83 : i32 to vector<1x8x1xi32>
      %154 = arith.addi %152, %153 : vector<1x8x1xi32>
      %155 = vector.broadcast %97 : i32 to vector<1x8x1xi32>
      %156 = arith.cmpi sge, %154, %155 : vector<1x8x1xi32>
      %157 = vector.broadcast %101 : i32 to vector<1x8x1xi32>
      %158 = arith.cmpi slt, %154, %157 : vector<1x8x1xi32>
      %159 = arith.andi %156, %158 : vector<1x8x1xi1>
      %c0_84 = arith.constant 0 : index
      %c8 = arith.constant 8 : index
      %c0_85 = arith.constant 0 : index
      %160 = vector.load %arg8[%c0_84, %c8, %c0_85] : memref<4x16x4xf32, #tpu.memory_space<vmem>>, vector<4x8x4xf32>
      %cst_86 = arith.constant 0xFF800000 : f32
      %161 = vector.shape_cast %159 : vector<1x8x1xi1> to vector<1x8x1xi1>
      %162 = vector.broadcast %161 : vector<1x8x1xi1> to vector<4x8x4xi1>
      %163 = vector.broadcast %cst_86 : f32 to vector<4x8x4xf32>
      %164 = arith.select %162, %160, %163 : vector<4x8x4xi1>, vector<4x8x4xf32>
      %cst_87 = arith.constant dense<0xFF800000> : vector<4x4xf32>
      %165 = vector.multi_reduction <maximumf>, %164, %cst_87 [1] : vector<4x8x4xf32> to vector<4x4xf32>
      %c4 = arith.constant 4 : index
      %c0_88 = arith.constant 0 : index
      %166 = vector.load %arg9[%c4, %c0_88] : memref<16x4xf32, #tpu.memory_space<vmem>>, vector<4x4xf32>
      %167 = arith.maximumf %166, %165 : vector<4x4xf32>
      %c4_89 = arith.constant 4 : index
      %c0_90 = arith.constant 0 : index
      %168 = vector.load %arg9[%c4_89, %c0_90] : memref<16x4xf32, #tpu.memory_space<vmem>>, vector<4x4xf32>
      tpu.vector_store %arg9[%c4_89, %c0_90], %167 {strides = array<i32>} : memref<16x4xf32, #tpu.memory_space<vmem>>, vector<4x4xf32>,
    } else {
    }
    %c4_i32_58 = arith.constant 4 : i32
    %112 = arith.muli %arg0, %c4_i32_58 : i32
    %c2_i32_59 = arith.constant 2 : i32
    %113 = arith.addi %112, %c2_i32_59 : i32
    %114 = arith.index_cast %113 : i32 to index
    %115 = memref.load %arg2[%114] : memref<24xi32, #tpu.memory_space<smem>>
    %c4_i32_60 = arith.constant 4 : i32
    %116 = arith.muli %arg0, %c4_i32_60 : i32
    %c2_i32_61 = arith.constant 2 : i32
    %117 = arith.addi %116, %c2_i32_61 : i32
    %118 = arith.index_cast %117 : i32 to index
    %119 = memref.load %arg3[%118] : memref<24xi32, #tpu.memory_space<smem>>
    %c0_i32_62 = arith.constant 0 : i32
    %120 = arith.cmpi sgt, %119, %c0_i32_62 : i32
    %c8_i32_63 = arith.constant 8 : i32
    %121 = arith.cmpi slt, %115, %c8_i32_63 : i32
    %122 = arith.andi %120, %121 : i1
    %123 = arith.extui %122 : i1 to i32
    %c0_i32_64 = arith.constant 0 : i32
    %124 = arith.cmpi ne, %123, %c0_i32_64 : i32
    scf.if %124 {
      %152 = tpu.iota {dimensions = array<i32: 1>} : vector<1x8x1xi32>
      %c0_i32_83 = arith.constant 0 : i32
      %153 = vector.broadcast %c0_i32_83 : i32 to vector<1x8x1xi32>
      %154 = arith.addi %152, %153 : vector<1x8x1xi32>
      %155 = vector.broadcast %115 : i32 to vector<1x8x1xi32>
      %156 = arith.cmpi sge, %154, %155 : vector<1x8x1xi32>
      %157 = vector.broadcast %119 : i32 to vector<1x8x1xi32>
      %158 = arith.cmpi slt, %154, %157 : vector<1x8x1xi32>
      %159 = arith.andi %156, %158 : vector<1x8x1xi1>
      %c0_84 = arith.constant 0 : index
      %c0_85 = arith.constant 0 : index
      %c0_86 = arith.constant 0 : index
      %160 = vector.load %arg8[%c0_84, %c0_85, %c0_86] : memref<4x16x4xf32, #tpu.memory_space<vmem>>, vector<4x8x4xf32>
      %cst_87 = arith.constant 0xFF800000 : f32
      %161 = vector.shape_cast %159 : vector<1x8x1xi1> to vector<1x8x1xi1>
      %162 = vector.broadcast %161 : vector<1x8x1xi1> to vector<4x8x4xi1>
      %163 = vector.broadcast %cst_87 : f32 to vector<4x8x4xf32>
      %164 = arith.select %162, %160, %163 : vector<4x8x4xi1>, vector<4x8x4xf32>
      %cst_88 = arith.constant dense<0xFF800000> : vector<4x4xf32>
      %165 = vector.multi_reduction <maximumf>, %164, %cst_88 [1] : vector<4x8x4xf32> to vector<4x4xf32>
      %c8 = arith.constant 8 : index
      %c0_89 = arith.constant 0 : index
      %166 = vector.load %arg9[%c8, %c0_89] : memref<16x4xf32, #tpu.memory_space<vmem>>, vector<4x4xf32>
      %167 = arith.maximumf %166, %165 : vector<4x4xf32>
      %c8_90 = arith.constant 8 : index
      %c0_91 = arith.constant 0 : index
      %168 = vector.load %arg9[%c8_90, %c0_91] : memref<16x4xf32, #tpu.memory_space<vmem>>, vector<4x4xf32>
      tpu.vector_store %arg9[%c8_90, %c0_91], %167 {strides = array<i32>} : memref<16x4xf32, #tpu.memory_space<vmem>>, vector<4x4xf32>,
    } else {
    }
    %c8_i32_65 = arith.constant 8 : i32
    %125 = arith.cmpi sgt, %119, %c8_i32_65 : i32
    %c16_i32_66 = arith.constant 16 : i32
    %126 = arith.cmpi slt, %115, %c16_i32_66 : i32
    %127 = arith.andi %125, %126 : i1
    %128 = arith.extui %127 : i1 to i32
    %c0_i32_67 = arith.constant 0 : i32
    %129 = arith.cmpi ne, %128, %c0_i32_67 : i32
    scf.if %129 {
      %152 = tpu.iota {dimensions = array<i32: 1>} : vector<1x8x1xi32>
      %c8_i32_83 = arith.constant 8 : i32
      %153 = vector.broadcast %c8_i32_83 : i32 to vector<1x8x1xi32>
      %154 = arith.addi %152, %153 : vector<1x8x1xi32>
      %155 = vector.broadcast %115 : i32 to vector<1x8x1xi32>
      %156 = arith.cmpi sge, %154, %155 : vector<1x8x1xi32>
      %157 = vector.broadcast %119 : i32 to vector<1x8x1xi32>
      %158 = arith.cmpi slt, %154, %157 : vector<1x8x1xi32>
      %159 = arith.andi %156, %158 : vector<1x8x1xi1>
      %c0_84 = arith.constant 0 : index
      %c8 = arith.constant 8 : index
      %c0_85 = arith.constant 0 : index
      %160 = vector.load %arg8[%c0_84, %c8, %c0_85] : memref<4x16x4xf32, #tpu.memory_space<vmem>>, vector<4x8x4xf32>
      %cst_86 = arith.constant 0xFF800000 : f32
      %161 = vector.shape_cast %159 : vector<1x8x1xi1> to vector<1x8x1xi1>
      %162 = vector.broadcast %161 : vector<1x8x1xi1> to vector<4x8x4xi1>
      %163 = vector.broadcast %cst_86 : f32 to vector<4x8x4xf32>
      %164 = arith.select %162, %160, %163 : vector<4x8x4xi1>, vector<4x8x4xf32>
      %cst_87 = arith.constant dense<0xFF800000> : vector<4x4xf32>
      %165 = vector.multi_reduction <maximumf>, %164, %cst_87 [1] : vector<4x8x4xf32> to vector<4x4xf32>
      %c8_88 = arith.constant 8 : index
      %c0_89 = arith.constant 0 : index
      %166 = vector.load %arg9[%c8_88, %c0_89] : memref<16x4xf32, #tpu.memory_space<vmem>>, vector<4x4xf32>
      %167 = arith.maximumf %166, %165 : vector<4x4xf32>
      %c8_90 = arith.constant 8 : index
      %c0_91 = arith.constant 0 : index
      %168 = vector.load %arg9[%c8_90, %c0_91] : memref<16x4xf32, #tpu.memory_space<vmem>>, vector<4x4xf32>
      tpu.vector_store %arg9[%c8_90, %c0_91], %167 {strides = array<i32>} : memref<16x4xf32, #tpu.memory_space<vmem>>, vector<4x4xf32>,
    } else {
    }
    %c4_i32_68 = arith.constant 4 : i32
    %130 = arith.muli %arg0, %c4_i32_68 : i32
    %c3_i32_69 = arith.constant 3 : i32
    %131 = arith.addi %130, %c3_i32_69 : i32
    %132 = arith.index_cast %131 : i32 to index
    %133 = memref.load %arg2[%132] : memref<24xi32, #tpu.memory_space<smem>>
    %c4_i32_70 = arith.constant 4 : i32
    %134 = arith.muli %arg0, %c4_i32_70 : i32
    %c3_i32_71 = arith.constant 3 : i32
    %135 = arith.addi %134, %c3_i32_71 : i32
    %136 = arith.index_cast %135 : i32 to index
    %137 = memref.load %arg3[%136] : memref<24xi32, #tpu.memory_space<smem>>
    %c0_i32_72 = arith.constant 0 : i32
    %138 = arith.cmpi sgt, %137, %c0_i32_72 : i32
    %c8_i32_73 = arith.constant 8 : i32
    %139 = arith.cmpi slt, %133, %c8_i32_73 : i32
    %140 = arith.andi %138, %139 : i1
    %141 = arith.extui %140 : i1 to i32
    %c0_i32_74 = arith.constant 0 : i32
    %142 = arith.cmpi ne, %141, %c0_i32_74 : i32
    scf.if %142 {
      %152 = tpu.iota {dimensions = array<i32: 1>} : vector<1x8x1xi32>
      %c0_i32_83 = arith.constant 0 : i32
      %153 = vector.broadcast %c0_i32_83 : i32 to vector<1x8x1xi32>
      %154 = arith.addi %152, %153 : vector<1x8x1xi32>
      %155 = vector.broadcast %133 : i32 to vector<1x8x1xi32>
      %156 = arith.cmpi sge, %154, %155 : vector<1x8x1xi32>
      %157 = vector.broadcast %137 : i32 to vector<1x8x1xi32>
      %158 = arith.cmpi slt, %154, %157 : vector<1x8x1xi32>
      %159 = arith.andi %156, %158 : vector<1x8x1xi1>
      %c0_84 = arith.constant 0 : index
      %c0_85 = arith.constant 0 : index
      %c0_86 = arith.constant 0 : index
      %160 = vector.load %arg8[%c0_84, %c0_85, %c0_86] : memref<4x16x4xf32, #tpu.memory_space<vmem>>, vector<4x8x4xf32>
      %cst_87 = arith.constant 0xFF800000 : f32
      %161 = vector.shape_cast %159 : vector<1x8x1xi1> to vector<1x8x1xi1>
      %162 = vector.broadcast %161 : vector<1x8x1xi1> to vector<4x8x4xi1>
      %163 = vector.broadcast %cst_87 : f32 to vector<4x8x4xf32>
      %164 = arith.select %162, %160, %163 : vector<4x8x4xi1>, vector<4x8x4xf32>
      %cst_88 = arith.constant dense<0xFF800000> : vector<4x4xf32>
      %165 = vector.multi_reduction <maximumf>, %164, %cst_88 [1] : vector<4x8x4xf32> to vector<4x4xf32>
      %c12 = arith.constant 12 : index
      %c0_89 = arith.constant 0 : index
      %166 = vector.load %arg9[%c12, %c0_89] : memref<16x4xf32, #tpu.memory_space<vmem>>, vector<4x4xf32>
      %167 = arith.maximumf %166, %165 : vector<4x4xf32>
      %c12_90 = arith.constant 12 : index
      %c0_91 = arith.constant 0 : index
      %168 = vector.load %arg9[%c12_90, %c0_91] : memref<16x4xf32, #tpu.memory_space<vmem>>, vector<4x4xf32>
      tpu.vector_store %arg9[%c12_90, %c0_91], %167 {strides = array<i32>} : memref<16x4xf32, #tpu.memory_space<vmem>>, vector<4x4xf32>,
    } else {
    }
    %c8_i32_75 = arith.constant 8 : i32
    %143 = arith.cmpi sgt, %137, %c8_i32_75 : i32
    %c16_i32_76 = arith.constant 16 : i32
    %144 = arith.cmpi slt, %133, %c16_i32_76 : i32
    %145 = arith.andi %143, %144 : i1
    %146 = arith.extui %145 : i1 to i32
    %c0_i32_77 = arith.constant 0 : i32
    %147 = arith.cmpi ne, %146, %c0_i32_77 : i32
    scf.if %147 {
      %152 = tpu.iota {dimensions = array<i32: 1>} : vector<1x8x1xi32>
      %c8_i32_83 = arith.constant 8 : i32
      %153 = vector.broadcast %c8_i32_83 : i32 to vector<1x8x1xi32>
      %154 = arith.addi %152, %153 : vector<1x8x1xi32>
      %155 = vector.broadcast %133 : i32 to vector<1x8x1xi32>
      %156 = arith.cmpi sge, %154, %155 : vector<1x8x1xi32>
      %157 = vector.broadcast %137 : i32 to vector<1x8x1xi32>
      %158 = arith.cmpi slt, %154, %157 : vector<1x8x1xi32>
      %159 = arith.andi %156, %158 : vector<1x8x1xi1>
      %c0_84 = arith.constant 0 : index
      %c8 = arith.constant 8 : index
      %c0_85 = arith.constant 0 : index
      %160 = vector.load %arg8[%c0_84, %c8, %c0_85] : memref<4x16x4xf32, #tpu.memory_space<vmem>>, vector<4x8x4xf32>
      %cst_86 = arith.constant 0xFF800000 : f32
      %161 = vector.shape_cast %159 : vector<1x8x1xi1> to vector<1x8x1xi1>
      %162 = vector.broadcast %161 : vector<1x8x1xi1> to vector<4x8x4xi1>
      %163 = vector.broadcast %cst_86 : f32 to vector<4x8x4xf32>
      %164 = arith.select %162, %160, %163 : vector<4x8x4xi1>, vector<4x8x4xf32>
      %cst_87 = arith.constant dense<0xFF800000> : vector<4x4xf32>
      %165 = vector.multi_reduction <maximumf>, %164, %cst_87 [1] : vector<4x8x4xf32> to vector<4x4xf32>
      %c12 = arith.constant 12 : index
      %c0_88 = arith.constant 0 : index
      %166 = vector.load %arg9[%c12, %c0_88] : memref<16x4xf32, #tpu.memory_space<vmem>>, vector<4x4xf32>
      %167 = arith.maximumf %166, %165 : vector<4x4xf32>
      %c12_89 = arith.constant 12 : index
      %c0_90 = arith.constant 0 : index
      %168 = vector.load %arg9[%c12_89, %c0_90] : memref<16x4xf32, #tpu.memory_space<vmem>>, vector<4x4xf32>
      tpu.vector_store %arg9[%c12_89, %c0_90], %167 {strides = array<i32>} : memref<16x4xf32, #tpu.memory_space<vmem>>, vector<4x4xf32>,
    } else {
    }
    %c0_78 = arith.constant 0 : index
    %c0_79 = arith.constant 0 : index
    %148 = vector.load %arg9[%c0_78, %c0_79] : memref<16x4xf32, #tpu.memory_space<vmem>>, vector<16x4xf32>
    %c0_80 = arith.constant 0 : index
    %c0_81 = arith.constant 0 : index
    %c0_82 = arith.constant 0 : index
    %149 = vector.load %arg7[%c0_80, %c0_81, %c0_82] : memref<1x16x4xf32, #tpu.memory_space<vmem>>, vector<1x16x4xf32>
    %150 = vector.shape_cast %149 : vector<1x16x4xf32> to vector<16x4xf32>
    %151 = vector.shape_cast %148 : vector<16x4xf32> to vector<1x16x4xf32>
    tpu.vector_store %arg7[%c0_80, %c0_81, %c0_82], %151 {strides = array<i32>} : memref<1x16x4xf32, #tpu.memory_space<vmem>>, vector<1x16x4xf32>,
    return
  }
  func.func @transform_0(%arg0: i32, %arg1: memref<6xi32, #tpu.memory_space<smem>>, %arg2: memref<24xi32, #tpu.memory_space<smem>>, %arg3: memref<24xi32, #tpu.memory_space<smem>>, %arg4: memref<24xi32, #tpu.memory_space<smem>>, %arg5: memref<24xi32, #tpu.memory_space<smem>>) -> (i32, i32, i32, i32) {
    %0 = arith.index_cast %arg0 : i32 to index
    %1 = memref.load %arg1[%0] : memref<6xi32, #tpu.memory_space<smem>>
    %c0_i32 = arith.constant 0 : i32
    %c0_i32_0 = arith.constant 0 : i32
    %c0_i32_1 = arith.constant 0 : i32
    %c0_i32_2 = arith.constant 0 : i32
    return %1, %c0_i32, %c0_i32_0, %c0_i32_1 : i32, i32, i32, i32
  }
  func.func @transform_1(%arg0: i32, %arg1: memref<6xi32, #tpu.memory_space<smem>>, %arg2: memref<24xi32, #tpu.memory_space<smem>>, %arg3: memref<24xi32, #tpu.memory_space<smem>>, %arg4: memref<24xi32, #tpu.memory_space<smem>>, %arg5: memref<24xi32, #tpu.memory_space<smem>>) -> (i32, i32, i32) {
    %c0_i32 = arith.constant 0 : i32
    %c0_i32_0 = arith.constant 0 : i32
    %c0_i32_1 = arith.constant 0 : i32
    return %arg0, %c0_i32, %c0_i32_0 : i32, i32, i32
  }
}

</mosaic_0001>

<bundles_post_ra>
// kernel: tpu_custom_call.1
= control target key start
LH: loop header
LB: loop body
LE: loop exit
PB: predicated region body
PF: predicated region fallthrough
CT: control target
= control target key end

     0   :  { %s3752_s0 = inlined_call_operand.vmem [shape: s32[6], index: 0, kind: input, shape index: {}]   ;;  %s3753_s5 = inlined_call_operand.vmem [shape: f32[2,16,16,4], index: 5, kind: input, shape index: {}]   ;;  %s3754_s6 = inlined_call_operand.vmem [shape: f32[6,16,4], index: 6, kind: output, shape index: {}]   ;;  %s3755_s1 = inlined_call_operand.vmem [shape: s32[24], index: 1, kind: input, shape index: {}]   ;;  %s3756_s2 = inlined_call_operand.vmem [shape: s32[24], index: 2, kind: input, shape index: {}]   ;;  %s3757_s3 = inlined_call_operand.vmem [shape: s32[24], index: 3, kind: input, shape index: {}]   ;;  %s3758_s4 = inlined_call_operand.vmem [shape: s32[24], index: 4, kind: input, shape index: {}]  }
   0x1   :  { %s11_s23 = sshll.u32 %s3752_s0, 4  ;;  %s15_s26 = sshll.u32 %s3755_s1, 4  ;;  %s12_s23 = int_to_ptr.vmem [resolvable:$true] %s11_s23  ;;  %s16_s26 = int_to_ptr.vmem [resolvable:$true] %s15_s26 }
   0x2   :  { %s2443_s27 = scalar_lea.vmem %s12_s23, 16  ;;  %p2448_p1 = scmp.lt.s32.totalorder %s12_s23, %s12_s23 }
   0x3   :  { %p2444_p0 = scmp.ne.s32.totalorder %s12_s23, %s2443_s27  ;;  %p2449_p2 = scmp.lt.s32.totalorder %s2443_s27, %s2443_s27 }
   0x5   :  { %p2450_p3 = por %p2449_p2, %p2448_p1 }
   0x7   :  { %p2451_p4 = pnand %p2450_p3, %p2444_p0 }
   0x9   :  { %2454 = shalt.err (!%p2451_p4)  }
   0xa   :  { %s2513_s28 = smov [#allocation5]   ;;  %s2455_s29 = scalar_lea.vmem %s16_s26, 16 }
   0xb   :  { %14 = dma.vmem_to_smem %s12_s23, 16, %s2513_s28, [#allocation4] }
   0xc   :  { %p2456_p5 = scmp.ne.s32.totalorder %s16_s26, %s2455_s29  ;;  %p2460_p6 = scmp.lt.s32.totalorder %s16_s26, %s16_s26 }
   0xd   :  { %p2461_p7 = scmp.lt.s32.totalorder %s2455_s29, %s2455_s29 }
   0xf   :  { %p2462_p8 = por %p2461_p7, %p2460_p6 }
  0x11   :  { %p2463_p9 = pnand %p2462_p8, %p2456_p5 }
  0x13   :  { %2466 = shalt.err (!%p2463_p9)  }
  0x14   :  { %s2514_s0 = smov [#allocation6]   ;;  %s19_s7 = sshll.u32 %s3756_s2, 4  ;;  %s20_s7 = int_to_ptr.vmem [resolvable:$true] %s19_s7 }
  0x15   :  { %18 = dma.vmem_to_smem %s16_s26, 16, %s2514_s0, [#allocation4] }
  0x16   :  { %s23_s10 = sshll.u32 %s3757_s3, 4  ;;  %s2467_s11 = scalar_lea.vmem %s20_s7, 16  ;;  %s24_s10 = int_to_ptr.vmem [resolvable:$true] %s23_s10 }
  0x17   :  { %p2468_p10 = scmp.ne.s32.totalorder %s20_s7, %s2467_s11  ;;  %p2472_p11 = scmp.lt.s32.totalorder %s20_s7, %s20_s7 }
  0x18   :  { %p2473_p12 = scmp.lt.s32.totalorder %s2467_s11, %s2467_s11 }
  0x1a   :  { %p2474_p13 = por %p2473_p12, %p2472_p11 }
  0x1c   :  { %p2475_p0 = pnand %p2474_p13, %p2468_p10 }
  0x1e   :  { %2478 = shalt.err (!%p2475_p0)  }
  0x1f   :  { %s2515_s12 = smov [#allocation7]   ;;  %s2479_s13 = scalar_lea.vmem %s24_s10, 16 }
  0x20   :  { %22 = dma.vmem_to_smem %s20_s7, 16, %s2515_s12, [#allocation4] }
  0x21   :  { %p2480_p1 = scmp.ne.s32.totalorder %s24_s10, %s2479_s13  ;;  %p2484_p2 = scmp.lt.s32.totalorder %s24_s10, %s24_s10 }
  0x22   :  { %p2485_p3 = scmp.lt.s32.totalorder %s2479_s13, %s2479_s13 }
  0x24   :  { %p2486_p4 = por %p2485_p3, %p2484_p2 }
  0x26   :  { %p2487_p5 = pnand %p2486_p4, %p2480_p1 }
  0x28   :  { %2490 = shalt.err (!%p2487_p5)  }
  0x29   :  { %s2516_s2 = smov [#allocation8]   ;;  %s27_s15 = sshll.u32 %s3758_s4, 4  ;;  %s28_s15 = int_to_ptr.vmem [resolvable:$true] %s27_s15 }
  0x2a   :  { %26 = dma.vmem_to_smem %s24_s10, 16, %s2516_s2, [#allocation4] }
  0x2b   :  { %s2491_s16 = scalar_lea.vmem %s28_s15, 16  ;;  %p2496_p7 = scmp.lt.s32.totalorder %s28_s15, %s28_s15 }
  0x2c   :  { %p2492_p6 = scmp.ne.s32.totalorder %s28_s15, %s2491_s16  ;;  %p2497_p8 = scmp.lt.s32.totalorder %s2491_s16, %s2491_s16 }
  0x2e   :  { %p2498_p9 = por %p2497_p8, %p2496_p7 }
  0x30   :  { %p2499_p10 = pnand %p2498_p9, %p2492_p6 }
  0x32   :  { %2502 = shalt.err (!%p2499_p10)  }
  0x33   :  { %s2517_s17 = smov [#allocation9]  }
  0x34   :  { %30 = dma.vmem_to_smem %s28_s15, 16, %s2517_s17, [#allocation4] }
  0x35   :  { %2507 = dma.done.wait [#allocation4], 80 }
  0x36   :  { %2508 = vsyncadd [#allocation4], 4294967216 }
  0x37   :  { %32 = sfence }
  0x38   :  { %s2569_s18 = smov 0  }
  0x39 LB: > { %s2415_s4 = sadd.s32 4294967295, %s2511_s18   ;;  %p2419_p11 = scmp.ge.s32.totalorder %s2511_s18, 1  ;;  %s2511_s18 = sphi %s2569_s18, %s38_s18  }
  0x3a   : > { %p118_p12 = scmp.lt.s32.totalorder %s2511_s18, 7 }
  0x3c   : > { %p119_p13 = pnand %p2419_p11, %p118_p12 }
  0x3d   : > { %s139_s19 = sld [smem:[#allocation5 + %s2415_s4]] (!%p119_p13)  ;;  %p146_p0 = scmp.lt.s32.totalorder (!%p119_p13), %s2415_s4, 5  ;;  %vm151_vm0 = vcmask (!%p119_p13), 31744   ;;  %v2518_v0 = vmov (!%p119_p13), -inf  }
  0x3e   : > { %122 = sbr.rel (%p119_p13) target bundleno = 779 (0x30b), region = 24  ;;  %152 = vst.msk [vmem:[#allocation2] sm:$0xff] (!%p119_p13), %vm151_vm0, %v2518_v0  ;;  %153 = vst.msk [vmem:[#allocation2 + $0x8] sm:$0xff] (!%p119_p13), %vm151_vm0, %v2518_v0  ;;  %s2587_s20 = sshll.u32 (!%p119_p13), %s2415_s4, 2 }
  0x3f   : > { %154 = vst.msk [vmem:[#allocation2 + $0x10] sm:$0xff] (!%p119_p13), %vm151_vm0, %v2518_v0  ;;  %155 = vst.msk [vmem:[#allocation2 + $0x18] sm:$0xff] (!%p119_p13), %vm151_vm0, %v2518_v0  ;;  %s2591_s21 = sld [smem:[#allocation8 + %s2587_s20]] (!%p119_p13) }
  0x40   : > { %156 = vst.msk [vmem:[#allocation2 + $0x20] sm:$0xff] (!%p119_p13), %vm151_vm0, %v2518_v0  ;;  %157 = vst.msk [vmem:[#allocation2 + $0x28] sm:$0xff] (!%p119_p13), %vm151_vm0, %v2518_v0  ;;  %s2594_s22 = sld [smem:[#allocation9 + %s2587_s20]] (!%p119_p13) }
  0x41   : > { %158 = vst.msk [vmem:[#allocation2 + $0x30] sm:$0xff] (!%p119_p13), %vm151_vm0, %v2518_v0  ;;  %159 = vst.msk [vmem:[#allocation2 + $0x38] sm:$0xff] (!%p119_p13), %vm151_vm0, %v2518_v0 }
  0x42   : > { %160 = vst.msk [vmem:[#allocation3] sm:$0xff] (!%p119_p13), %vm151_vm0, %v2518_v0  ;;  %161 = vst.msk [vmem:[#allocation3 + $0x8] sm:$0xff] (!%p119_p13), %vm151_vm0, %v2518_v0 }
  0x43   : > { %p140_p1 = scmp.lt.s32.totalorder (!%p119_p13), %s139_s19, 1 }
  0x45   : > { %s3776_s4 = smov (!%p146_p0, %s2415_s4), 5  ;;  %s3778_s19 = smov (!%p140_p1, %s139_s19), 1 }
  0x46   : > { %s2428_s23 = sshll.u32 %s3776_s4, 4  ;;  %p165_p2 = scmp.gt.s32.totalorder %s2594_s22, 0 }
  0x47   : > { %s2599_s26 = scalar_lea.vmem %s3754_s6, %s2428_s23  ;;  %p166_p3 = scmp.lt.s32.totalorder %s2591_s21, 8 }
  0x48   : > { %s2427_s27 = sshll.u32 %s3778_s19, 8 }
  0x49   : > { %s2606_s0 = scalar_lea.vmem %s3753_s5, %s2427_s27  ;;  %p167_p4 = pnand %p166_p3, %p165_p2 }
  0x4a   : > { %v171_v1 = vlaneseq (!%p167_p4)  ;;  %v173_v2 = vstv (!%p167_p4), %s2591_s21  ;;  %v175_v3 = vstv (!%p167_p4), %s2594_s22  ;;  %v178_v5 = vld [vmem:[%s2606_s0] sm:$0xff] (!%p167_p4)  ;;  %v179_v6 = vld [vmem:[%s2606_s0 + $0x10] sm:$0xff] (!%p167_p4)  ;;  %vm342_vm4 = vcmask (!%p167_p4), 1041409  }
  0x4b   : > { %170 = sbr.rel (%p167_p4) target bundleno = 121 (0x79), region = 28  ;;  %v180_v7 = vld [vmem:[%s2606_s0 + $0x20] sm:$0xff] (!%p167_p4)  ;;  %v181_v8 = vld [vmem:[%s2606_s0 + $0x30] sm:$0xff] (!%p167_p4)  ;;  %vm344_vm5 = vcmask (!%p167_p4), 1042434   ;;  %vm346_vm6 = vcmask (!%p167_p4), 1043459   ;;  %vm348_vm7 = vcmask (!%p167_p4), 1044484  }
  0x4c   : > { %v172_v4 = vshrl.u32 (!%p167_p4), %v171_v1, 7  ;;  %v182_v9 = vld [vmem:[%s2606_s0 + $0x40] sm:$0xff] (!%p167_p4)  ;;  %v183_v10 = vld [vmem:[%s2606_s0 + $0x50] sm:$0xff] (!%p167_p4)  ;;  %vm350_vm8 = vcmask (!%p167_p4), 1045509   ;;  %vm352_vm9 = vcmask (!%p167_p4), 1046534   ;;  %vm354_vm10 = vcmask (!%p167_p4), 1047559  }
  0x4d   : > { %v184_v11 = vld [vmem:[%s2606_s0 + $0x60] sm:$0xff] (!%p167_p4)  ;;  %v185_v13 = vld [vmem:[%s2606_s0 + $0x70] sm:$0xff] (!%p167_p4) }
  0x4e   : > { %vm174_vm1 = vcmp.ge.s32.totalorder (!%p167_p4), %v172_v4, %v173_v2  ;;  %vm176_vm2 = vcmp.lt.s32.totalorder (!%p167_p4), %v172_v4, %v175_v3  ;;  %v2623_v14 = vld [vmem:[%s2606_s0 + $0x80] sm:$0xff] (!%p167_p4)  ;;  %v2626_v15 = vld [vmem:[%s2606_s0 + $0x90] sm:$0xff] (!%p167_p4) }
  0x4f   : > { %vm2617_vm3 = vmand (!%p167_p4), %vm174_vm1, %vm176_vm2  ;;  %v2629_v16 = vld [vmem:[%s2606_s0 + $0xa0] sm:$0xff] (!%p167_p4)  ;;  %v2632_v17 = vld [vmem:[%s2606_s0 + $0xb0] sm:$0xff] (!%p167_p4) }
  0x50   : > { %v196_v18 = vsel (!%p167_p4), %vm2617_vm3, %v178_v5, -inf  ;;  %v197_v19 = vsel (!%p167_p4), %vm2617_vm3, %v179_v6, -inf  ;;  %v198_v20 = vsel (!%p167_p4), %vm2617_vm3, %v180_v7, -inf  ;;  %v199_v21 = vsel (!%p167_p4), %vm2617_vm3, %v181_v8, -inf  ;;  %v190_v58 = vld [vmem:[%s2606_s0 + $0xc0] sm:$0xff] (!%p167_p4)  ;;  %v191_v59 = vld [vmem:[%s2606_s0 + $0xd0] sm:$0xff] (!%p167_p4) }
  0x51   : > { %v200_v22 = vsel (!%p167_p4), %vm2617_vm3, %v182_v9, -inf  ;;  %v201_v23 = vsel (!%p167_p4), %vm2617_vm3, %v183_v10, -inf  ;;  %v202_v24 = vsel (!%p167_p4), %vm2617_vm3, %v184_v11, -inf  ;;  %v203_v25 = vsel (!%p167_p4), %vm2617_vm3, %v185_v13, -inf  ;;  %v192_v0 = vld [vmem:[%s2606_s0 + $0xe0] sm:$0xff] (!%p167_p4)  ;;  %v193_v1 = vld [vmem:[%s2606_s0 + $0xf0] sm:$0xff] (!%p167_p4) }
  0x52   : > { %v204_v26 = vsel %vm2617_vm3, %v2623_v14, -inf  ;;  %v205_v27 = vsel %vm2617_vm3, %v2626_v15, -inf  ;;  %v206_v28 = vsel %vm2617_vm3, %v2629_v16, -inf  ;;  %v207_v29 = vsel %vm2617_vm3, %v2632_v17, -inf }
  0x53   : > { %v212_v30 = vsel %vm151_vm0, %v196_v18, -inf  ;;  %v219_v31 = vsel %vm151_vm0, %v197_v19, -inf  ;;  %v226_v32 = vsel %vm151_vm0, %v198_v20, -inf  ;;  %v233_v33 = vsel %vm151_vm0, %v199_v21, -inf }
  0x54   : > { %v213_v34 = vrot.slane %v212_v30, 4  ;;  %v220_v35 = vrot.slane %v219_v31, 4  ;;  %v227_v36 = vrot.slane %v226_v32, 4  ;;  %v234_v37 = vrot.slane %v233_v33, 4 }
  0x55   : > { %v240_v38 = vsel %vm151_vm0, %v200_v22, -inf  ;;  %v247_v39 = vsel %vm151_vm0, %v201_v23, -inf  ;;  %v254_v40 = vsel %vm151_vm0, %v202_v24, -inf  ;;  %v261_v41 = vsel %vm151_vm0, %v203_v25, -inf }
  0x56   : > { %v214_v42 = vmax.f32 %v212_v30, %v213_v34  ;;  %v221_v43 = vmax.f32 %v219_v31, %v220_v35  ;;  %v228_v44 = vmax.f32 %v226_v32, %v227_v36  ;;  %v235_v45 = vmax.f32 %v233_v33, %v234_v37 }
  0x57   : > { %v241_v46 = vrot.slane %v240_v38, 4  ;;  %v248_v47 = vrot.slane %v247_v39, 4  ;;  %v255_v48 = vrot.slane %v254_v40, 4  ;;  %v262_v49 = vrot.slane %v261_v41, 4 }
  0x58   : > { %v215_v50 = vrot.slane %v214_v42, 2  ;;  %v222_v51 = vrot.slane %v221_v43, 2  ;;  %v229_v52 = vrot.slane %v228_v44, 2  ;;  %v236_v53 = vrot.slane %v235_v45, 2 }
  0x59   : > { %v242_v54 = vmax.f32 %v240_v38, %v241_v46  ;;  %v249_v55 = vmax.f32 %v247_v39, %v248_v47  ;;  %v256_v56 = vmax.f32 %v254_v40, %v255_v48  ;;  %v263_v57 = vmax.f32 %v261_v41, %v262_v49 }
  0x5a   : > { %v216_v60 = vmax.f32 %v214_v42, %v215_v50  ;;  %v223_v61 = vmax.f32 %v221_v43, %v222_v51  ;;  %v230_v62 = vmax.f32 %v228_v44, %v229_v52  ;;  %v237_v63 = vmax.f32 %v235_v45, %v236_v53 }
  0x5b   : > { %v243_v2 = vrot.slane %v242_v54, 2  ;;  %v250_v3 = vrot.slane %v249_v55, 2  ;;  %v257_v4 = vrot.slane %v256_v56, 2  ;;  %v264_v5 = vrot.slane %v263_v57, 2 }
  0x5c   : > { %v217_v6 = vrot.slane %v216_v60, 1  ;;  %v224_v7 = vrot.slane %v223_v61, 1  ;;  %v231_v8 = vrot.slane %v230_v62, 1  ;;  %v238_v9 = vrot.slane %v237_v63, 1 }
  0x5d   : > { %v2674_v10 = vmax.f32 %v242_v54, %v243_v2  ;;  %v2676_v11 = vmax.f32 %v249_v55, %v250_v3  ;;  %v2678_v13 = vmax.f32 %v256_v56, %v257_v4  ;;  %v2680_v14 = vmax.f32 %v263_v57, %v264_v5 }
  0x5e   : > { %v208_v15 = vsel %vm2617_vm3, %v190_v58, -inf  ;;  %v209_v16 = vsel %vm2617_vm3, %v191_v59, -inf  ;;  %v210_v17 = vsel %vm2617_vm3, %v192_v0, -inf  ;;  %v211_v18 = vsel %vm2617_vm3, %v193_v1, -inf }
  0x5f   : > { %v2690_v19 = vmax.f32 %v216_v60, %v217_v6  ;;  %v2692_v20 = vmax.f32 %v223_v61, %v224_v7  ;;  %v2694_v21 = vmax.f32 %v230_v62, %v231_v8  ;;  %v2696_v22 = vmax.f32 %v237_v63, %v238_v9 }
  0x60   : > { %v268_v23 = vsel %vm151_vm0, %v204_v26, -inf  ;;  %v275_v24 = vsel %vm151_vm0, %v205_v27, -inf  ;;  %v282_v25 = vsel %vm151_vm0, %v206_v28, -inf  ;;  %v289_v30 = vsel %vm151_vm0, %v207_v29, -inf }
  0x61   : > { %v245_v31 = vrot.slane %v2674_v10, 1  ;;  %v252_v12 = vrot.slane %v2676_v11, 1  ;;  %v259_v32 = vrot.slane %v2678_v13, 1  ;;  %v266_v33 = vrot.slane %v2680_v14, 1 }
  0x62   : > { %v269_v34 = vrot.slane %v268_v23, 4  ;;  %v276_v35 = vrot.slane %v275_v24, 4  ;;  %v283_v36 = vrot.slane %v282_v25, 4  ;;  %v290_v37 = vrot.slane %v289_v30, 4 }
  0x63   : > { %v296_v26 = vsel %vm151_vm0, %v208_v15, -inf  ;;  %v303_v27 = vsel %vm151_vm0, %v209_v16, -inf  ;;  %v310_v28 = vsel %vm151_vm0, %v210_v17, -inf  ;;  %v317_v29 = vsel %vm151_vm0, %v211_v18, -inf }
  0x64   : > { %v270_v38 = vmax.f32 %v268_v23, %v269_v34  ;;  %v277_v39 = vmax.f32 %v275_v24, %v276_v35  ;;  %v284_v40 = vmax.f32 %v282_v25, %v283_v36  ;;  %v291_v41 = vmax.f32 %v289_v30, %v290_v37 }
  0x65   : > { %v297_v42 = vrot.slane %v296_v26, 4  ;;  %v304_v43 = vrot.slane %v303_v27, 4  ;;  %v311_v44 = vrot.slane %v310_v28, 4  ;;  %v318_v45 = vrot.slane %v317_v29, 4 }
  0x66   : > { %v271_v46 = vrot.slane %v270_v38, 2  ;;  %v278_v47 = vrot.slane %v277_v39, 2  ;;  %v285_v48 = vrot.slane %v284_v40, 2  ;;  %v292_v49 = vrot.slane %v291_v41, 2 }
  0x67   : > { %v298_v50 = vmax.f32 %v296_v26, %v297_v42  ;;  %v305_v51 = vmax.f32 %v303_v27, %v304_v43  ;;  %v312_v52 = vmax.f32 %v310_v28, %v311_v44  ;;  %v319_v53 = vmax.f32 %v317_v29, %v318_v45  ;;  %v325_v27 = vld [vmem:[#allocation2 + $0x8] sm:$0xff] }
  0x68   : > { %v272_v54 = vmax.f32 %v270_v38, %v271_v46  ;;  %v279_v55 = vmax.f32 %v277_v39, %v278_v47  ;;  %v286_v56 = vmax.f32 %v284_v40, %v285_v48  ;;  %v293_v57 = vmax.f32 %v291_v41, %v292_v49 }
  0x69   : > { %v299_v58 = vrot.slane %v298_v50, 2  ;;  %v306_v59 = vrot.slane %v305_v51, 2  ;;  %v313_v60 = vrot.slane %v312_v52, 2  ;;  %v320_v61 = vrot.slane %v319_v53, 2 }
  0x6a   : > { %v273_v62 = vrot.slane %v272_v54, 1  ;;  %v280_v63 = vrot.slane %v279_v55, 1  ;;  %v287_v0 = vrot.slane %v286_v56, 1  ;;  %v294_v1 = vrot.slane %v293_v57, 1 }
  0x6b   : > { %v300_v2 = vmax.f32 %v298_v50, %v299_v58  ;;  %v307_v3 = vmax.f32 %v305_v51, %v306_v59  ;;  %v314_v4 = vmax.f32 %v312_v52, %v313_v60  ;;  %v321_v5 = vmax.f32 %v319_v53, %v320_v61 }
  0x6c   : > { %v274_v6 = vmax.f32 %v272_v54, %v273_v62  ;;  %v281_v7 = vmax.f32 %v279_v55, %v280_v63  ;;  %v288_v8 = vmax.f32 %v286_v56, %v287_v0  ;;  %v295_v9 = vmax.f32 %v293_v57, %v294_v1 }
  0x6d   : > { %v301_v15 = vrot.slane %v300_v2, 1  ;;  %v308_v16 = vrot.slane %v307_v3, 1  ;;  %v315_v17 = vrot.slane %v314_v4, 1  ;;  %v322_v18 = vrot.slane %v321_v5, 1 }
  0x6e   : > { %v246_v23 = vmax.f32 %v2674_v10, %v245_v31  ;;  %v343_v24 = vsel %vm342_vm4, %v2692_v20, %v2690_v19  ;;  %v356_v25 = vsel %vm342_vm4, %v281_v7, %v274_v6  ;;  %v253_v30 = vmax.f32 %v2676_v11, %v252_v12 }
  0x6f   : > { %v302_v34 = vmax.f32 %v300_v2, %v301_v15  ;;  %v309_v35 = vmax.f32 %v307_v3, %v308_v16  ;;  %v260_v36 = vmax.f32 %v2678_v13, %v259_v32  ;;  %v316_v37 = vmax.f32 %v314_v4, %v315_v17  ;;  %v324_v32 = vld [vmem:[#allocation2] sm:$0xff] }
  0x70   : > { %v345_v26 = vsel %vm344_vm5, %v2694_v21, %v343_v24  ;;  %v357_v10 = vsel %vm344_vm5, %v288_v8, %v356_v25  ;;  %v267_v19 = vmax.f32 %v2680_v14, %v266_v33  ;;  %v323_v20 = vmax.f32 %v321_v5, %v322_v18 }
  0x71   : > { %v347_v31 = vsel %vm346_vm6, %v2696_v22, %v345_v26  ;;  %v358_v11 = vsel %vm346_vm6, %v295_v9, %v357_v10 }
  0x72   : > { %v349_v12 = vsel %vm348_vm7, %v246_v23, %v347_v31  ;;  %v359_v13 = vsel %vm348_vm7, %v302_v34, %v358_v11 }
  0x73   : > { %v351_v21 = vsel %vm350_vm8, %v253_v30, %v349_v12  ;;  %v360_v28 = vsel %vm350_vm8, %v309_v35, %v359_v13 }
  0x74   : > { %v353_v29 = vsel %vm352_vm9, %v260_v36, %v351_v21  ;;  %v361_v14 = vsel %vm352_vm9, %v316_v37, %v360_v28 }
  0x75   : > { %v355_v33 = vsel %vm354_vm10, %v267_v19, %v353_v29  ;;  %v362_v38 = vsel %vm354_vm10, %v323_v20, %v361_v14 }
  0x76   : > { %v365_v22 = vmax.f32 %v324_v32, %v355_v33  ;;  %v366_v39 = vmax.f32 %v325_v27, %v362_v38 }
  0x78   : > { %367 = vst.msk [vmem:[#allocation2] sm:$0xff] %vm151_vm0, %v365_v22  ;;  %368 = vst.msk [vmem:[#allocation2 + $0x8] sm:$0xff] %vm151_vm0, %v366_v39 }
  0x79 PF: > { %p369_p5 = scmp.gt.s32.totalorder %s2594_s22, 8  ;;  %p370_p6 = scmp.lt.s32.totalorder %s2591_s21, 16 }
  0x7b   : > { %p371_p7 = pnand %p370_p6, %p369_p5 }
  0x7c   : > { %v375_v40 = vlaneseq (!%p371_p7)  ;;  %v378_v42 = vstv (!%p371_p7), %s2591_s21  ;;  %v380_v43 = vstv (!%p371_p7), %s2594_s22  ;;  %v383_v45 = vld [vmem:[%s2606_s0 + $0x8] sm:$0xff] (!%p371_p7)  ;;  %v384_v46 = vld [vmem:[%s2606_s0 + $0x18] sm:$0xff] (!%p371_p7)  ;;  %vm547_vm14 = vcmask (!%p371_p7), 1041409  }
  0x7d   : > { %374 = sbr.rel (%p371_p7) target bundleno = 173 (0xad), region = 32  ;;  %v385_v47 = vld [vmem:[%s2606_s0 + $0x28] sm:$0xff] (!%p371_p7)  ;;  %v386_v48 = vld [vmem:[%s2606_s0 + $0x38] sm:$0xff] (!%p371_p7)  ;;  %vm549_vm15 = vcmask (!%p371_p7), 1042434   ;;  %vm551_vm1 = vcmask (!%p371_p7), 1043459   ;;  %vm553_vm2 = vcmask (!%p371_p7), 1044484  }
  0x7e   : > { %v376_v41 = vshrl.u32 (!%p371_p7), %v375_v40, 7  ;;  %v387_v49 = vld [vmem:[%s2606_s0 + $0x48] sm:$0xff] (!%p371_p7)  ;;  %v388_v50 = vld [vmem:[%s2606_s0 + $0x58] sm:$0xff] (!%p371_p7)  ;;  %vm555_vm3 = vcmask (!%p371_p7), 1045509   ;;  %vm557_vm4 = vcmask (!%p371_p7), 1046534   ;;  %vm559_vm5 = vcmask (!%p371_p7), 1047559  }
  0x7f   : > { %v389_v51 = vld [vmem:[%s2606_s0 + $0x68] sm:$0xff] (!%p371_p7)  ;;  %v390_v53 = vld [vmem:[%s2606_s0 + $0x78] sm:$0xff] (!%p371_p7) }
  0x80   : > { %v377_v44 = vadd.s32 (!%p371_p7), 8, %v376_v41  ;;  %v2751_v54 = vld [vmem:[%s2606_s0 + $0x88] sm:$0xff] (!%p371_p7)  ;;  %v2754_v55 = vld [vmem:[%s2606_s0 + $0x98] sm:$0xff] (!%p371_p7) }
  0x81   : > { %v2757_v56 = vld [vmem:[%s2606_s0 + $0xa8] sm:$0xff] (!%p371_p7)  ;;  %v2760_v57 = vld [vmem:[%s2606_s0 + $0xb8] sm:$0xff] (!%p371_p7) }
  0x82   : > { %vm379_vm11 = vcmp.ge.s32.totalorder (!%p371_p7), %v377_v44, %v378_v42  ;;  %vm381_vm12 = vcmp.lt.s32.totalorder (!%p371_p7), %v377_v44, %v380_v43  ;;  %v395_v29 = vld [vmem:[%s2606_s0 + $0xc8] sm:$0xff] (!%p371_p7)  ;;  %v396_v14 = vld [vmem:[%s2606_s0 + $0xd8] sm:$0xff] (!%p371_p7) }
  0x83   : > { %vm2745_vm13 = vmand (!%p371_p7), %vm379_vm11, %vm381_vm12  ;;  %v397_v40 = vld [vmem:[%s2606_s0 + $0xe8] sm:$0xff] (!%p371_p7)  ;;  %v398_v41 = vld [vmem:[%s2606_s0 + $0xf8] sm:$0xff] (!%p371_p7) }
  0x84   : > { %v401_v58 = vsel %vm2745_vm13, %v383_v45, -inf  ;;  %v402_v59 = vsel %vm2745_vm13, %v384_v46, -inf  ;;  %v403_v60 = vsel %vm2745_vm13, %v385_v47, -inf  ;;  %v404_v61 = vsel %vm2745_vm13, %v386_v48, -inf }
  0x85   : > { %v405_v62 = vsel %vm2745_vm13, %v387_v49, -inf  ;;  %v406_v63 = vsel %vm2745_vm13, %v388_v50, -inf  ;;  %v407_v0 = vsel %vm2745_vm13, %v389_v51, -inf  ;;  %v408_v1 = vsel %vm2745_vm13, %v390_v53, -inf }
  0x86   : > { %v409_v2 = vsel %vm2745_vm13, %v2751_v54, -inf  ;;  %v410_v3 = vsel %vm2745_vm13, %v2754_v55, -inf  ;;  %v411_v4 = vsel %vm2745_vm13, %v2757_v56, -inf  ;;  %v412_v5 = vsel %vm2745_vm13, %v2760_v57, -inf }
  0x87   : > { %v417_v6 = vsel %vm151_vm0, %v401_v58, -inf  ;;  %v424_v7 = vsel %vm151_vm0, %v402_v59, -inf  ;;  %v431_v8 = vsel %vm151_vm0, %v403_v60, -inf  ;;  %v438_v9 = vsel %vm151_vm0, %v404_v61, -inf }
  0x88   : > { %v418_v15 = vrot.slane %v417_v6, 4  ;;  %v425_v16 = vrot.slane %v424_v7, 4  ;;  %v432_v17 = vrot.slane %v431_v8, 4  ;;  %v439_v18 = vrot.slane %v438_v9, 4 }
  0x89   : > { %v445_v23 = vsel %vm151_vm0, %v405_v62, -inf  ;;  %v452_v24 = vsel %vm151_vm0, %v406_v63, -inf  ;;  %v459_v25 = vsel %vm151_vm0, %v407_v0, -inf  ;;  %v466_v30 = vsel %vm151_vm0, %v408_v1, -inf }
  0x8a   : > { %v419_v34 = vmax.f32 %v417_v6, %v418_v15  ;;  %v426_v35 = vmax.f32 %v424_v7, %v425_v16  ;;  %v433_v36 = vmax.f32 %v431_v8, %v432_v17  ;;  %v440_v37 = vmax.f32 %v438_v9, %v439_v18 }
  0x8b   : > { %v446_v26 = vrot.slane %v445_v23, 4  ;;  %v453_v10 = vrot.slane %v452_v24, 4  ;;  %v460_v19 = vrot.slane %v459_v25, 4  ;;  %v467_v20 = vrot.slane %v466_v30, 4 }
  0x8c   : > { %v420_v31 = vrot.slane %v419_v34, 2  ;;  %v427_v11 = vrot.slane %v426_v35, 2  ;;  %v434_v12 = vrot.slane %v433_v36, 2  ;;  %v441_v13 = vrot.slane %v440_v37, 2 }
  0x8d   : > { %v447_v32 = vmax.f32 %v445_v23, %v446_v26  ;;  %v454_v27 = vmax.f32 %v452_v24, %v453_v10  ;;  %v461_v21 = vmax.f32 %v459_v25, %v460_v19  ;;  %v468_v28 = vmax.f32 %v466_v30, %v467_v20 }
  0x8e   : > { %v421_v33 = vmax.f32 %v419_v34, %v420_v31  ;;  %v428_v38 = vmax.f32 %v426_v35, %v427_v11  ;;  %v435_v22 = vmax.f32 %v433_v36, %v434_v12  ;;  %v442_v39 = vmax.f32 %v440_v37, %v441_v13 }
  0x8f   : > { %v448_v42 = vrot.slane %v447_v32, 2  ;;  %v455_v43 = vrot.slane %v454_v27, 2  ;;  %v462_v44 = vrot.slane %v461_v21, 2  ;;  %v469_v45 = vrot.slane %v468_v28, 2 }
  0x90   : > { %v422_v46 = vrot.slane %v421_v33, 1  ;;  %v429_v47 = vrot.slane %v428_v38, 1  ;;  %v436_v48 = vrot.slane %v435_v22, 1  ;;  %v443_v49 = vrot.slane %v442_v39, 1 }
  0x91   : > { %v2802_v50 = vmax.f32 %v447_v32, %v448_v42  ;;  %v2804_v51 = vmax.f32 %v454_v27, %v455_v43  ;;  %v2806_v53 = vmax.f32 %v461_v21, %v462_v44  ;;  %v2808_v54 = vmax.f32 %v468_v28, %v469_v45 }
  0x92   : > { %v413_v55 = vsel %vm2745_vm13, %v395_v29, -inf  ;;  %v414_v56 = vsel %vm2745_vm13, %v396_v14, -inf  ;;  %v415_v57 = vsel %vm2745_vm13, %v397_v40, -inf  ;;  %v416_v58 = vsel %vm2745_vm13, %v398_v41, -inf }
  0x93   : > { %v2818_v59 = vmax.f32 %v421_v33, %v422_v46  ;;  %v2820_v60 = vmax.f32 %v428_v38, %v429_v47  ;;  %v2822_v61 = vmax.f32 %v435_v22, %v436_v48  ;;  %v2824_v62 = vmax.f32 %v442_v39, %v443_v49 }
  0x94   : > { %v473_v63 = vsel %vm151_vm0, %v409_v2, -inf  ;;  %v480_v0 = vsel %vm151_vm0, %v410_v3, -inf  ;;  %v487_v1 = vsel %vm151_vm0, %v411_v4, -inf  ;;  %v494_v6 = vsel %vm151_vm0, %v412_v5, -inf }
  0x95   : > { %v450_v7 = vrot.slane %v2802_v50, 1  ;;  %v457_v52 = vrot.slane %v2804_v51, 1  ;;  %v464_v8 = vrot.slane %v2806_v53, 1  ;;  %v471_v9 = vrot.slane %v2808_v54, 1 }
  0x96   : > { %v474_v15 = vrot.slane %v473_v63, 4  ;;  %v481_v16 = vrot.slane %v480_v0, 4  ;;  %v488_v17 = vrot.slane %v487_v1, 4  ;;  %v495_v18 = vrot.slane %v494_v6, 4 }
  0x97   : > { %v501_v2 = vsel %vm151_vm0, %v413_v55, -inf  ;;  %v508_v3 = vsel %vm151_vm0, %v414_v56, -inf  ;;  %v515_v4 = vsel %vm151_vm0, %v415_v57, -inf  ;;  %v522_v5 = vsel %vm151_vm0, %v416_v58, -inf }
  0x98   : > { %v475_v23 = vmax.f32 %v473_v63, %v474_v15  ;;  %v482_v24 = vmax.f32 %v480_v0, %v481_v16  ;;  %v489_v25 = vmax.f32 %v487_v1, %v488_v17  ;;  %v496_v30 = vmax.f32 %v494_v6, %v495_v18 }
  0x99   : > { %v502_v34 = vrot.slane %v501_v2, 4  ;;  %v509_v35 = vrot.slane %v508_v3, 4  ;;  %v516_v36 = vrot.slane %v515_v4, 4  ;;  %v523_v37 = vrot.slane %v522_v5, 4 }
  0x9a   : > { %v476_v26 = vrot.slane %v475_v23, 2  ;;  %v483_v10 = vrot.slane %v482_v24, 2  ;;  %v490_v19 = vrot.slane %v489_v25, 2  ;;  %v497_v20 = vrot.slane %v496_v30, 2 }
  0x9b   : > { %v503_v31 = vmax.f32 %v501_v2, %v502_v34  ;;  %v510_v11 = vmax.f32 %v508_v3, %v509_v35  ;;  %v517_v12 = vmax.f32 %v515_v4, %v516_v36  ;;  %v524_v13 = vmax.f32 %v522_v5, %v523_v37  ;;  %v530_v3 = vld [vmem:[#allocation2 + $0x8] sm:$0xff] }
  0x9c   : > { %v477_v32 = vmax.f32 %v475_v23, %v476_v26  ;;  %v484_v27 = vmax.f32 %v482_v24, %v483_v10  ;;  %v491_v21 = vmax.f32 %v489_v25, %v490_v19  ;;  %v498_v28 = vmax.f32 %v496_v30, %v497_v20 }
  0x9d   : > { %v504_v29 = vrot.slane %v503_v31, 2  ;;  %v511_v14 = vrot.slane %v510_v11, 2  ;;  %v518_v33 = vrot.slane %v517_v12, 2  ;;  %v525_v38 = vrot.slane %v524_v13, 2 }
  0x9e   : > { %v478_v22 = vrot.slane %v477_v32, 1  ;;  %v485_v39 = vrot.slane %v484_v27, 1  ;;  %v492_v40 = vrot.slane %v491_v21, 1  ;;  %v499_v41 = vrot.slane %v498_v28, 1 }
  0x9f   : > { %v505_v42 = vmax.f32 %v503_v31, %v504_v29  ;;  %v512_v43 = vmax.f32 %v510_v11, %v511_v14  ;;  %v519_v44 = vmax.f32 %v517_v12, %v518_v33  ;;  %v526_v45 = vmax.f32 %v524_v13, %v525_v38 }
  0xa0   : > { %v479_v46 = vmax.f32 %v477_v32, %v478_v22  ;;  %v486_v47 = vmax.f32 %v484_v27, %v485_v39  ;;  %v493_v48 = vmax.f32 %v491_v21, %v492_v40  ;;  %v500_v49 = vmax.f32 %v498_v28, %v499_v41 }
  0xa1   : > { %v506_v55 = vrot.slane %v505_v42, 1  ;;  %v513_v56 = vrot.slane %v512_v43, 1  ;;  %v520_v57 = vrot.slane %v519_v44, 1  ;;  %v527_v58 = vrot.slane %v526_v45, 1 }
  0xa2   : > { %v451_v63 = vmax.f32 %v2802_v50, %v450_v7  ;;  %v548_v0 = vsel %vm547_vm14, %v2820_v60, %v2818_v59  ;;  %v561_v1 = vsel %vm547_vm14, %v486_v47, %v479_v46  ;;  %v458_v6 = vmax.f32 %v2804_v51, %v457_v52 }
  0xa3   : > { %v507_v15 = vmax.f32 %v505_v42, %v506_v55  ;;  %v514_v16 = vmax.f32 %v512_v43, %v513_v56  ;;  %v465_v17 = vmax.f32 %v2806_v53, %v464_v8  ;;  %v521_v18 = vmax.f32 %v519_v44, %v520_v57  ;;  %v529_v8 = vld [vmem:[#allocation2] sm:$0xff] }
  0xa4   : > { %v550_v2 = vsel %vm549_vm15, %v2822_v61, %v548_v0  ;;  %v562_v50 = vsel %vm549_vm15, %v493_v48, %v561_v1  ;;  %v472_v59 = vmax.f32 %v2808_v54, %v471_v9  ;;  %v528_v60 = vmax.f32 %v526_v45, %v527_v58 }
  0xa5   : > { %v552_v7 = vsel %vm551_vm1, %v2824_v62, %v550_v2  ;;  %v563_v51 = vsel %vm551_vm1, %v500_v49, %v562_v50 }
  0xa6   : > { %v554_v52 = vsel %vm553_vm2, %v451_v63, %v552_v7  ;;  %v564_v53 = vsel %vm553_vm2, %v507_v15, %v563_v51 }
  0xa7   : > { %v556_v61 = vsel %vm555_vm3, %v458_v6, %v554_v52  ;;  %v565_v4 = vsel %vm555_vm3, %v514_v16, %v564_v53 }
  0xa8   : > { %v558_v5 = vsel %vm557_vm4, %v465_v17, %v556_v61  ;;  %v566_v54 = vsel %vm557_vm4, %v521_v18, %v565_v4 }
  0xa9   : > { %v560_v9 = vsel %vm559_vm5, %v472_v59, %v558_v5  ;;  %v567_v23 = vsel %vm559_vm5, %v528_v60, %v566_v54 }
  0xaa   : > { %v570_v62 = vmax.f32 %v529_v8, %v560_v9  ;;  %v571_v24 = vmax.f32 %v530_v3, %v567_v23 }
  0xac   : > { %572 = vst.msk [vmem:[#allocation2] sm:$0xff] %vm151_vm0, %v570_v62  ;;  %573 = vst.msk [vmem:[#allocation2 + $0x8] sm:$0xff] %vm151_vm0, %v571_v24 }
  0xad PF: > { %s2863_s1 = sadd.s32 1, %s2587_s20 }
  0xae   : > { %s2866_s30 = sld [smem:[#allocation8 + %s2863_s1]] }
  0xaf   : > { %s2869_s7 = sld [smem:[#allocation9 + %s2863_s1]] }
  0xb4   : > { %p578_p9 = scmp.lt.s32.totalorder %s2866_s30, 8 }
  0xb5   : > { %p577_p8 = scmp.gt.s32.totalorder %s2869_s7, 0 }
  0xb7   : > { %p579_p10 = pnand %p578_p9, %p577_p8 }
  0xb8   : > { %v583_v25 = vlaneseq (!%p579_p10)  ;;  %v585_v30 = vstv (!%p579_p10), %s2866_s30  ;;  %v587_v34 = vstv (!%p579_p10), %s2869_s7  ;;  %v590_v36 = vld [vmem:[%s2606_s0] sm:$0xff] (!%p579_p10)  ;;  %v591_v37 = vld [vmem:[%s2606_s0 + $0x10] sm:$0xff] (!%p579_p10)  ;;  %vm755_vm9 = vcmask (!%p579_p10), 1041409  }
  0xb9   : > { %582 = sbr.rel (%p579_p10) target bundleno = 231 (0xe7), region = 36  ;;  %v592_v26 = vld [vmem:[%s2606_s0 + $0x20] sm:$0xff] (!%p579_p10)  ;;  %v593_v10 = vld [vmem:[%s2606_s0 + $0x30] sm:$0xff] (!%p579_p10)  ;;  %vm757_vm10 = vcmask (!%p579_p10), 1042434   ;;  %vm759_vm11 = vcmask (!%p579_p10), 1043459   ;;  %vm761_vm12 = vcmask (!%p579_p10), 1044484  }
  0xba   : > { %v584_v35 = vshrl.u32 (!%p579_p10), %v583_v25, 7  ;;  %v594_v19 = vld [vmem:[%s2606_s0 + $0x40] sm:$0xff] (!%p579_p10)  ;;  %v595_v20 = vld [vmem:[%s2606_s0 + $0x50] sm:$0xff] (!%p579_p10)  ;;  %vm763_vm13 = vcmask (!%p579_p10), 1045509   ;;  %vm765_vm14 = vcmask (!%p579_p10), 1046534   ;;  %vm767_vm15 = vcmask (!%p579_p10), 1047559  }
  0xbb   : > { %v596_v31 = vld [vmem:[%s2606_s0 + $0x60] sm:$0xff] (!%p579_p10)  ;;  %v597_v12 = vld [vmem:[%s2606_s0 + $0x70] sm:$0xff] (!%p579_p10) }
  0xbc   : > { %vm586_vm6 = vcmp.ge.s32.totalorder (!%p579_p10), %v584_v35, %v585_v30  ;;  %vm588_vm7 = vcmp.lt.s32.totalorder (!%p579_p10), %v584_v35, %v587_v34  ;;  %v2888_v13 = vld [vmem:[%s2606_s0 + $0x80] sm:$0xff] (!%p579_p10)  ;;  %v2891_v32 = vld [vmem:[%s2606_s0 + $0x90] sm:$0xff] (!%p579_p10) }
  0xbd   : > { %vm2882_vm8 = vmand (!%p579_p10), %vm586_vm6, %vm588_vm7  ;;  %v2894_v27 = vld [vmem:[%s2606_s0 + $0xa0] sm:$0xff] (!%p579_p10)  ;;  %v2897_v21 = vld [vmem:[%s2606_s0 + $0xb0] sm:$0xff] (!%p579_p10) }
  0xbe   : > { %v608_v28 = vsel (!%p579_p10), %vm2882_vm8, %v590_v36, -inf  ;;  %v609_v29 = vsel (!%p579_p10), %vm2882_vm8, %v591_v37, -inf  ;;  %v610_v14 = vsel (!%p579_p10), %vm2882_vm8, %v592_v26, -inf  ;;  %v611_v33 = vsel (!%p579_p10), %vm2882_vm8, %v593_v10, -inf  ;;  %v602_v4 = vld [vmem:[%s2606_s0 + $0xc0] sm:$0xff] (!%p579_p10)  ;;  %v603_v5 = vld [vmem:[%s2606_s0 + $0xd0] sm:$0xff] (!%p579_p10) }
  0xbf   : > { %v612_v38 = vsel (!%p579_p10), %vm2882_vm8, %v594_v19, -inf  ;;  %v613_v22 = vsel (!%p579_p10), %vm2882_vm8, %v595_v20, -inf  ;;  %v614_v39 = vsel (!%p579_p10), %vm2882_vm8, %v596_v31, -inf  ;;  %v615_v40 = vsel (!%p579_p10), %vm2882_vm8, %v597_v12, -inf  ;;  %v604_v24 = vld [vmem:[%s2606_s0 + $0xe0] sm:$0xff] (!%p579_p10)  ;;  %v605_v25 = vld [vmem:[%s2606_s0 + $0xf0] sm:$0xff] (!%p579_p10) }
  0xc0   : > { %v616_v41 = vsel %vm2882_vm8, %v2888_v13, -inf  ;;  %v617_v42 = vsel %vm2882_vm8, %v2891_v32, -inf  ;;  %v618_v43 = vsel %vm2882_vm8, %v2894_v27, -inf  ;;  %v619_v44 = vsel %vm2882_vm8, %v2897_v21, -inf }
  0xc1   : > { %v624_v45 = vsel %vm151_vm0, %v608_v28, -inf  ;;  %v631_v46 = vsel %vm151_vm0, %v609_v29, -inf  ;;  %v638_v47 = vsel %vm151_vm0, %v610_v14, -inf  ;;  %v645_v48 = vsel %vm151_vm0, %v611_v33, -inf }
  0xc2   : > { %v625_v49 = vrot.slane %v624_v45, 4  ;;  %v632_v55 = vrot.slane %v631_v46, 4  ;;  %v639_v56 = vrot.slane %v638_v47, 4  ;;  %v646_v57 = vrot.slane %v645_v48, 4 }
  0xc3   : > { %v652_v58 = vsel %vm151_vm0, %v612_v38, -inf  ;;  %v659_v63 = vsel %vm151_vm0, %v613_v22, -inf  ;;  %v666_v0 = vsel %vm151_vm0, %v614_v39, -inf  ;;  %v673_v1 = vsel %vm151_vm0, %v615_v40, -inf }
  0xc4   : > { %v626_v6 = vmax.f32 %v624_v45, %v625_v49  ;;  %v633_v15 = vmax.f32 %v631_v46, %v632_v55  ;;  %v640_v16 = vmax.f32 %v638_v47, %v639_v56  ;;  %v647_v17 = vmax.f32 %v645_v48, %v646_v57 }
  0xc5   : > { %v653_v18 = vrot.slane %v652_v58, 4  ;;  %v660_v2 = vrot.slane %v659_v63, 4  ;;  %v667_v50 = vrot.slane %v666_v0, 4  ;;  %v674_v59 = vrot.slane %v673_v1, 4 }
  0xc6   : > { %v627_v60 = vrot.slane %v626_v6, 2  ;;  %v634_v7 = vrot.slane %v633_v15, 2  ;;  %v641_v51 = vrot.slane %v640_v16, 2  ;;  %v648_v52 = vrot.slane %v647_v17, 2 }
  0xc7   : > { %v654_v53 = vmax.f32 %v652_v58, %v653_v18  ;;  %v661_v8 = vmax.f32 %v659_v63, %v660_v2  ;;  %v668_v3 = vmax.f32 %v666_v0, %v667_v50  ;;  %v675_v61 = vmax.f32 %v673_v1, %v674_v59 }
  0xc8   : > { %v628_v54 = vmax.f32 %v626_v6, %v627_v60  ;;  %v635_v9 = vmax.f32 %v633_v15, %v634_v7  ;;  %v642_v23 = vmax.f32 %v640_v16, %v641_v51  ;;  %v649_v62 = vmax.f32 %v647_v17, %v648_v52 }
  0xc9   : > { %v655_v30 = vrot.slane %v654_v53, 2  ;;  %v662_v34 = vrot.slane %v661_v8, 2  ;;  %v669_v35 = vrot.slane %v668_v3, 2  ;;  %v676_v36 = vrot.slane %v675_v61, 2 }
  0xca   : > { %v629_v37 = vrot.slane %v628_v54, 1  ;;  %v636_v26 = vrot.slane %v635_v9, 1  ;;  %v643_v10 = vrot.slane %v642_v23, 1  ;;  %v650_v19 = vrot.slane %v649_v62, 1 }
  0xcb   : > { %v2939_v20 = vmax.f32 %v654_v53, %v655_v30  ;;  %v2941_v31 = vmax.f32 %v661_v8, %v662_v34  ;;  %v2943_v12 = vmax.f32 %v668_v3, %v669_v35  ;;  %v2945_v13 = vmax.f32 %v675_v61, %v676_v36 }
  0xcc   : > { %v620_v32 = vsel %vm2882_vm8, %v602_v4, -inf  ;;  %v621_v27 = vsel %vm2882_vm8, %v603_v5, -inf  ;;  %v622_v21 = vsel %vm2882_vm8, %v604_v24, -inf  ;;  %v623_v28 = vsel %vm2882_vm8, %v605_v25, -inf }
  0xcd   : > { %v2955_v29 = vmax.f32 %v628_v54, %v629_v37  ;;  %v2957_v14 = vmax.f32 %v635_v9, %v636_v26  ;;  %v2959_v33 = vmax.f32 %v642_v23, %v643_v10  ;;  %v2961_v38 = vmax.f32 %v649_v62, %v650_v19 }
  0xce   : > { %v680_v22 = vsel %vm151_vm0, %v616_v41, -inf  ;;  %v687_v39 = vsel %vm151_vm0, %v617_v42, -inf  ;;  %v694_v40 = vsel %vm151_vm0, %v618_v43, -inf  ;;  %v701_v45 = vsel %vm151_vm0, %v619_v44, -inf }
  0xcf   : > { %v657_v46 = vrot.slane %v2939_v20, 1  ;;  %v664_v11 = vrot.slane %v2941_v31, 1  ;;  %v671_v47 = vrot.slane %v2943_v12, 1  ;;  %v678_v48 = vrot.slane %v2945_v13, 1 }
  0xd0   : > { %v681_v49 = vrot.slane %v680_v22, 4  ;;  %v688_v55 = vrot.slane %v687_v39, 4  ;;  %v695_v56 = vrot.slane %v694_v40, 4  ;;  %v702_v57 = vrot.slane %v701_v45, 4 }
  0xd1   : > { %v708_v41 = vsel %vm151_vm0, %v620_v32, -inf  ;;  %v715_v42 = vsel %vm151_vm0, %v621_v27, -inf  ;;  %v722_v43 = vsel %vm151_vm0, %v622_v21, -inf  ;;  %v729_v44 = vsel %vm151_vm0, %v623_v28, -inf }
  0xd2   : > { %v682_v58 = vmax.f32 %v680_v22, %v681_v49  ;;  %v689_v63 = vmax.f32 %v687_v39, %v688_v55  ;;  %v696_v0 = vmax.f32 %v694_v40, %v695_v56  ;;  %v703_v1 = vmax.f32 %v701_v45, %v702_v57 }
  0xd3   : > { %v709_v6 = vrot.slane %v708_v41, 4  ;;  %v716_v15 = vrot.slane %v715_v42, 4  ;;  %v723_v16 = vrot.slane %v722_v43, 4  ;;  %v730_v17 = vrot.slane %v729_v44, 4 }
  0xd4   : > { %v683_v18 = vrot.slane %v682_v58, 2  ;;  %v690_v2 = vrot.slane %v689_v63, 2  ;;  %v697_v50 = vrot.slane %v696_v0, 2  ;;  %v704_v59 = vrot.slane %v703_v1, 2 }
  0xd5   : > { %v710_v60 = vmax.f32 %v708_v41, %v709_v6  ;;  %v717_v7 = vmax.f32 %v715_v42, %v716_v15  ;;  %v724_v51 = vmax.f32 %v722_v43, %v723_v16  ;;  %v731_v52 = vmax.f32 %v729_v44, %v730_v17  ;;  %v738_v42 = vld [vmem:[#allocation2 + $0x18] sm:$0xff] }
  0xd6   : > { %v684_v53 = vmax.f32 %v682_v58, %v683_v18  ;;  %v691_v8 = vmax.f32 %v689_v63, %v690_v2  ;;  %v698_v3 = vmax.f32 %v696_v0, %v697_v50  ;;  %v705_v61 = vmax.f32 %v703_v1, %v704_v59 }
  0xd7   : > { %v711_v4 = vrot.slane %v710_v60, 2  ;;  %v718_v5 = vrot.slane %v717_v7, 2  ;;  %v725_v54 = vrot.slane %v724_v51, 2  ;;  %v732_v9 = vrot.slane %v731_v52, 2 }
  0xd8   : > { %v685_v23 = vrot.slane %v684_v53, 1  ;;  %v692_v62 = vrot.slane %v691_v8, 1  ;;  %v699_v24 = vrot.slane %v698_v3, 1  ;;  %v706_v25 = vrot.slane %v705_v61, 1 }
  0xd9   : > { %v712_v30 = vmax.f32 %v710_v60, %v711_v4  ;;  %v719_v34 = vmax.f32 %v717_v7, %v718_v5  ;;  %v726_v35 = vmax.f32 %v724_v51, %v725_v54  ;;  %v733_v36 = vmax.f32 %v731_v52, %v732_v9 }
  0xda   : > { %v686_v37 = vmax.f32 %v684_v53, %v685_v23  ;;  %v693_v26 = vmax.f32 %v691_v8, %v692_v62  ;;  %v700_v10 = vmax.f32 %v698_v3, %v699_v24  ;;  %v707_v19 = vmax.f32 %v705_v61, %v706_v25 }
  0xdb   : > { %v713_v32 = vrot.slane %v712_v30, 1  ;;  %v720_v27 = vrot.slane %v719_v34, 1  ;;  %v727_v21 = vrot.slane %v726_v35, 1  ;;  %v734_v28 = vrot.slane %v733_v36, 1 }
  0xdc   : > { %v658_v22 = vmax.f32 %v2939_v20, %v657_v46  ;;  %v756_v39 = vsel %vm755_vm9, %v2957_v14, %v2955_v29  ;;  %v769_v40 = vsel %vm755_vm9, %v693_v26, %v686_v37  ;;  %v665_v45 = vmax.f32 %v2941_v31, %v664_v11 }
  0xdd   : > { %v714_v49 = vmax.f32 %v712_v30, %v713_v32  ;;  %v721_v55 = vmax.f32 %v719_v34, %v720_v27  ;;  %v672_v56 = vmax.f32 %v2943_v12, %v671_v47  ;;  %v728_v57 = vmax.f32 %v726_v35, %v727_v21  ;;  %v737_v47 = vld [vmem:[#allocation2 + $0x10] sm:$0xff] }
  0xde   : > { %v758_v41 = vsel %vm757_vm10, %v2959_v33, %v756_v39  ;;  %v770_v20 = vsel %vm757_vm10, %v700_v10, %v769_v40  ;;  %v679_v29 = vmax.f32 %v2945_v13, %v678_v48  ;;  %v735_v14 = vmax.f32 %v733_v36, %v734_v28 }
  0xdf   : > { %v760_v46 = vsel %vm759_vm11, %v2961_v38, %v758_v41  ;;  %v771_v31 = vsel %vm759_vm11, %v707_v19, %v770_v20 }
  0xe0   : > { %v762_v11 = vsel %vm761_vm12, %v658_v22, %v760_v46  ;;  %v772_v12 = vsel %vm761_vm12, %v714_v49, %v771_v31 }
  0xe1   : > { %v764_v33 = vsel %vm763_vm13, %v665_v45, %v762_v11  ;;  %v773_v43 = vsel %vm763_vm13, %v721_v55, %v772_v12 }
  0xe2   : > { %v766_v44 = vsel %vm765_vm14, %v672_v56, %v764_v33  ;;  %v774_v13 = vsel %vm765_vm14, %v728_v57, %v773_v43 }
  0xe3   : > { %v768_v48 = vsel %vm767_vm15, %v679_v29, %v766_v44  ;;  %v775_v58 = vsel %vm767_vm15, %v735_v14, %v774_v13 }
  0xe4   : > { %v778_v38 = vmax.f32 %v737_v47, %v768_v48  ;;  %v779_v63 = vmax.f32 %v738_v42, %v775_v58 }
  0xe6   : > { %780 = vst.msk [vmem:[#allocation2 + $0x10] sm:$0xff] %vm151_vm0, %v778_v38  ;;  %781 = vst.msk [vmem:[#allocation2 + $0x18] sm:$0xff] %vm151_vm0, %v779_v63 }
  0xe7 PF: > { %p782_p11 = scmp.gt.s32.totalorder %s2869_s7, 8  ;;  %p783_p12 = scmp.lt.s32.totalorder %s2866_s30, 16 }
  0xe9   : > { %p784_p13 = pnand %p783_p12, %p782_p11 }
  0xea   : > { %v788_v0 = vlaneseq (!%p784_p13)  ;;  %v791_v6 = vstv (!%p784_p13), %s2866_s30  ;;  %v793_v15 = vstv (!%p784_p13), %s2869_s7  ;;  %v796_v17 = vld [vmem:[%s2606_s0 + $0x8] sm:$0xff] (!%p784_p13)  ;;  %v797_v18 = vld [vmem:[%s2606_s0 + $0x18] sm:$0xff] (!%p784_p13)  ;;  %vm961_vm4 = vcmask (!%p784_p13), 1041409  }
  0xeb   : > { %787 = sbr.rel (%p784_p13) target bundleno = 283 (0x11b), region = 40  ;;  %v798_v2 = vld [vmem:[%s2606_s0 + $0x28] sm:$0xff] (!%p784_p13)  ;;  %v799_v50 = vld [vmem:[%s2606_s0 + $0x38] sm:$0xff] (!%p784_p13)  ;;  %vm963_vm5 = vcmask (!%p784_p13), 1042434   ;;  %vm965_vm6 = vcmask (!%p784_p13), 1043459   ;;  %vm967_vm7 = vcmask (!%p784_p13), 1044484  }
  0xec   : > { %v789_v1 = vshrl.u32 (!%p784_p13), %v788_v0, 7  ;;  %v800_v59 = vld [vmem:[%s2606_s0 + $0x48] sm:$0xff] (!%p784_p13)  ;;  %v801_v60 = vld [vmem:[%s2606_s0 + $0x58] sm:$0xff] (!%p784_p13)  ;;  %vm969_vm8 = vcmask (!%p784_p13), 1045509   ;;  %vm971_vm9 = vcmask (!%p784_p13), 1046534   ;;  %vm973_vm10 = vcmask (!%p784_p13), 1047559  }
  0xed   : > { %v802_v7 = vld [vmem:[%s2606_s0 + $0x68] sm:$0xff] (!%p784_p13)  ;;  %v803_v52 = vld [vmem:[%s2606_s0 + $0x78] sm:$0xff] (!%p784_p13) }
  0xee   : > { %v790_v16 = vadd.s32 (!%p784_p13), 8, %v789_v1  ;;  %v3016_v53 = vld [vmem:[%s2606_s0 + $0x88] sm:$0xff] (!%p784_p13)  ;;  %v3019_v8 = vld [vmem:[%s2606_s0 + $0x98] sm:$0xff] (!%p784_p13) }
  0xef   : > { %v3022_v3 = vld [vmem:[%s2606_s0 + $0xa8] sm:$0xff] (!%p784_p13)  ;;  %v3025_v61 = vld [vmem:[%s2606_s0 + $0xb8] sm:$0xff] (!%p784_p13) }
  0xf0   : > { %vm792_vm1 = vcmp.ge.s32.totalorder (!%p784_p13), %v790_v16, %v791_v6  ;;  %vm794_vm2 = vcmp.lt.s32.totalorder (!%p784_p13), %v790_v16, %v793_v15  ;;  %v808_v44 = vld [vmem:[%s2606_s0 + $0xc8] sm:$0xff] (!%p784_p13)  ;;  %v809_v13 = vld [vmem:[%s2606_s0 + $0xd8] sm:$0xff] (!%p784_p13) }
  0xf1   : > { %vm3010_vm3 = vmand (!%p784_p13), %vm792_vm1, %vm794_vm2  ;;  %v810_v0 = vld [vmem:[%s2606_s0 + $0xe8] sm:$0xff] (!%p784_p13)  ;;  %v811_v1 = vld [vmem:[%s2606_s0 + $0xf8] sm:$0xff] (!%p784_p13) }
  0xf2   : > { %v814_v4 = vsel %vm3010_vm3, %v796_v17, -inf  ;;  %v815_v5 = vsel %vm3010_vm3, %v797_v18, -inf  ;;  %v816_v54 = vsel %vm3010_vm3, %v798_v2, -inf  ;;  %v817_v9 = vsel %vm3010_vm3, %v799_v50, -inf }
  0xf3   : > { %v818_v23 = vsel %vm3010_vm3, %v800_v59, -inf  ;;  %v819_v62 = vsel %vm3010_vm3, %v801_v60, -inf  ;;  %v820_v24 = vsel %vm3010_vm3, %v802_v7, -inf  ;;  %v821_v25 = vsel %vm3010_vm3, %v803_v52, -inf }
  0xf4   : > { %v822_v30 = vsel %vm3010_vm3, %v3016_v53, -inf  ;;  %v823_v34 = vsel %vm3010_vm3, %v3019_v8, -inf  ;;  %v824_v35 = vsel %vm3010_vm3, %v3022_v3, -inf  ;;  %v825_v36 = vsel %vm3010_vm3, %v3025_v61, -inf }
  0xf5   : > { %v830_v37 = vsel %vm151_vm0, %v814_v4, -inf  ;;  %v837_v26 = vsel %vm151_vm0, %v815_v5, -inf  ;;  %v844_v10 = vsel %vm151_vm0, %v816_v54, -inf  ;;  %v851_v19 = vsel %vm151_vm0, %v817_v9, -inf }
  0xf6   : > { %v831_v32 = vrot.slane %v830_v37, 4  ;;  %v838_v27 = vrot.slane %v837_v26, 4  ;;  %v845_v21 = vrot.slane %v844_v10, 4  ;;  %v852_v28 = vrot.slane %v851_v19, 4 }
  0xf7   : > { %v858_v22 = vsel %vm151_vm0, %v818_v23, -inf  ;;  %v865_v39 = vsel %vm151_vm0, %v819_v62, -inf  ;;  %v872_v40 = vsel %vm151_vm0, %v820_v24, -inf  ;;  %v879_v45 = vsel %vm151_vm0, %v821_v25, -inf }
  0xf8   : > { %v832_v49 = vmax.f32 %v830_v37, %v831_v32  ;;  %v839_v55 = vmax.f32 %v837_v26, %v838_v27  ;;  %v846_v56 = vmax.f32 %v844_v10, %v845_v21  ;;  %v853_v57 = vmax.f32 %v851_v19, %v852_v28 }
  0xf9   : > { %v859_v41 = vrot.slane %v858_v22, 4  ;;  %v866_v20 = vrot.slane %v865_v39, 4  ;;  %v873_v29 = vrot.slane %v872_v40, 4  ;;  %v880_v14 = vrot.slane %v879_v45, 4 }
  0xfa   : > { %v833_v46 = vrot.slane %v832_v49, 2  ;;  %v840_v31 = vrot.slane %v839_v55, 2  ;;  %v847_v11 = vrot.slane %v846_v56, 2  ;;  %v854_v12 = vrot.slane %v853_v57, 2 }
  0xfb   : > { %v860_v47 = vmax.f32 %v858_v22, %v859_v41  ;;  %v867_v42 = vmax.f32 %v865_v39, %v866_v20  ;;  %v874_v33 = vmax.f32 %v872_v40, %v873_v29  ;;  %v881_v43 = vmax.f32 %v879_v45, %v880_v14 }
  0xfc   : > { %v834_v48 = vmax.f32 %v832_v49, %v833_v46  ;;  %v841_v58 = vmax.f32 %v839_v55, %v840_v31  ;;  %v848_v38 = vmax.f32 %v846_v56, %v847_v11  ;;  %v855_v63 = vmax.f32 %v853_v57, %v854_v12 }
  0xfd   : > { %v861_v6 = vrot.slane %v860_v47, 2  ;;  %v868_v15 = vrot.slane %v867_v42, 2  ;;  %v875_v16 = vrot.slane %v874_v33, 2  ;;  %v882_v17 = vrot.slane %v881_v43, 2 }
  0xfe   : > { %v835_v18 = vrot.slane %v834_v48, 1  ;;  %v842_v2 = vrot.slane %v841_v58, 1  ;;  %v849_v50 = vrot.slane %v848_v38, 1  ;;  %v856_v59 = vrot.slane %v855_v63, 1 }
  0xff   : > { %v3067_v60 = vmax.f32 %v860_v47, %v861_v6  ;;  %v3069_v7 = vmax.f32 %v867_v42, %v868_v15  ;;  %v3071_v52 = vmax.f32 %v874_v33, %v875_v16  ;;  %v3073_v53 = vmax.f32 %v881_v43, %v882_v17 }
 0x100   : > { %v826_v8 = vsel %vm3010_vm3, %v808_v44, -inf  ;;  %v827_v3 = vsel %vm3010_vm3, %v809_v13, -inf  ;;  %v828_v61 = vsel %vm3010_vm3, %v810_v0, -inf  ;;  %v829_v4 = vsel %vm3010_vm3, %v811_v1, -inf }
 0x101   : > { %v3083_v5 = vmax.f32 %v834_v48, %v835_v18  ;;  %v3085_v54 = vmax.f32 %v841_v58, %v842_v2  ;;  %v3087_v9 = vmax.f32 %v848_v38, %v849_v50  ;;  %v3089_v23 = vmax.f32 %v855_v63, %v856_v59 }
 0x102   : > { %v886_v62 = vsel %vm151_vm0, %v822_v30, -inf  ;;  %v893_v24 = vsel %vm151_vm0, %v823_v34, -inf  ;;  %v900_v25 = vsel %vm151_vm0, %v824_v35, -inf  ;;  %v907_v37 = vsel %vm151_vm0, %v825_v36, -inf }
 0x103   : > { %v863_v26 = vrot.slane %v3067_v60, 1  ;;  %v870_v51 = vrot.slane %v3069_v7, 1  ;;  %v877_v10 = vrot.slane %v3071_v52, 1  ;;  %v884_v19 = vrot.slane %v3073_v53, 1 }
 0x104   : > { %v887_v32 = vrot.slane %v886_v62, 4  ;;  %v894_v27 = vrot.slane %v893_v24, 4  ;;  %v901_v21 = vrot.slane %v900_v25, 4  ;;  %v908_v28 = vrot.slane %v907_v37, 4 }
 0x105   : > { %v914_v30 = vsel %vm151_vm0, %v826_v8, -inf  ;;  %v921_v34 = vsel %vm151_vm0, %v827_v3, -inf  ;;  %v928_v35 = vsel %vm151_vm0, %v828_v61, -inf  ;;  %v935_v36 = vsel %vm151_vm0, %v829_v4, -inf }
 0x106   : > { %v888_v22 = vmax.f32 %v886_v62, %v887_v32  ;;  %v895_v39 = vmax.f32 %v893_v24, %v894_v27  ;;  %v902_v40 = vmax.f32 %v900_v25, %v901_v21  ;;  %v909_v45 = vmax.f32 %v907_v37, %v908_v28 }
 0x107   : > { %v915_v49 = vrot.slane %v914_v30, 4  ;;  %v922_v55 = vrot.slane %v921_v34, 4  ;;  %v929_v56 = vrot.slane %v928_v35, 4  ;;  %v936_v57 = vrot.slane %v935_v36, 4 }
 0x108   : > { %v889_v41 = vrot.slane %v888_v22, 2  ;;  %v896_v20 = vrot.slane %v895_v39, 2  ;;  %v903_v29 = vrot.slane %v902_v40, 2  ;;  %v910_v14 = vrot.slane %v909_v45, 2 }
 0x109   : > { %v916_v46 = vmax.f32 %v914_v30, %v915_v49  ;;  %v923_v31 = vmax.f32 %v921_v34, %v922_v55  ;;  %v930_v11 = vmax.f32 %v928_v35, %v929_v56  ;;  %v937_v12 = vmax.f32 %v935_v36, %v936_v57  ;;  %v944_v34 = vld [vmem:[#allocation2 + $0x18] sm:$0xff] }
 0x10a   : > { %v890_v47 = vmax.f32 %v888_v22, %v889_v41  ;;  %v897_v42 = vmax.f32 %v895_v39, %v896_v20  ;;  %v904_v33 = vmax.f32 %v902_v40, %v903_v29  ;;  %v911_v43 = vmax.f32 %v909_v45, %v910_v14 }
 0x10b   : > { %v917_v44 = vrot.slane %v916_v46, 2  ;;  %v924_v13 = vrot.slane %v923_v31, 2  ;;  %v931_v48 = vrot.slane %v930_v11, 2  ;;  %v938_v58 = vrot.slane %v937_v12, 2 }
 0x10c   : > { %v891_v38 = vrot.slane %v890_v47, 1  ;;  %v898_v63 = vrot.slane %v897_v42, 1  ;;  %v905_v0 = vrot.slane %v904_v33, 1  ;;  %v912_v1 = vrot.slane %v911_v43, 1 }
 0x10d   : > { %v918_v6 = vmax.f32 %v916_v46, %v917_v44  ;;  %v925_v15 = vmax.f32 %v923_v31, %v924_v13  ;;  %v932_v16 = vmax.f32 %v930_v11, %v931_v48  ;;  %v939_v17 = vmax.f32 %v937_v12, %v938_v58 }
 0x10e   : > { %v892_v18 = vmax.f32 %v890_v47, %v891_v38  ;;  %v899_v2 = vmax.f32 %v897_v42, %v898_v63  ;;  %v906_v50 = vmax.f32 %v904_v33, %v905_v0  ;;  %v913_v59 = vmax.f32 %v911_v43, %v912_v1 }
 0x10f   : > { %v919_v8 = vrot.slane %v918_v6, 1  ;;  %v926_v3 = vrot.slane %v925_v15, 1  ;;  %v933_v61 = vrot.slane %v932_v16, 1  ;;  %v940_v4 = vrot.slane %v939_v17, 1 }
 0x110   : > { %v864_v62 = vmax.f32 %v3067_v60, %v863_v26  ;;  %v962_v24 = vsel %vm961_vm4, %v3085_v54, %v3083_v5  ;;  %v975_v25 = vsel %vm961_vm4, %v899_v2, %v892_v18  ;;  %v871_v37 = vmax.f32 %v3069_v7, %v870_v51 }
 0x111   : > { %v920_v32 = vmax.f32 %v918_v6, %v919_v8  ;;  %v927_v27 = vmax.f32 %v925_v15, %v926_v3  ;;  %v878_v21 = vmax.f32 %v3071_v52, %v877_v10  ;;  %v934_v28 = vmax.f32 %v932_v16, %v933_v61  ;;  %v943_v10 = vld [vmem:[#allocation2 + $0x10] sm:$0xff] }
 0x112   : > { %v964_v30 = vsel %vm963_vm5, %v3087_v9, %v962_v24  ;;  %v976_v60 = vsel %vm963_vm5, %v906_v50, %v975_v25  ;;  %v885_v5 = vmax.f32 %v3073_v53, %v884_v19  ;;  %v941_v54 = vmax.f32 %v939_v17, %v940_v4 }
 0x113   : > { %v966_v26 = vsel %vm965_vm6, %v3089_v23, %v964_v30  ;;  %v977_v7 = vsel %vm965_vm6, %v913_v59, %v976_v60 }
 0x114   : > { %v968_v51 = vsel %vm967_vm7, %v864_v62, %v966_v26  ;;  %v978_v52 = vsel %vm967_vm7, %v920_v32, %v977_v7 }
 0x115   : > { %v970_v9 = vsel %vm969_vm8, %v871_v37, %v968_v51  ;;  %v979_v35 = vsel %vm969_vm8, %v927_v27, %v978_v52 }
 0x116   : > { %v972_v36 = vsel %vm971_vm9, %v878_v21, %v970_v9  ;;  %v980_v53 = vsel %vm971_vm9, %v934_v28, %v979_v35 }
 0x117   : > { %v974_v19 = vsel %vm973_vm10, %v885_v5, %v972_v36  ;;  %v981_v22 = vsel %vm973_vm10, %v941_v54, %v980_v53 }
 0x118   : > { %v984_v23 = vmax.f32 %v943_v10, %v974_v19  ;;  %v985_v39 = vmax.f32 %v944_v34, %v981_v22 }
 0x11a   : > { %986 = vst.msk [vmem:[#allocation2 + $0x10] sm:$0xff] %vm151_vm0, %v984_v23  ;;  %987 = vst.msk [vmem:[#allocation2 + $0x18] sm:$0xff] %vm151_vm0, %v985_v39 }
 0x11b PF: > { %s3128_s8 = sadd.s32 2, %s2587_s20 }
 0x11c   : > { %s3131_s9 = sld [smem:[#allocation8 + %s3128_s8]] }
 0x11d   : > { %s3134_s10 = sld [smem:[#allocation9 + %s3128_s8]] }
 0x122   : > { %p992_p1 = scmp.lt.s32.totalorder %s3131_s9, 8 }
 0x123   : > { %p991_p0 = scmp.gt.s32.totalorder %s3134_s10, 0 }
 0x125   : > { %p993_p2 = pnand %p992_p1, %p991_p0 }
 0x126   : > { %v997_v40 = vlaneseq (!%p993_p2)  ;;  %v999_v45 = vstv (!%p993_p2), %s3131_s9  ;;  %v1001_v49 = vstv (!%p993_p2), %s3134_s10  ;;  %v1004_v56 = vld [vmem:[%s2606_s0] sm:$0xff] (!%p993_p2)  ;;  %v1005_v57 = vld [vmem:[%s2606_s0 + $0x10] sm:$0xff] (!%p993_p2)  ;;  %vm1169_vm14 = vcmask (!%p993_p2), 1041409  }
 0x127   : > { %996 = sbr.rel (%p993_p2) target bundleno = 341 (0x155), region = 44  ;;  %v1006_v41 = vld [vmem:[%s2606_s0 + $0x20] sm:$0xff] (!%p993_p2)  ;;  %v1007_v20 = vld [vmem:[%s2606_s0 + $0x30] sm:$0xff] (!%p993_p2)  ;;  %vm1171_vm15 = vcmask (!%p993_p2), 1042434   ;;  %vm1173_vm1 = vcmask (!%p993_p2), 1043459   ;;  %vm1175_vm2 = vcmask (!%p993_p2), 1044484  }
 0x128   : > { %v998_v55 = vshrl.u32 (!%p993_p2), %v997_v40, 7  ;;  %v1008_v29 = vld [vmem:[%s2606_s0 + $0x40] sm:$0xff] (!%p993_p2)  ;;  %v1009_v14 = vld [vmem:[%s2606_s0 + $0x50] sm:$0xff] (!%p993_p2)  ;;  %vm1177_vm3 = vcmask (!%p993_p2), 1045509   ;;  %vm1179_vm4 = vcmask (!%p993_p2), 1046534   ;;  %vm1181_vm5 = vcmask (!%p993_p2), 1047559  }
 0x129   : > { %v1010_v46 = vld [vmem:[%s2606_s0 + $0x60] sm:$0xff] (!%p993_p2)  ;;  %v1011_v11 = vld [vmem:[%s2606_s0 + $0x70] sm:$0xff] (!%p993_p2) }
 0x12a   : > { %vm1000_vm11 = vcmp.ge.s32.totalorder (!%p993_p2), %v998_v55, %v999_v45  ;;  %vm1002_vm12 = vcmp.lt.s32.totalorder (!%p993_p2), %v998_v55, %v1001_v49  ;;  %v3153_v12 = vld [vmem:[%s2606_s0 + $0x80] sm:$0xff] (!%p993_p2)  ;;  %v3156_v47 = vld [vmem:[%s2606_s0 + $0x90] sm:$0xff] (!%p993_p2) }
 0x12b   : > { %vm3147_vm13 = vmand (!%p993_p2), %vm1000_vm11, %vm1002_vm12  ;;  %v3159_v42 = vld [vmem:[%s2606_s0 + $0xa0] sm:$0xff] (!%p993_p2)  ;;  %v3162_v33 = vld [vmem:[%s2606_s0 + $0xb0] sm:$0xff] (!%p993_p2) }
 0x12c   : > { %v1022_v43 = vsel (!%p993_p2), %vm3147_vm13, %v1004_v56, -inf  ;;  %v1023_v44 = vsel (!%p993_p2), %vm3147_vm13, %v1005_v57, -inf  ;;  %v1024_v13 = vsel (!%p993_p2), %vm3147_vm13, %v1006_v41, -inf  ;;  %v1025_v48 = vsel (!%p993_p2), %vm3147_vm13, %v1007_v20, -inf  ;;  %v1016_v35 = vld [vmem:[%s2606_s0 + $0xc0] sm:$0xff] (!%p993_p2)  ;;  %v1017_v36 = vld [vmem:[%s2606_s0 + $0xd0] sm:$0xff] (!%p993_p2) }
 0x12d   : > { %v1026_v58 = vsel (!%p993_p2), %vm3147_vm13, %v1008_v29, -inf  ;;  %v1027_v38 = vsel (!%p993_p2), %vm3147_vm13, %v1009_v14, -inf  ;;  %v1028_v63 = vsel (!%p993_p2), %vm3147_vm13, %v1010_v46, -inf  ;;  %v1029_v0 = vsel (!%p993_p2), %vm3147_vm13, %v1011_v11, -inf  ;;  %v1018_v39 = vld [vmem:[%s2606_s0 + $0xe0] sm:$0xff] (!%p993_p2)  ;;  %v1019_v40 = vld [vmem:[%s2606_s0 + $0xf0] sm:$0xff] (!%p993_p2) }
 0x12e   : > { %v1030_v1 = vsel %vm3147_vm13, %v3153_v12, -inf  ;;  %v1031_v6 = vsel %vm3147_vm13, %v3156_v47, -inf  ;;  %v1032_v15 = vsel %vm3147_vm13, %v3159_v42, -inf  ;;  %v1033_v16 = vsel %vm3147_vm13, %v3162_v33, -inf }
 0x12f   : > { %v1038_v17 = vsel %vm151_vm0, %v1022_v43, -inf  ;;  %v1045_v18 = vsel %vm151_vm0, %v1023_v44, -inf  ;;  %v1052_v2 = vsel %vm151_vm0, %v1024_v13, -inf  ;;  %v1059_v50 = vsel %vm151_vm0, %v1025_v48, -inf }
 0x130   : > { %v1039_v59 = vrot.slane %v1038_v17, 4  ;;  %v1046_v8 = vrot.slane %v1045_v18, 4  ;;  %v1053_v3 = vrot.slane %v1052_v2, 4  ;;  %v1060_v61 = vrot.slane %v1059_v50, 4 }
 0x131   : > { %v1066_v4 = vsel %vm151_vm0, %v1026_v58, -inf  ;;  %v1073_v62 = vsel %vm151_vm0, %v1027_v38, -inf  ;;  %v1080_v24 = vsel %vm151_vm0, %v1028_v63, -inf  ;;  %v1087_v25 = vsel %vm151_vm0, %v1029_v0, -inf }
 0x132   : > { %v1040_v37 = vmax.f32 %v1038_v17, %v1039_v59  ;;  %v1047_v32 = vmax.f32 %v1045_v18, %v1046_v8  ;;  %v1054_v27 = vmax.f32 %v1052_v2, %v1053_v3  ;;  %v1061_v21 = vmax.f32 %v1059_v50, %v1060_v61 }
 0x133   : > { %v1067_v28 = vrot.slane %v1066_v4, 4  ;;  %v1074_v30 = vrot.slane %v1073_v62, 4  ;;  %v1081_v60 = vrot.slane %v1080_v24, 4  ;;  %v1088_v5 = vrot.slane %v1087_v25, 4 }
 0x134   : > { %v1041_v54 = vrot.slane %v1040_v37, 2  ;;  %v1048_v26 = vrot.slane %v1047_v32, 2  ;;  %v1055_v7 = vrot.slane %v1054_v27, 2  ;;  %v1062_v51 = vrot.slane %v1061_v21, 2 }
 0x135   : > { %v1068_v52 = vmax.f32 %v1066_v4, %v1067_v28  ;;  %v1075_v10 = vmax.f32 %v1073_v62, %v1074_v30  ;;  %v1082_v34 = vmax.f32 %v1080_v24, %v1081_v60  ;;  %v1089_v9 = vmax.f32 %v1087_v25, %v1088_v5 }
 0x136   : > { %v1042_v53 = vmax.f32 %v1040_v37, %v1041_v54  ;;  %v1049_v19 = vmax.f32 %v1047_v32, %v1048_v26  ;;  %v1056_v22 = vmax.f32 %v1054_v27, %v1055_v7  ;;  %v1063_v23 = vmax.f32 %v1061_v21, %v1062_v51 }
 0x137   : > { %v1069_v45 = vrot.slane %v1068_v52, 2  ;;  %v1076_v49 = vrot.slane %v1075_v10, 2  ;;  %v1083_v55 = vrot.slane %v1082_v34, 2  ;;  %v1090_v56 = vrot.slane %v1089_v9, 2 }
 0x138   : > { %v1043_v57 = vrot.slane %v1042_v53, 1  ;;  %v1050_v41 = vrot.slane %v1049_v19, 1  ;;  %v1057_v20 = vrot.slane %v1056_v22, 1  ;;  %v1064_v29 = vrot.slane %v1063_v23, 1 }
 0x139   : > { %v3204_v14 = vmax.f32 %v1068_v52, %v1069_v45  ;;  %v3206_v46 = vmax.f32 %v1075_v10, %v1076_v49  ;;  %v3208_v11 = vmax.f32 %v1082_v34, %v1083_v55  ;;  %v3210_v12 = vmax.f32 %v1089_v9, %v1090_v56 }
 0x13a   : > { %v1034_v47 = vsel %vm3147_vm13, %v1016_v35, -inf  ;;  %v1035_v42 = vsel %vm3147_vm13, %v1017_v36, -inf  ;;  %v1036_v33 = vsel %vm3147_vm13, %v1018_v39, -inf  ;;  %v1037_v43 = vsel %vm3147_vm13, %v1019_v40, -inf }
 0x13b   : > { %v3220_v44 = vmax.f32 %v1042_v53, %v1043_v57  ;;  %v3222_v13 = vmax.f32 %v1049_v19, %v1050_v41  ;;  %v3224_v48 = vmax.f32 %v1056_v22, %v1057_v20  ;;  %v3226_v58 = vmax.f32 %v1063_v23, %v1064_v29 }
 0x13c   : > { %v1094_v38 = vsel %vm151_vm0, %v1030_v1, -inf  ;;  %v1101_v63 = vsel %vm151_vm0, %v1031_v6, -inf  ;;  %v1108_v0 = vsel %vm151_vm0, %v1032_v15, -inf  ;;  %v1115_v17 = vsel %vm151_vm0, %v1033_v16, -inf }
 0x13d   : > { %v1071_v18 = vrot.slane %v3204_v14, 1  ;;  %v1078_v31 = vrot.slane %v3206_v46, 1  ;;  %v1085_v2 = vrot.slane %v3208_v11, 1  ;;  %v1092_v50 = vrot.slane %v3210_v12, 1 }
 0x13e   : > { %v1095_v59 = vrot.slane %v1094_v38, 4  ;;  %v1102_v8 = vrot.slane %v1101_v63, 4  ;;  %v1109_v3 = vrot.slane %v1108_v0, 4  ;;  %v1116_v61 = vrot.slane %v1115_v17, 4 }
 0x13f   : > { %v1122_v1 = vsel %vm151_vm0, %v1034_v47, -inf  ;;  %v1129_v6 = vsel %vm151_vm0, %v1035_v42, -inf  ;;  %v1136_v15 = vsel %vm151_vm0, %v1036_v33, -inf  ;;  %v1143_v16 = vsel %vm151_vm0, %v1037_v43, -inf }
 0x140   : > { %v1096_v4 = vmax.f32 %v1094_v38, %v1095_v59  ;;  %v1103_v62 = vmax.f32 %v1101_v63, %v1102_v8  ;;  %v1110_v24 = vmax.f32 %v1108_v0, %v1109_v3  ;;  %v1117_v25 = vmax.f32 %v1115_v17, %v1116_v61 }
 0x141   : > { %v1123_v37 = vrot.slane %v1122_v1, 4  ;;  %v1130_v32 = vrot.slane %v1129_v6, 4  ;;  %v1137_v27 = vrot.slane %v1136_v15, 4  ;;  %v1144_v21 = vrot.slane %v1143_v16, 4 }
 0x142   : > { %v1097_v28 = vrot.slane %v1096_v4, 2  ;;  %v1104_v30 = vrot.slane %v1103_v62, 2  ;;  %v1111_v60 = vrot.slane %v1110_v24, 2  ;;  %v1118_v5 = vrot.slane %v1117_v25, 2 }
 0x143   : > { %v1124_v54 = vmax.f32 %v1122_v1, %v1123_v37  ;;  %v1131_v26 = vmax.f32 %v1129_v6, %v1130_v32  ;;  %v1138_v7 = vmax.f32 %v1136_v15, %v1137_v27  ;;  %v1145_v51 = vmax.f32 %v1143_v16, %v1144_v21  ;;  %v1152_v6 = vld [vmem:[#allocation2 + $0x28] sm:$0xff] }
 0x144   : > { %v1098_v52 = vmax.f32 %v1096_v4, %v1097_v28  ;;  %v1105_v10 = vmax.f32 %v1103_v62, %v1104_v30  ;;  %v1112_v34 = vmax.f32 %v1110_v24, %v1111_v60  ;;  %v1119_v9 = vmax.f32 %v1117_v25, %v1118_v5 }
 0x145   : > { %v1125_v35 = vrot.slane %v1124_v54, 2  ;;  %v1132_v36 = vrot.slane %v1131_v26, 2  ;;  %v1139_v53 = vrot.slane %v1138_v7, 2  ;;  %v1146_v19 = vrot.slane %v1145_v51, 2 }
 0x146   : > { %v1099_v22 = vrot.slane %v1098_v52, 1  ;;  %v1106_v23 = vrot.slane %v1105_v10, 1  ;;  %v1113_v39 = vrot.slane %v1112_v34, 1  ;;  %v1120_v40 = vrot.slane %v1119_v9, 1 }
 0x147   : > { %v1126_v45 = vmax.f32 %v1124_v54, %v1125_v35  ;;  %v1133_v49 = vmax.f32 %v1131_v26, %v1132_v36  ;;  %v1140_v55 = vmax.f32 %v1138_v7, %v1139_v53  ;;  %v1147_v56 = vmax.f32 %v1145_v51, %v1146_v19 }
 0x148   : > { %v1100_v57 = vmax.f32 %v1098_v52, %v1099_v22  ;;  %v1107_v41 = vmax.f32 %v1105_v10, %v1106_v23  ;;  %v1114_v20 = vmax.f32 %v1112_v34, %v1113_v39  ;;  %v1121_v29 = vmax.f32 %v1119_v9, %v1120_v40 }
 0x149   : > { %v1127_v47 = vrot.slane %v1126_v45, 1  ;;  %v1134_v42 = vrot.slane %v1133_v49, 1  ;;  %v1141_v33 = vrot.slane %v1140_v55, 1  ;;  %v1148_v43 = vrot.slane %v1147_v56, 1 }
 0x14a   : > { %v1072_v38 = vmax.f32 %v3204_v14, %v1071_v18  ;;  %v1170_v63 = vsel %vm1169_vm14, %v3222_v13, %v3220_v44  ;;  %v1183_v0 = vsel %vm1169_vm14, %v1107_v41, %v1100_v57  ;;  %v1079_v17 = vmax.f32 %v3206_v46, %v1078_v31 }
 0x14b   : > { %v1128_v59 = vmax.f32 %v1126_v45, %v1127_v47  ;;  %v1135_v8 = vmax.f32 %v1133_v49, %v1134_v42  ;;  %v1086_v3 = vmax.f32 %v3208_v11, %v1085_v2  ;;  %v1142_v61 = vmax.f32 %v1140_v55, %v1141_v33  ;;  %v1151_v2 = vld [vmem:[#allocation2 + $0x20] sm:$0xff] }
 0x14c   : > { %v1172_v1 = vsel %vm1171_vm15, %v3224_v48, %v1170_v63  ;;  %v1184_v14 = vsel %vm1171_vm15, %v1114_v20, %v1183_v0  ;;  %v1093_v44 = vmax.f32 %v3210_v12, %v1092_v50  ;;  %v1149_v13 = vmax.f32 %v1147_v56, %v1148_v43 }
 0x14d   : > { %v1174_v18 = vsel %vm1173_vm1, %v3226_v58, %v1172_v1  ;;  %v1185_v46 = vsel %vm1173_vm1, %v1121_v29, %v1184_v14 }
 0x14e   : > { %v1176_v31 = vsel %vm1175_vm2, %v1072_v38, %v1174_v18  ;;  %v1186_v11 = vsel %vm1175_vm2, %v1128_v59, %v1185_v46 }
 0x14f   : > { %v1178_v48 = vsel %vm1177_vm3, %v1079_v17, %v1176_v31  ;;  %v1187_v15 = vsel %vm1177_vm3, %v1135_v8, %v1186_v11 }
 0x150   : > { %v1180_v16 = vsel %vm1179_vm4, %v1086_v3, %v1178_v48  ;;  %v1188_v12 = vsel %vm1179_vm4, %v1142_v61, %v1187_v15 }
 0x151   : > { %v1182_v50 = vsel %vm1181_vm5, %v1093_v44, %v1180_v16  ;;  %v1189_v4 = vsel %vm1181_vm5, %v1149_v13, %v1188_v12 }
 0x152   : > { %v1192_v58 = vmax.f32 %v1151_v2, %v1182_v50  ;;  %v1193_v62 = vmax.f32 %v1152_v6, %v1189_v4 }
 0x154   : > { %1194 = vst.msk [vmem:[#allocation2 + $0x20] sm:$0xff] %vm151_vm0, %v1192_v58  ;;  %1195 = vst.msk [vmem:[#allocation2 + $0x28] sm:$0xff] %vm151_vm0, %v1193_v62 }
 0x155 PF: > { %p1196_p3 = scmp.gt.s32.totalorder %s3134_s10, 8  ;;  %p1197_p4 = scmp.lt.s32.totalorder %s3131_s9, 16 }
 0x157   : > { %p1198_p5 = pnand %p1197_p4, %p1196_p3 }
 0x158   : > { %v1202_v24 = vlaneseq (!%p1198_p5)  ;;  %v1205_v37 = vstv (!%p1198_p5), %s3131_s9  ;;  %v1207_v32 = vstv (!%p1198_p5), %s3134_s10  ;;  %v1210_v21 = vld [vmem:[%s2606_s0 + $0x8] sm:$0xff] (!%p1198_p5)  ;;  %v1211_v28 = vld [vmem:[%s2606_s0 + $0x18] sm:$0xff] (!%p1198_p5)  ;;  %vm1375_vm9 = vcmask (!%p1198_p5), 1041409  }
 0x159   : > { %1201 = sbr.rel (%p1198_p5) target bundleno = 393 (0x189), region = 48  ;;  %v1212_v30 = vld [vmem:[%s2606_s0 + $0x28] sm:$0xff] (!%p1198_p5)  ;;  %v1213_v60 = vld [vmem:[%s2606_s0 + $0x38] sm:$0xff] (!%p1198_p5)  ;;  %vm1377_vm10 = vcmask (!%p1198_p5), 1042434   ;;  %vm1379_vm11 = vcmask (!%p1198_p5), 1043459   ;;  %vm1381_vm12 = vcmask (!%p1198_p5), 1044484  }
 0x15a   : > { %v1203_v25 = vshrl.u32 (!%p1198_p5), %v1202_v24, 7  ;;  %v1214_v5 = vld [vmem:[%s2606_s0 + $0x48] sm:$0xff] (!%p1198_p5)  ;;  %v1215_v54 = vld [vmem:[%s2606_s0 + $0x58] sm:$0xff] (!%p1198_p5)  ;;  %vm1383_vm13 = vcmask (!%p1198_p5), 1045509   ;;  %vm1385_vm14 = vcmask (!%p1198_p5), 1046534   ;;  %vm1387_vm15 = vcmask (!%p1198_p5), 1047559  }
 0x15b   : > { %v1216_v26 = vld [vmem:[%s2606_s0 + $0x68] sm:$0xff] (!%p1198_p5)  ;;  %v1217_v51 = vld [vmem:[%s2606_s0 + $0x78] sm:$0xff] (!%p1198_p5) }
 0x15c   : > { %v1204_v27 = vadd.s32 (!%p1198_p5), 8, %v1203_v25  ;;  %v3281_v52 = vld [vmem:[%s2606_s0 + $0x88] sm:$0xff] (!%p1198_p5)  ;;  %v3284_v10 = vld [vmem:[%s2606_s0 + $0x98] sm:$0xff] (!%p1198_p5) }
 0x15d   : > { %v3287_v34 = vld [vmem:[%s2606_s0 + $0xa8] sm:$0xff] (!%p1198_p5)  ;;  %v3290_v9 = vld [vmem:[%s2606_s0 + $0xb8] sm:$0xff] (!%p1198_p5) }
 0x15e   : > { %vm1206_vm6 = vcmp.ge.s32.totalorder (!%p1198_p5), %v1204_v27, %v1205_v37  ;;  %vm1208_vm7 = vcmp.lt.s32.totalorder (!%p1198_p5), %v1204_v27, %v1207_v32  ;;  %v1222_v16 = vld [vmem:[%s2606_s0 + $0xc8] sm:$0xff] (!%p1198_p5)  ;;  %v1223_v12 = vld [vmem:[%s2606_s0 + $0xd8] sm:$0xff] (!%p1198_p5) }
 0x15f   : > { %vm3275_vm8 = vmand (!%p1198_p5), %vm1206_vm6, %vm1208_vm7  ;;  %v1224_v24 = vld [vmem:[%s2606_s0 + $0xe8] sm:$0xff] (!%p1198_p5)  ;;  %v1225_v25 = vld [vmem:[%s2606_s0 + $0xf8] sm:$0xff] (!%p1198_p5) }
 0x160   : > { %v1228_v35 = vsel %vm3275_vm8, %v1210_v21, -inf  ;;  %v1229_v36 = vsel %vm3275_vm8, %v1211_v28, -inf  ;;  %v1230_v53 = vsel %vm3275_vm8, %v1212_v30, -inf  ;;  %v1231_v19 = vsel %vm3275_vm8, %v1213_v60, -inf }
 0x161   : > { %v1232_v22 = vsel %vm3275_vm8, %v1214_v5, -inf  ;;  %v1233_v23 = vsel %vm3275_vm8, %v1215_v54, -inf  ;;  %v1234_v39 = vsel %vm3275_vm8, %v1216_v26, -inf  ;;  %v1235_v40 = vsel %vm3275_vm8, %v1217_v51, -inf }
 0x162   : > { %v1236_v45 = vsel %vm3275_vm8, %v3281_v52, -inf  ;;  %v1237_v49 = vsel %vm3275_vm8, %v3284_v10, -inf  ;;  %v1238_v55 = vsel %vm3275_vm8, %v3287_v34, -inf  ;;  %v1239_v56 = vsel %vm3275_vm8, %v3290_v9, -inf }
 0x163   : > { %v1244_v57 = vsel %vm151_vm0, %v1228_v35, -inf  ;;  %v1251_v41 = vsel %vm151_vm0, %v1229_v36, -inf  ;;  %v1258_v20 = vsel %vm151_vm0, %v1230_v53, -inf  ;;  %v1265_v29 = vsel %vm151_vm0, %v1231_v19, -inf }
 0x164   : > { %v1245_v47 = vrot.slane %v1244_v57, 4  ;;  %v1252_v42 = vrot.slane %v1251_v41, 4  ;;  %v1259_v33 = vrot.slane %v1258_v20, 4  ;;  %v1266_v43 = vrot.slane %v1265_v29, 4 }
 0x165   : > { %v1272_v38 = vsel %vm151_vm0, %v1232_v22, -inf  ;;  %v1279_v63 = vsel %vm151_vm0, %v1233_v23, -inf  ;;  %v1286_v0 = vsel %vm151_vm0, %v1234_v39, -inf  ;;  %v1293_v17 = vsel %vm151_vm0, %v1235_v40, -inf }
 0x166   : > { %v1246_v59 = vmax.f32 %v1244_v57, %v1245_v47  ;;  %v1253_v8 = vmax.f32 %v1251_v41, %v1252_v42  ;;  %v1260_v3 = vmax.f32 %v1258_v20, %v1259_v33  ;;  %v1267_v61 = vmax.f32 %v1265_v29, %v1266_v43 }
 0x167   : > { %v1273_v1 = vrot.slane %v1272_v38, 4  ;;  %v1280_v14 = vrot.slane %v1279_v63, 4  ;;  %v1287_v44 = vrot.slane %v1286_v0, 4  ;;  %v1294_v13 = vrot.slane %v1293_v17, 4 }
 0x168   : > { %v1247_v18 = vrot.slane %v1246_v59, 2  ;;  %v1254_v46 = vrot.slane %v1253_v8, 2  ;;  %v1261_v31 = vrot.slane %v1260_v3, 2  ;;  %v1268_v11 = vrot.slane %v1267_v61, 2 }
 0x169   : > { %v1274_v2 = vmax.f32 %v1272_v38, %v1273_v1  ;;  %v1281_v6 = vmax.f32 %v1279_v63, %v1280_v14  ;;  %v1288_v48 = vmax.f32 %v1286_v0, %v1287_v44  ;;  %v1295_v15 = vmax.f32 %v1293_v17, %v1294_v13 }
 0x16a   : > { %v1248_v50 = vmax.f32 %v1246_v59, %v1247_v18  ;;  %v1255_v4 = vmax.f32 %v1253_v8, %v1254_v46  ;;  %v1262_v58 = vmax.f32 %v1260_v3, %v1261_v31  ;;  %v1269_v62 = vmax.f32 %v1267_v61, %v1268_v11 }
 0x16b   : > { %v1275_v37 = vrot.slane %v1274_v2, 2  ;;  %v1282_v32 = vrot.slane %v1281_v6, 2  ;;  %v1289_v27 = vrot.slane %v1288_v48, 2  ;;  %v1296_v21 = vrot.slane %v1295_v15, 2 }
 0x16c   : > { %v1249_v28 = vrot.slane %v1248_v50, 1  ;;  %v1256_v30 = vrot.slane %v1255_v4, 1  ;;  %v1263_v60 = vrot.slane %v1262_v58, 1  ;;  %v1270_v5 = vrot.slane %v1269_v62, 1 }
 0x16d   : > { %v3332_v54 = vmax.f32 %v1274_v2, %v1275_v37  ;;  %v3334_v26 = vmax.f32 %v1281_v6, %v1282_v32  ;;  %v3336_v51 = vmax.f32 %v1288_v48, %v1289_v27  ;;  %v3338_v52 = vmax.f32 %v1295_v15, %v1296_v21 }
 0x16e   : > { %v1240_v10 = vsel %vm3275_vm8, %v1222_v16, -inf  ;;  %v1241_v34 = vsel %vm3275_vm8, %v1223_v12, -inf  ;;  %v1242_v9 = vsel %vm3275_vm8, %v1224_v24, -inf  ;;  %v1243_v35 = vsel %vm3275_vm8, %v1225_v25, -inf }
 0x16f   : > { %v3348_v36 = vmax.f32 %v1248_v50, %v1249_v28  ;;  %v3350_v53 = vmax.f32 %v1255_v4, %v1256_v30  ;;  %v3352_v19 = vmax.f32 %v1262_v58, %v1263_v60  ;;  %v3354_v22 = vmax.f32 %v1269_v62, %v1270_v5 }
 0x170   : > { %v1300_v23 = vsel %vm151_vm0, %v1236_v45, -inf  ;;  %v1307_v39 = vsel %vm151_vm0, %v1237_v49, -inf  ;;  %v1314_v40 = vsel %vm151_vm0, %v1238_v55, -inf  ;;  %v1321_v57 = vsel %vm151_vm0, %v1239_v56, -inf }
 0x171   : > { %v1277_v41 = vrot.slane %v3332_v54, 1  ;;  %v1284_v7 = vrot.slane %v3334_v26, 1  ;;  %v1291_v20 = vrot.slane %v3336_v51, 1  ;;  %v1298_v29 = vrot.slane %v3338_v52, 1 }
 0x172   : > { %v1301_v47 = vrot.slane %v1300_v23, 4  ;;  %v1308_v42 = vrot.slane %v1307_v39, 4  ;;  %v1315_v33 = vrot.slane %v1314_v40, 4  ;;  %v1322_v43 = vrot.slane %v1321_v57, 4 }
 0x173   : > { %v1328_v45 = vsel %vm151_vm0, %v1240_v10, -inf  ;;  %v1335_v49 = vsel %vm151_vm0, %v1241_v34, -inf  ;;  %v1342_v55 = vsel %vm151_vm0, %v1242_v9, -inf  ;;  %v1349_v56 = vsel %vm151_vm0, %v1243_v35, -inf }
 0x174   : > { %v1302_v38 = vmax.f32 %v1300_v23, %v1301_v47  ;;  %v1309_v63 = vmax.f32 %v1307_v39, %v1308_v42  ;;  %v1316_v0 = vmax.f32 %v1314_v40, %v1315_v33  ;;  %v1323_v17 = vmax.f32 %v1321_v57, %v1322_v43 }
 0x175   : > { %v1329_v59 = vrot.slane %v1328_v45, 4  ;;  %v1336_v8 = vrot.slane %v1335_v49, 4  ;;  %v1343_v3 = vrot.slane %v1342_v55, 4  ;;  %v1350_v61 = vrot.slane %v1349_v56, 4 }
 0x176   : > { %v1303_v1 = vrot.slane %v1302_v38, 2  ;;  %v1310_v14 = vrot.slane %v1309_v63, 2  ;;  %v1317_v44 = vrot.slane %v1316_v0, 2  ;;  %v1324_v13 = vrot.slane %v1323_v17, 2 }
 0x177   : > { %v1330_v18 = vmax.f32 %v1328_v45, %v1329_v59  ;;  %v1337_v46 = vmax.f32 %v1335_v49, %v1336_v8  ;;  %v1344_v31 = vmax.f32 %v1342_v55, %v1343_v3  ;;  %v1351_v11 = vmax.f32 %v1349_v56, %v1350_v61  ;;  %v1358_v49 = vld [vmem:[#allocation2 + $0x28] sm:$0xff] }
 0x178   : > { %v1304_v2 = vmax.f32 %v1302_v38, %v1303_v1  ;;  %v1311_v6 = vmax.f32 %v1309_v63, %v1310_v14  ;;  %v1318_v48 = vmax.f32 %v1316_v0, %v1317_v44  ;;  %v1325_v15 = vmax.f32 %v1323_v17, %v1324_v13 }
 0x179   : > { %v1331_v16 = vrot.slane %v1330_v18, 2  ;;  %v1338_v12 = vrot.slane %v1337_v46, 2  ;;  %v1345_v50 = vrot.slane %v1344_v31, 2  ;;  %v1352_v4 = vrot.slane %v1351_v11, 2 }
 0x17a   : > { %v1305_v58 = vrot.slane %v1304_v2, 1  ;;  %v1312_v62 = vrot.slane %v1311_v6, 1  ;;  %v1319_v24 = vrot.slane %v1318_v48, 1  ;;  %v1326_v25 = vrot.slane %v1325_v15, 1 }
 0x17b   : > { %v1332_v37 = vmax.f32 %v1330_v18, %v1331_v16  ;;  %v1339_v32 = vmax.f32 %v1337_v46, %v1338_v12  ;;  %v1346_v27 = vmax.f32 %v1344_v31, %v1345_v50  ;;  %v1353_v21 = vmax.f32 %v1351_v11, %v1352_v4 }
 0x17c   : > { %v1306_v28 = vmax.f32 %v1304_v2, %v1305_v58  ;;  %v1313_v30 = vmax.f32 %v1311_v6, %v1312_v62  ;;  %v1320_v60 = vmax.f32 %v1318_v48, %v1319_v24  ;;  %v1327_v5 = vmax.f32 %v1325_v15, %v1326_v25 }
 0x17d   : > { %v1333_v10 = vrot.slane %v1332_v37, 1  ;;  %v1340_v34 = vrot.slane %v1339_v32, 1  ;;  %v1347_v9 = vrot.slane %v1346_v27, 1  ;;  %v1354_v35 = vrot.slane %v1353_v21, 1 }
 0x17e   : > { %v1278_v23 = vmax.f32 %v3332_v54, %v1277_v41  ;;  %v1376_v39 = vsel %vm1375_vm9, %v3350_v53, %v3348_v36  ;;  %v1389_v40 = vsel %vm1375_vm9, %v1313_v30, %v1306_v28  ;;  %v1285_v57 = vmax.f32 %v3334_v26, %v1284_v7 }
 0x17f   : > { %v1334_v47 = vmax.f32 %v1332_v37, %v1333_v10  ;;  %v1341_v42 = vmax.f32 %v1339_v32, %v1340_v34  ;;  %v1292_v33 = vmax.f32 %v3336_v51, %v1291_v20  ;;  %v1348_v43 = vmax.f32 %v1346_v27, %v1347_v9  ;;  %v1357_v20 = vld [vmem:[#allocation2 + $0x20] sm:$0xff] }
 0x180   : > { %v1378_v45 = vsel %vm1377_vm10, %v3352_v19, %v1376_v39  ;;  %v1390_v54 = vsel %vm1377_vm10, %v1320_v60, %v1389_v40  ;;  %v1299_v36 = vmax.f32 %v3338_v52, %v1298_v29  ;;  %v1355_v53 = vmax.f32 %v1353_v21, %v1354_v35 }
 0x181   : > { %v1380_v41 = vsel %vm1379_vm11, %v3354_v22, %v1378_v45  ;;  %v1391_v26 = vsel %vm1379_vm11, %v1327_v5, %v1390_v54 }
 0x182   : > { %v1382_v7 = vsel %vm1381_vm12, %v1278_v23, %v1380_v41  ;;  %v1392_v51 = vsel %vm1381_vm12, %v1334_v47, %v1391_v26 }
 0x183   : > { %v1384_v19 = vsel %vm1383_vm13, %v1285_v57, %v1382_v7  ;;  %v1393_v55 = vsel %vm1383_vm13, %v1341_v42, %v1392_v51 }
 0x184   : > { %v1386_v56 = vsel %vm1385_vm14, %v1292_v33, %v1384_v19  ;;  %v1394_v52 = vsel %vm1385_vm14, %v1348_v43, %v1393_v55 }
 0x185   : > { %v1388_v29 = vsel %vm1387_vm15, %v1299_v36, %v1386_v56  ;;  %v1395_v38 = vsel %vm1387_vm15, %v1355_v53, %v1394_v52 }
 0x186   : > { %v1398_v22 = vmax.f32 %v1357_v20, %v1388_v29  ;;  %v1399_v63 = vmax.f32 %v1358_v49, %v1395_v38 }
 0x188   : > { %1400 = vst.msk [vmem:[#allocation2 + $0x20] sm:$0xff] %vm151_vm0, %v1398_v22  ;;  %1401 = vst.msk [vmem:[#allocation2 + $0x28] sm:$0xff] %vm151_vm0, %v1399_v63 }
 0x189 PF: > { %s3393_s11 = sadd.s32 3, %s2587_s20 }
 0x18a   : > { %s3396_s12 = sld [smem:[#allocation8 + %s3393_s11]] }
 0x18b   : > { %s3399_s13 = sld [smem:[#allocation9 + %s3393_s11]] }
 0x190   : > { %p1406_p7 = scmp.lt.s32.totalorder %s3396_s12, 8 }
 0x191   : > { %p1405_p6 = scmp.gt.s32.totalorder %s3399_s13, 0 }
 0x193   : > { %p1407_p8 = pnand %p1406_p7, %p1405_p6 }
 0x194   : > { %v1411_v0 = vlaneseq (!%p1407_p8)  ;;  %v1413_v17 = vstv (!%p1407_p8), %s3396_s12  ;;  %v1415_v59 = vstv (!%p1407_p8), %s3399_s13  ;;  %v1418_v3 = vld [vmem:[%s2606_s0] sm:$0xff] (!%p1407_p8)  ;;  %v1419_v61 = vld [vmem:[%s2606_s0 + $0x10] sm:$0xff] (!%p1407_p8)  ;;  %vm1583_vm4 = vcmask (!%p1407_p8), 1041409  }
 0x195   : > { %1410 = sbr.rel (%p1407_p8) target bundleno = 451 (0x1c3), region = 52  ;;  %v1420_v1 = vld [vmem:[%s2606_s0 + $0x20] sm:$0xff] (!%p1407_p8)  ;;  %v1421_v14 = vld [vmem:[%s2606_s0 + $0x30] sm:$0xff] (!%p1407_p8)  ;;  %vm1585_vm5 = vcmask (!%p1407_p8), 1042434   ;;  %vm1587_vm6 = vcmask (!%p1407_p8), 1043459   ;;  %vm1589_vm7 = vcmask (!%p1407_p8), 1044484  }
 0x196   : > { %v1412_v8 = vshrl.u32 (!%p1407_p8), %v1411_v0, 7  ;;  %v1422_v44 = vld [vmem:[%s2606_s0 + $0x40] sm:$0xff] (!%p1407_p8)  ;;  %v1423_v13 = vld [vmem:[%s2606_s0 + $0x50] sm:$0xff] (!%p1407_p8)  ;;  %vm1591_vm8 = vcmask (!%p1407_p8), 1045509   ;;  %vm1593_vm9 = vcmask (!%p1407_p8), 1046534   ;;  %vm1595_vm10 = vcmask (!%p1407_p8), 1047559  }
 0x197   : > { %v1424_v18 = vld [vmem:[%s2606_s0 + $0x60] sm:$0xff] (!%p1407_p8)  ;;  %v1425_v31 = vld [vmem:[%s2606_s0 + $0x70] sm:$0xff] (!%p1407_p8) }
 0x198   : > { %vm1414_vm1 = vcmp.ge.s32.totalorder (!%p1407_p8), %v1412_v8, %v1413_v17  ;;  %vm1416_vm2 = vcmp.lt.s32.totalorder (!%p1407_p8), %v1412_v8, %v1415_v59  ;;  %v3418_v11 = vld [vmem:[%s2606_s0 + $0x80] sm:$0xff] (!%p1407_p8)  ;;  %v3421_v2 = vld [vmem:[%s2606_s0 + $0x90] sm:$0xff] (!%p1407_p8) }
 0x199   : > { %vm3412_vm3 = vmand (!%p1407_p8), %vm1414_vm1, %vm1416_vm2  ;;  %v3424_v6 = vld [vmem:[%s2606_s0 + $0xa0] sm:$0xff] (!%p1407_p8)  ;;  %v3427_v48 = vld [vmem:[%s2606_s0 + $0xb0] sm:$0xff] (!%p1407_p8) }
 0x19a   : > { %v1436_v15 = vsel (!%p1407_p8), %vm3412_vm3, %v1418_v3, -inf  ;;  %v1437_v16 = vsel (!%p1407_p8), %vm3412_vm3, %v1419_v61, -inf  ;;  %v1438_v12 = vsel (!%p1407_p8), %vm3412_vm3, %v1420_v1, -inf  ;;  %v1439_v50 = vsel (!%p1407_p8), %vm3412_vm3, %v1421_v14, -inf  ;;  %v1430_v55 = vld [vmem:[%s2606_s0 + $0xc0] sm:$0xff] (!%p1407_p8)  ;;  %v1431_v56 = vld [vmem:[%s2606_s0 + $0xd0] sm:$0xff] (!%p1407_p8) }
 0x19b   : > { %v1440_v4 = vsel (!%p1407_p8), %vm3412_vm3, %v1422_v44, -inf  ;;  %v1441_v58 = vsel (!%p1407_p8), %vm3412_vm3, %v1423_v13, -inf  ;;  %v1442_v62 = vsel (!%p1407_p8), %vm3412_vm3, %v1424_v18, -inf  ;;  %v1443_v24 = vsel (!%p1407_p8), %vm3412_vm3, %v1425_v31, -inf  ;;  %v1432_v63 = vld [vmem:[%s2606_s0 + $0xe0] sm:$0xff] (!%p1407_p8)  ;;  %v1433_v0 = vld [vmem:[%s2606_s0 + $0xf0] sm:$0xff] (!%p1407_p8) }
 0x19c   : > { %v1444_v25 = vsel %vm3412_vm3, %v3418_v11, -inf  ;;  %v1445_v37 = vsel %vm3412_vm3, %v3421_v2, -inf  ;;  %v1446_v32 = vsel %vm3412_vm3, %v3424_v6, -inf  ;;  %v1447_v27 = vsel %vm3412_vm3, %v3427_v48, -inf }
 0x19d   : > { %v1452_v21 = vsel %vm151_vm0, %v1436_v15, -inf  ;;  %v1459_v28 = vsel %vm151_vm0, %v1437_v16, -inf  ;;  %v1466_v30 = vsel %vm151_vm0, %v1438_v12, -inf  ;;  %v1473_v60 = vsel %vm151_vm0, %v1439_v50, -inf }
 0x19e   : > { %v1453_v5 = vrot.slane %v1452_v21, 4  ;;  %v1460_v10 = vrot.slane %v1459_v28, 4  ;;  %v1467_v34 = vrot.slane %v1466_v30, 4  ;;  %v1474_v9 = vrot.slane %v1473_v60, 4 }
 0x19f   : > { %v1480_v35 = vsel %vm151_vm0, %v1440_v4, -inf  ;;  %v1487_v23 = vsel %vm151_vm0, %v1441_v58, -inf  ;;  %v1494_v39 = vsel %vm151_vm0, %v1442_v62, -inf  ;;  %v1501_v40 = vsel %vm151_vm0, %v1443_v24, -inf }
 0x1a0   : > { %v1454_v57 = vmax.f32 %v1452_v21, %v1453_v5  ;;  %v1461_v47 = vmax.f32 %v1459_v28, %v1460_v10  ;;  %v1468_v42 = vmax.f32 %v1466_v30, %v1467_v34  ;;  %v1475_v33 = vmax.f32 %v1473_v60, %v1474_v9 }
 0x1a1   : > { %v1481_v43 = vrot.slane %v1480_v35, 4  ;;  %v1488_v45 = vrot.slane %v1487_v23, 4  ;;  %v1495_v54 = vrot.slane %v1494_v39, 4  ;;  %v1502_v36 = vrot.slane %v1501_v40, 4 }
 0x1a2   : > { %v1455_v53 = vrot.slane %v1454_v57, 2  ;;  %v1462_v41 = vrot.slane %v1461_v47, 2  ;;  %v1469_v26 = vrot.slane %v1468_v42, 2  ;;  %v1476_v7 = vrot.slane %v1475_v33, 2 }
 0x1a3   : > { %v1482_v51 = vmax.f32 %v1480_v35, %v1481_v43  ;;  %v1489_v20 = vmax.f32 %v1487_v23, %v1488_v45  ;;  %v1496_v49 = vmax.f32 %v1494_v39, %v1495_v54  ;;  %v1503_v19 = vmax.f32 %v1501_v40, %v1502_v36 }
 0x1a4   : > { %v1456_v52 = vmax.f32 %v1454_v57, %v1455_v53  ;;  %v1463_v29 = vmax.f32 %v1461_v47, %v1462_v41  ;;  %v1470_v38 = vmax.f32 %v1468_v42, %v1469_v26  ;;  %v1477_v22 = vmax.f32 %v1475_v33, %v1476_v7 }
 0x1a5   : > { %v1483_v17 = vrot.slane %v1482_v51, 2  ;;  %v1490_v59 = vrot.slane %v1489_v20, 2  ;;  %v1497_v8 = vrot.slane %v1496_v49, 2  ;;  %v1504_v3 = vrot.slane %v1503_v19, 2 }
 0x1a6   : > { %v1457_v61 = vrot.slane %v1456_v52, 1  ;;  %v1464_v1 = vrot.slane %v1463_v29, 1  ;;  %v1471_v14 = vrot.slane %v1470_v38, 1  ;;  %v1478_v44 = vrot.slane %v1477_v22, 1 }
 0x1a7   : > { %v3469_v13 = vmax.f32 %v1482_v51, %v1483_v17  ;;  %v3471_v18 = vmax.f32 %v1489_v20, %v1490_v59  ;;  %v3473_v31 = vmax.f32 %v1496_v49, %v1497_v8  ;;  %v3475_v11 = vmax.f32 %v1503_v19, %v1504_v3 }
 0x1a8   : > { %v1448_v2 = vsel %vm3412_vm3, %v1430_v55, -inf  ;;  %v1449_v6 = vsel %vm3412_vm3, %v1431_v56, -inf  ;;  %v1450_v48 = vsel %vm3412_vm3, %v1432_v63, -inf  ;;  %v1451_v15 = vsel %vm3412_vm3, %v1433_v0, -inf }
 0x1a9   : > { %v3485_v16 = vmax.f32 %v1456_v52, %v1457_v61  ;;  %v3487_v12 = vmax.f32 %v1463_v29, %v1464_v1  ;;  %v3489_v50 = vmax.f32 %v1470_v38, %v1471_v14  ;;  %v3491_v4 = vmax.f32 %v1477_v22, %v1478_v44 }
 0x1aa   : > { %v1508_v58 = vsel %vm151_vm0, %v1444_v25, -inf  ;;  %v1515_v62 = vsel %vm151_vm0, %v1445_v37, -inf  ;;  %v1522_v24 = vsel %vm151_vm0, %v1446_v32, -inf  ;;  %v1529_v21 = vsel %vm151_vm0, %v1447_v27, -inf }
 0x1ab   : > { %v1485_v28 = vrot.slane %v3469_v13, 1  ;;  %v1492_v46 = vrot.slane %v3471_v18, 1  ;;  %v1499_v30 = vrot.slane %v3473_v31, 1  ;;  %v1506_v60 = vrot.slane %v3475_v11, 1 }
 0x1ac   : > { %v1509_v5 = vrot.slane %v1508_v58, 4  ;;  %v1516_v10 = vrot.slane %v1515_v62, 4  ;;  %v1523_v34 = vrot.slane %v1522_v24, 4  ;;  %v1530_v9 = vrot.slane %v1529_v21, 4 }
 0x1ad   : > { %v1536_v25 = vsel %vm151_vm0, %v1448_v2, -inf  ;;  %v1543_v37 = vsel %vm151_vm0, %v1449_v6, -inf  ;;  %v1550_v32 = vsel %vm151_vm0, %v1450_v48, -inf  ;;  %v1557_v27 = vsel %vm151_vm0, %v1451_v15, -inf }
 0x1ae   : > { %v1510_v35 = vmax.f32 %v1508_v58, %v1509_v5  ;;  %v1517_v23 = vmax.f32 %v1515_v62, %v1516_v10  ;;  %v1524_v39 = vmax.f32 %v1522_v24, %v1523_v34  ;;  %v1531_v40 = vmax.f32 %v1529_v21, %v1530_v9 }
 0x1af   : > { %v1537_v57 = vrot.slane %v1536_v25, 4  ;;  %v1544_v47 = vrot.slane %v1543_v37, 4  ;;  %v1551_v42 = vrot.slane %v1550_v32, 4  ;;  %v1558_v33 = vrot.slane %v1557_v27, 4 }
 0x1b0   : > { %v1511_v43 = vrot.slane %v1510_v35, 2  ;;  %v1518_v45 = vrot.slane %v1517_v23, 2  ;;  %v1525_v54 = vrot.slane %v1524_v39, 2  ;;  %v1532_v36 = vrot.slane %v1531_v40, 2 }
 0x1b1   : > { %v1538_v53 = vmax.f32 %v1536_v25, %v1537_v57  ;;  %v1545_v41 = vmax.f32 %v1543_v37, %v1544_v47  ;;  %v1552_v26 = vmax.f32 %v1550_v32, %v1551_v42  ;;  %v1559_v7 = vmax.f32 %v1557_v27, %v1558_v33  ;;  %v1566_v37 = vld [vmem:[#allocation2 + $0x38] sm:$0xff] }
 0x1b2   : > { %v1512_v51 = vmax.f32 %v1510_v35, %v1511_v43  ;;  %v1519_v20 = vmax.f32 %v1517_v23, %v1518_v45  ;;  %v1526_v49 = vmax.f32 %v1524_v39, %v1525_v54  ;;  %v1533_v19 = vmax.f32 %v1531_v40, %v1532_v36 }
 0x1b3   : > { %v1539_v55 = vrot.slane %v1538_v53, 2  ;;  %v1546_v56 = vrot.slane %v1545_v41, 2  ;;  %v1553_v52 = vrot.slane %v1552_v26, 2  ;;  %v1560_v29 = vrot.slane %v1559_v7, 2 }
 0x1b4   : > { %v1513_v38 = vrot.slane %v1512_v51, 1  ;;  %v1520_v22 = vrot.slane %v1519_v20, 1  ;;  %v1527_v63 = vrot.slane %v1526_v49, 1  ;;  %v1534_v0 = vrot.slane %v1533_v19, 1 }
 0x1b5   : > { %v1540_v17 = vmax.f32 %v1538_v53, %v1539_v55  ;;  %v1547_v59 = vmax.f32 %v1545_v41, %v1546_v56  ;;  %v1554_v8 = vmax.f32 %v1552_v26, %v1553_v52  ;;  %v1561_v3 = vmax.f32 %v1559_v7, %v1560_v29 }
 0x1b6   : > { %v1514_v61 = vmax.f32 %v1512_v51, %v1513_v38  ;;  %v1521_v1 = vmax.f32 %v1519_v20, %v1520_v22  ;;  %v1528_v14 = vmax.f32 %v1526_v49, %v1527_v63  ;;  %v1535_v44 = vmax.f32 %v1533_v19, %v1534_v0 }
 0x1b7   : > { %v1541_v2 = vrot.slane %v1540_v17, 1  ;;  %v1548_v6 = vrot.slane %v1547_v59, 1  ;;  %v1555_v48 = vrot.slane %v1554_v8, 1  ;;  %v1562_v15 = vrot.slane %v1561_v3, 1 }
 0x1b8   : > { %v1486_v58 = vmax.f32 %v3469_v13, %v1485_v28  ;;  %v1584_v62 = vsel %vm1583_vm4, %v3487_v12, %v3485_v16  ;;  %v1597_v24 = vsel %vm1583_vm4, %v1521_v1, %v1514_v61  ;;  %v1493_v21 = vmax.f32 %v3471_v18, %v1492_v46 }
 0x1b9   : > { %v1542_v5 = vmax.f32 %v1540_v17, %v1541_v2  ;;  %v1549_v10 = vmax.f32 %v1547_v59, %v1548_v6  ;;  %v1500_v34 = vmax.f32 %v3473_v31, %v1499_v30  ;;  %v1556_v9 = vmax.f32 %v1554_v8, %v1555_v48  ;;  %v1565_v30 = vld [vmem:[#allocation2 + $0x30] sm:$0xff] }
 0x1ba   : > { %v1586_v25 = vsel %vm1585_vm5, %v3489_v50, %v1584_v62  ;;  %v1598_v13 = vsel %vm1585_vm5, %v1528_v14, %v1597_v24  ;;  %v1507_v16 = vmax.f32 %v3475_v11, %v1506_v60  ;;  %v1563_v12 = vmax.f32 %v1561_v3, %v1562_v15 }
 0x1bb   : > { %v1588_v28 = vsel %vm1587_vm6, %v3491_v4, %v1586_v25  ;;  %v1599_v18 = vsel %vm1587_vm6, %v1535_v44, %v1598_v13 }
 0x1bc   : > { %v1590_v46 = vsel %vm1589_vm7, %v1486_v58, %v1588_v28  ;;  %v1600_v31 = vsel %vm1589_vm7, %v1542_v5, %v1599_v18 }
 0x1bd   : > { %v1592_v50 = vsel %vm1591_vm8, %v1493_v21, %v1590_v46  ;;  %v1601_v32 = vsel %vm1591_vm8, %v1549_v10, %v1600_v31 }
 0x1be   : > { %v1594_v27 = vsel %vm1593_vm9, %v1500_v34, %v1592_v50  ;;  %v1602_v11 = vsel %vm1593_vm9, %v1556_v9, %v1601_v32 }
 0x1bf   : > { %v1596_v60 = vsel %vm1595_vm10, %v1507_v16, %v1594_v27  ;;  %v1603_v35 = vsel %vm1595_vm10, %v1563_v12, %v1602_v11 }
 0x1c0   : > { %v1606_v4 = vmax.f32 %v1565_v30, %v1596_v60  ;;  %v1607_v23 = vmax.f32 %v1566_v37, %v1603_v35 }
 0x1c2   : > { %1608 = vst.msk [vmem:[#allocation2 + $0x30] sm:$0xff] %vm151_vm0, %v1606_v4  ;;  %1609 = vst.msk [vmem:[#allocation2 + $0x38] sm:$0xff] %vm151_vm0, %v1607_v23 }
 0x1c3 PF: > { %p1610_p9 = scmp.gt.s32.totalorder %s3399_s13, 8  ;;  %p1611_p10 = scmp.lt.s32.totalorder %s3396_s12, 16 }
 0x1c5   : > { %p1612_p11 = pnand %p1611_p10, %p1610_p9 }
 0x1c6   : > { %v1616_v39 = vlaneseq (!%p1612_p11)  ;;  %v1619_v57 = vstv (!%p1612_p11), %s3396_s12  ;;  %v1621_v47 = vstv (!%p1612_p11), %s3399_s13  ;;  %v1624_v33 = vld [vmem:[%s2606_s0 + $0x8] sm:$0xff] (!%p1612_p11)  ;;  %v1625_v43 = vld [vmem:[%s2606_s0 + $0x18] sm:$0xff] (!%p1612_p11)  ;;  %vm1789_vm14 = vcmask (!%p1612_p11), 1041409  }
 0x1c7   : > { %1615 = sbr.rel (%p1612_p11) target bundleno = 503 (0x1f7), region = 56  ;;  %v1626_v45 = vld [vmem:[%s2606_s0 + $0x28] sm:$0xff] (!%p1612_p11)  ;;  %v1627_v54 = vld [vmem:[%s2606_s0 + $0x38] sm:$0xff] (!%p1612_p11)  ;;  %vm1791_vm15 = vcmask (!%p1612_p11), 1042434   ;;  %vm1793_vm1 = vcmask (!%p1612_p11), 1043459   ;;  %vm1795_vm2 = vcmask (!%p1612_p11), 1044484  }
 0x1c8   : > { %v1617_v40 = vshrl.u32 (!%p1612_p11), %v1616_v39, 7  ;;  %v1628_v36 = vld [vmem:[%s2606_s0 + $0x48] sm:$0xff] (!%p1612_p11)  ;;  %v1629_v53 = vld [vmem:[%s2606_s0 + $0x58] sm:$0xff] (!%p1612_p11)  ;;  %vm1797_vm3 = vcmask (!%p1612_p11), 1045509   ;;  %vm1799_vm4 = vcmask (!%p1612_p11), 1046534   ;;  %vm1801_vm5 = vcmask (!%p1612_p11), 1047559  }
 0x1c9   : > { %v1630_v41 = vld [vmem:[%s2606_s0 + $0x68] sm:$0xff] (!%p1612_p11)  ;;  %v1631_v7 = vld [vmem:[%s2606_s0 + $0x78] sm:$0xff] (!%p1612_p11) }
 0x1ca   : > { %v1618_v42 = vadd.s32 (!%p1612_p11), 8, %v1617_v40  ;;  %v3546_v51 = vld [vmem:[%s2606_s0 + $0x88] sm:$0xff] (!%p1612_p11)  ;;  %v3549_v20 = vld [vmem:[%s2606_s0 + $0x98] sm:$0xff] (!%p1612_p11) }
 0x1cb   : > { %v3552_v49 = vld [vmem:[%s2606_s0 + $0xa8] sm:$0xff] (!%p1612_p11)  ;;  %v3555_v19 = vld [vmem:[%s2606_s0 + $0xb8] sm:$0xff] (!%p1612_p11) }
 0x1cc   : > { %vm1620_vm11 = vcmp.ge.s32.totalorder (!%p1612_p11), %v1618_v42, %v1619_v57  ;;  %vm1622_vm12 = vcmp.lt.s32.totalorder (!%p1612_p11), %v1618_v42, %v1621_v47  ;;  %v1636_v27 = vld [vmem:[%s2606_s0 + $0xc8] sm:$0xff] (!%p1612_p11)  ;;  %v1637_v11 = vld [vmem:[%s2606_s0 + $0xd8] sm:$0xff] (!%p1612_p11) }
 0x1cd   : > { %vm3540_vm13 = vmand (!%p1612_p11), %vm1620_vm11, %vm1622_vm12  ;;  %v1638_v39 = vld [vmem:[%s2606_s0 + $0xe8] sm:$0xff] (!%p1612_p11)  ;;  %v1639_v40 = vld [vmem:[%s2606_s0 + $0xf8] sm:$0xff] (!%p1612_p11) }
 0x1ce   : > { %v1642_v55 = vsel %vm3540_vm13, %v1624_v33, -inf  ;;  %v1643_v56 = vsel %vm3540_vm13, %v1625_v43, -inf  ;;  %v1644_v52 = vsel %vm3540_vm13, %v1626_v45, -inf  ;;  %v1645_v29 = vsel %vm3540_vm13, %v1627_v54, -inf }
 0x1cf   : > { %v1646_v38 = vsel %vm3540_vm13, %v1628_v36, -inf  ;;  %v1647_v22 = vsel %vm3540_vm13, %v1629_v53, -inf  ;;  %v1648_v63 = vsel %vm3540_vm13, %v1630_v41, -inf  ;;  %v1649_v0 = vsel %vm3540_vm13, %v1631_v7, -inf }
 0x1d0   : > { %v1650_v17 = vsel %vm3540_vm13, %v3546_v51, -inf  ;;  %v1651_v59 = vsel %vm3540_vm13, %v3549_v20, -inf  ;;  %v1652_v8 = vsel %vm3540_vm13, %v3552_v49, -inf  ;;  %v1653_v3 = vsel %vm3540_vm13, %v3555_v19, -inf }
 0x1d1   : > { %v1658_v61 = vsel %vm151_vm0, %v1642_v55, -inf  ;;  %v1665_v1 = vsel %vm151_vm0, %v1643_v56, -inf  ;;  %v1672_v14 = vsel %vm151_vm0, %v1644_v52, -inf  ;;  %v1679_v44 = vsel %vm151_vm0, %v1645_v29, -inf }
 0x1d2   : > { %v1659_v2 = vrot.slane %v1658_v61, 4  ;;  %v1666_v6 = vrot.slane %v1665_v1, 4  ;;  %v1673_v48 = vrot.slane %v1672_v14, 4  ;;  %v1680_v15 = vrot.slane %v1679_v44, 4 }
 0x1d3   : > { %v1686_v58 = vsel %vm151_vm0, %v1646_v38, -inf  ;;  %v1693_v62 = vsel %vm151_vm0, %v1647_v22, -inf  ;;  %v1700_v24 = vsel %vm151_vm0, %v1648_v63, -inf  ;;  %v1707_v21 = vsel %vm151_vm0, %v1649_v0, -inf }
 0x1d4   : > { %v1660_v5 = vmax.f32 %v1658_v61, %v1659_v2  ;;  %v1667_v10 = vmax.f32 %v1665_v1, %v1666_v6  ;;  %v1674_v34 = vmax.f32 %v1672_v14, %v1673_v48  ;;  %v1681_v9 = vmax.f32 %v1679_v44, %v1680_v15 }
 0x1d5   : > { %v1687_v25 = vrot.slane %v1686_v58, 4  ;;  %v1694_v13 = vrot.slane %v1693_v62, 4  ;;  %v1701_v16 = vrot.slane %v1700_v24, 4  ;;  %v1708_v12 = vrot.slane %v1707_v21, 4 }
 0x1d6   : > { %v1661_v28 = vrot.slane %v1660_v5, 2  ;;  %v1668_v18 = vrot.slane %v1667_v10, 2  ;;  %v1675_v46 = vrot.slane %v1674_v34, 2  ;;  %v1682_v31 = vrot.slane %v1681_v9, 2 }
 0x1d7   : > { %v1688_v30 = vmax.f32 %v1686_v58, %v1687_v25  ;;  %v1695_v37 = vmax.f32 %v1693_v62, %v1694_v13  ;;  %v1702_v50 = vmax.f32 %v1700_v24, %v1701_v16  ;;  %v1709_v32 = vmax.f32 %v1707_v21, %v1708_v12 }
 0x1d8   : > { %v1662_v60 = vmax.f32 %v1660_v5, %v1661_v28  ;;  %v1669_v35 = vmax.f32 %v1667_v10, %v1668_v18  ;;  %v1676_v4 = vmax.f32 %v1674_v34, %v1675_v46  ;;  %v1683_v23 = vmax.f32 %v1681_v9, %v1682_v31 }
 0x1d9   : > { %v1689_v57 = vrot.slane %v1688_v30, 2  ;;  %v1696_v47 = vrot.slane %v1695_v37, 2  ;;  %v1703_v42 = vrot.slane %v1702_v50, 2  ;;  %v1710_v33 = vrot.slane %v1709_v32, 2 }
 0x1da   : > { %v1663_v43 = vrot.slane %v1662_v60, 1  ;;  %v1670_v45 = vrot.slane %v1669_v35, 1  ;;  %v1677_v54 = vrot.slane %v1676_v4, 1  ;;  %v1684_v36 = vrot.slane %v1683_v23, 1 }
 0x1db   : > { %v3597_v53 = vmax.f32 %v1688_v30, %v1689_v57  ;;  %v3599_v41 = vmax.f32 %v1695_v37, %v1696_v47  ;;  %v3601_v7 = vmax.f32 %v1702_v50, %v1703_v42  ;;  %v3603_v51 = vmax.f32 %v1709_v32, %v1710_v33 }
 0x1dc   : > { %v1654_v20 = vsel %vm3540_vm13, %v1636_v27, -inf  ;;  %v1655_v49 = vsel %vm3540_vm13, %v1637_v11, -inf  ;;  %v1656_v19 = vsel %vm3540_vm13, %v1638_v39, -inf  ;;  %v1657_v55 = vsel %vm3540_vm13, %v1639_v40, -inf }
 0x1dd   : > { %v3613_v56 = vmax.f32 %v1662_v60, %v1663_v43  ;;  %v3615_v52 = vmax.f32 %v1669_v35, %v1670_v45  ;;  %v3617_v29 = vmax.f32 %v1676_v4, %v1677_v54  ;;  %v3619_v38 = vmax.f32 %v1683_v23, %v1684_v36 }
 0x1de   : > { %v1714_v22 = vsel %vm151_vm0, %v1650_v17, -inf  ;;  %v1721_v63 = vsel %vm151_vm0, %v1651_v59, -inf  ;;  %v1728_v0 = vsel %vm151_vm0, %v1652_v8, -inf  ;;  %v1735_v61 = vsel %vm151_vm0, %v1653_v3, -inf }
 0x1df   : > { %v1691_v1 = vrot.slane %v3597_v53, 1  ;;  %v1698_v26 = vrot.slane %v3599_v41, 1  ;;  %v1705_v14 = vrot.slane %v3601_v7, 1  ;;  %v1712_v44 = vrot.slane %v3603_v51, 1 }
 0x1e0   : > { %v1715_v2 = vrot.slane %v1714_v22, 4  ;;  %v1722_v6 = vrot.slane %v1721_v63, 4  ;;  %v1729_v48 = vrot.slane %v1728_v0, 4  ;;  %v1736_v15 = vrot.slane %v1735_v61, 4 }
 0x1e1   : > { %v1742_v17 = vsel %vm151_vm0, %v1654_v20, -inf  ;;  %v1749_v59 = vsel %vm151_vm0, %v1655_v49, -inf  ;;  %v1756_v8 = vsel %vm151_vm0, %v1656_v19, -inf  ;;  %v1763_v3 = vsel %vm151_vm0, %v1657_v55, -inf }
 0x1e2   : > { %v1716_v58 = vmax.f32 %v1714_v22, %v1715_v2  ;;  %v1723_v62 = vmax.f32 %v1721_v63, %v1722_v6  ;;  %v1730_v24 = vmax.f32 %v1728_v0, %v1729_v48  ;;  %v1737_v21 = vmax.f32 %v1735_v61, %v1736_v15 }
 0x1e3   : > { %v1743_v5 = vrot.slane %v1742_v17, 4  ;;  %v1750_v10 = vrot.slane %v1749_v59, 4  ;;  %v1757_v34 = vrot.slane %v1756_v8, 4  ;;  %v1764_v9 = vrot.slane %v1763_v3, 4 }
 0x1e4   : > { %v1717_v25 = vrot.slane %v1716_v58, 2  ;;  %v1724_v13 = vrot.slane %v1723_v62, 2  ;;  %v1731_v16 = vrot.slane %v1730_v24, 2  ;;  %v1738_v12 = vrot.slane %v1737_v21, 2 }
 0x1e5   : > { %v1744_v28 = vmax.f32 %v1742_v17, %v1743_v5  ;;  %v1751_v18 = vmax.f32 %v1749_v59, %v1750_v10  ;;  %v1758_v46 = vmax.f32 %v1756_v8, %v1757_v34  ;;  %v1765_v31 = vmax.f32 %v1763_v3, %v1764_v9  ;;  %v1772_v59 = vld [vmem:[#allocation2 + $0x38] sm:$0xff] }
 0x1e6   : > { %v1718_v30 = vmax.f32 %v1716_v58, %v1717_v25  ;;  %v1725_v37 = vmax.f32 %v1723_v62, %v1724_v13  ;;  %v1732_v50 = vmax.f32 %v1730_v24, %v1731_v16  ;;  %v1739_v32 = vmax.f32 %v1737_v21, %v1738_v12 }
 0x1e7   : > { %v1745_v27 = vrot.slane %v1744_v28, 2  ;;  %v1752_v11 = vrot.slane %v1751_v18, 2  ;;  %v1759_v60 = vrot.slane %v1758_v46, 2  ;;  %v1766_v35 = vrot.slane %v1765_v31, 2 }
 0x1e8   : > { %v1719_v4 = vrot.slane %v1718_v30, 1  ;;  %v1726_v23 = vrot.slane %v1725_v37, 1  ;;  %v1733_v39 = vrot.slane %v1732_v50, 1  ;;  %v1740_v40 = vrot.slane %v1739_v32, 1 }
 0x1e9   : > { %v1746_v57 = vmax.f32 %v1744_v28, %v1745_v27  ;;  %v1753_v47 = vmax.f32 %v1751_v18, %v1752_v11  ;;  %v1760_v42 = vmax.f32 %v1758_v46, %v1759_v60  ;;  %v1767_v33 = vmax.f32 %v1765_v31, %v1766_v35 }
 0x1ea   : > { %v1720_v43 = vmax.f32 %v1718_v30, %v1719_v4  ;;  %v1727_v45 = vmax.f32 %v1725_v37, %v1726_v23  ;;  %v1734_v54 = vmax.f32 %v1732_v50, %v1733_v39  ;;  %v1741_v36 = vmax.f32 %v1739_v32, %v1740_v40 }
 0x1eb   : > { %v1747_v20 = vrot.slane %v1746_v57, 1  ;;  %v1754_v49 = vrot.slane %v1753_v47, 1  ;;  %v1761_v19 = vrot.slane %v1760_v42, 1  ;;  %v1768_v55 = vrot.slane %v1767_v33, 1 }
 0x1ec   : > { %v1692_v22 = vmax.f32 %v3597_v53, %v1691_v1  ;;  %v1790_v63 = vsel %vm1789_vm14, %v3615_v52, %v3613_v56  ;;  %v1803_v0 = vsel %vm1789_vm14, %v1727_v45, %v1720_v43  ;;  %v1699_v61 = vmax.f32 %v3599_v41, %v1698_v26 }
 0x1ed   : > { %v1748_v2 = vmax.f32 %v1746_v57, %v1747_v20  ;;  %v1755_v6 = vmax.f32 %v1753_v47, %v1754_v49  ;;  %v1706_v48 = vmax.f32 %v3601_v7, %v1705_v14  ;;  %v1762_v15 = vmax.f32 %v1760_v42, %v1761_v19  ;;  %v1771_v14 = vld [vmem:[#allocation2 + $0x30] sm:$0xff] }
 0x1ee   : > { %v1792_v17 = vsel %vm1791_vm15, %v3617_v29, %v1790_v63  ;;  %v1804_v53 = vsel %vm1791_vm15, %v1734_v54, %v1803_v0  ;;  %v1713_v56 = vmax.f32 %v3603_v51, %v1712_v44  ;;  %v1769_v52 = vmax.f32 %v1767_v33, %v1768_v55 }
 0x1ef   : > { %v1794_v1 = vsel %vm1793_vm1, %v3619_v38, %v1792_v17  ;;  %v1805_v41 = vsel %vm1793_vm1, %v1741_v36, %v1804_v53 }
 0x1f0   : > { %v1796_v26 = vsel %vm1795_vm2, %v1692_v22, %v1794_v1  ;;  %v1806_v7 = vsel %vm1795_vm2, %v1748_v2, %v1805_v41 }
 0x1f1   : > { %v1798_v29 = vsel %vm1797_vm3, %v1699_v61, %v1796_v26  ;;  %v1807_v8 = vsel %vm1797_vm3, %v1755_v6, %v1806_v7 }
 0x1f2   : > { %v1800_v3 = vsel %vm1799_vm4, %v1706_v48, %v1798_v29  ;;  %v1808_v51 = vsel %vm1799_vm4, %v1762_v15, %v1807_v8 }
 0x1f3   : > { %v1802_v44 = vsel %vm1801_vm5, %v1713_v56, %v1800_v3  ;;  %v1809_v58 = vsel %vm1801_vm5, %v1769_v52, %v1808_v51 }
 0x1f4   : > { %v1812_v38 = vmax.f32 %v1771_v14, %v1802_v44  ;;  %v1813_v62 = vmax.f32 %v1772_v59, %v1809_v58 }
 0x1f6   : > { %1814 = vst.msk [vmem:[#allocation2 + $0x30] sm:$0xff] %vm151_vm0, %v1812_v38  ;;  %1815 = vst.msk [vmem:[#allocation2 + $0x38] sm:$0xff] %vm151_vm0, %v1813_v62 }
 0x1f7 PF: > { %s3658_s2 = sld [smem:[#allocation6 + %s2587_s20]] }
 0x1f8   : > { %s3661_s3 = sld [smem:[#allocation7 + %s2587_s20]] }
 0x1fd   : > { %p1819_p13 = scmp.lt.s32.totalorder %s3658_s2, 8 }
 0x1fe   : > { %p1818_p12 = scmp.gt.s32.totalorder %s3661_s3, 0 }
 0x200   : > { %p1820_p0 = pnand %p1819_p13, %p1818_p12 }
 0x201   : > { %v1824_v24 = vlaneseq (!%p1820_p0)  ;;  %v1826_v21 = vstv (!%p1820_p0), %s3658_s2  ;;  %v1828_v5 = vstv (!%p1820_p0), %s3661_s3  ;;  %v1831_v34 = vld [vmem:[#allocation2] sm:$0xff] (!%p1820_p0)  ;;  %v1832_v9 = vld [vmem:[#allocation2 + $0x10] sm:$0xff] (!%p1820_p0)  ;;  %vm1874_vm9 = vcmask (!%p1820_p0), 1041409  }
 0x202   : > { %1823 = sbr.rel (%p1820_p0) target bundleno = 539 (0x21b), region = 60  ;;  %v1833_v25 = vld [vmem:[#allocation2 + $0x20] sm:$0xff] (!%p1820_p0)  ;;  %v1834_v13 = vld [vmem:[#allocation2 + $0x30] sm:$0xff] (!%p1820_p0)  ;;  %vm1876_vm10 = vcmask (!%p1820_p0), 1042434   ;;  %vm1878_vm11 = vcmask (!%p1820_p0), 1043459   ;;  %vm1882_vm12 = vcmask (!%p1820_p0), 27648  }
 0x203   : > { %v1825_v10 = vshrl.u32 (!%p1820_p0), %v1824_v24, 7  ;;  %v1869_v0 = vld [vmem:[#allocation3] sm:$0xf] (!%p1820_p0) }
 0x205   : > { %vm1827_vm6 = vcmp.ge.s32.totalorder (!%p1820_p0), %v1825_v10, %v1826_v21  ;;  %vm1829_vm7 = vcmp.lt.s32.totalorder (!%p1820_p0), %v1825_v10, %v1828_v5 }
 0x206   : > { %vm1830_vm8 = vmand (!%p1820_p0), %vm1827_vm6, %vm1829_vm7 }
 0x207   : > { %v1837_v16 = vsel (!%p1820_p0), %vm1830_vm8, %v1831_v34, -inf  ;;  %v1838_v12 = vsel (!%p1820_p0), %vm1830_vm8, %v1832_v9, -inf  ;;  %v1839_v28 = vsel (!%p1820_p0), %vm1830_vm8, %v1833_v25, -inf  ;;  %v1840_v18 = vsel (!%p1820_p0), %vm1830_vm8, %v1834_v13, -inf }
 0x208   : > { %v1841_v46 = vsel (!%p1820_p0), %vm151_vm0, %v1837_v16, -inf  ;;  %v1848_v31 = vsel (!%p1820_p0), %vm151_vm0, %v1838_v12, -inf  ;;  %v1855_v30 = vsel (!%p1820_p0), %vm151_vm0, %v1839_v28, -inf  ;;  %v1862_v37 = vsel (!%p1820_p0), %vm151_vm0, %v1840_v18, -inf }
 0x209   : > { %v1842_v50 = vrot.slane %v1841_v46, 4  ;;  %v1849_v32 = vrot.slane %v1848_v31, 4  ;;  %v1856_v27 = vrot.slane %v1855_v30, 4  ;;  %v1863_v11 = vrot.slane %v1862_v37, 4 }
 0x20b   : > { %v1843_v60 = vmax.f32 %v1841_v46, %v1842_v50  ;;  %v1850_v35 = vmax.f32 %v1848_v31, %v1849_v32  ;;  %v1857_v4 = vmax.f32 %v1855_v30, %v1856_v27  ;;  %v1864_v23 = vmax.f32 %v1862_v37, %v1863_v11 }
 0x20d   : > { %v1844_v39 = vrot.slane %v1843_v60, 2  ;;  %v1851_v40 = vrot.slane %v1850_v35, 2  ;;  %v1858_v57 = vrot.slane %v1857_v4, 2  ;;  %v1865_v47 = vrot.slane %v1864_v23, 2 }
 0x20f   : > { %v1845_v42 = vmax.f32 %v1843_v60, %v1844_v39  ;;  %v1852_v33 = vmax.f32 %v1850_v35, %v1851_v40  ;;  %v1859_v43 = vmax.f32 %v1857_v4, %v1858_v57  ;;  %v1866_v45 = vmax.f32 %v1864_v23, %v1865_v47 }
 0x211   : > { %v1846_v54 = vrot.slane %v1845_v42, 1  ;;  %v1853_v36 = vrot.slane %v1852_v33, 1  ;;  %v1860_v20 = vrot.slane %v1859_v43, 1  ;;  %v1867_v49 = vrot.slane %v1866_v45, 1 }
 0x213   : > { %v1847_v19 = vmax.f32 %v1845_v42, %v1846_v54  ;;  %v1854_v55 = vmax.f32 %v1852_v33, %v1853_v36  ;;  %v1861_v22 = vmax.f32 %v1859_v43, %v1860_v20  ;;  %v1868_v63 = vmax.f32 %v1866_v45, %v1867_v49 }
 0x215   : > { %v1875_v61 = vsel %vm1874_vm9, %v1854_v55, %v1847_v19 }
 0x216   : > { %v1877_v2 = vsel %vm1876_vm10, %v1861_v22, %v1875_v61 }
 0x217   : > { %v1879_v6 = vsel %vm1878_vm11, %v1868_v63, %v1877_v2 }
 0x218   : > { %v1881_v48 = vmax.f32 %v1869_v0, %v1879_v6 }
 0x21a   : > { %1883 = vst.msk [vmem:[#allocation3] sm:$0xf] %vm1882_vm12, %v1881_v48 }
 0x21b PF: > { %p1884_p1 = scmp.gt.s32.totalorder %s3661_s3, 8  ;;  %p1885_p2 = scmp.lt.s32.totalorder %s3658_s2, 16 }
 0x21d   : > { %p1886_p3 = pnand %p1885_p2, %p1884_p1 }
 0x21e   : > { %v1890_v15 = vlaneseq (!%p1886_p3)  ;;  %v1893_v53 = vstv (!%p1886_p3), %s3658_s2  ;;  %v1895_v56 = vstv (!%p1886_p3), %s3661_s3  ;;  %v1898_v1 = vld [vmem:[#allocation2 + $0x8] sm:$0xff] (!%p1886_p3)  ;;  %v1899_v41 = vld [vmem:[#allocation2 + $0x18] sm:$0xff] (!%p1886_p3)  ;;  %vm1941_vm1 = vcmask (!%p1886_p3), 1041409  }
 0x21f   : > { %1889 = sbr.rel (%p1886_p3) target bundleno = 570 (0x23a), region = 64  ;;  %v1900_v26 = vld [vmem:[#allocation2 + $0x28] sm:$0xff] (!%p1886_p3)  ;;  %v1901_v7 = vld [vmem:[#allocation2 + $0x38] sm:$0xff] (!%p1886_p3)  ;;  %vm1943_vm2 = vcmask (!%p1886_p3), 1042434   ;;  %vm1945_vm3 = vcmask (!%p1886_p3), 1043459   ;;  %vm1949_vm4 = vcmask (!%p1886_p3), 27648  }
 0x220   : > { %v1891_v17 = vshrl.u32 (!%p1886_p3), %v1890_v15, 7 }
 0x221   : > { %v1936_v4 = vld [vmem:[#allocation3] sm:$0xf] (!%p1886_p3) }
 0x222   : > { %v1892_v52 = vadd.s32 (!%p1886_p3), 8, %v1891_v17 }
 0x224   : > { %vm1894_vm13 = vcmp.ge.s32.totalorder (!%p1886_p3), %v1892_v52, %v1893_v53  ;;  %vm1896_vm14 = vcmp.lt.s32.totalorder (!%p1886_p3), %v1892_v52, %v1895_v56 }
 0x225   : > { %vm1897_vm15 = vmand (!%p1886_p3), %vm1894_vm13, %vm1896_vm14 }
 0x226   : > { %v1904_v14 = vsel %vm1897_vm15, %v1898_v1, -inf  ;;  %v1905_v59 = vsel %vm1897_vm15, %v1899_v41, -inf  ;;  %v1906_v29 = vsel %vm1897_vm15, %v1900_v26, -inf  ;;  %v1907_v8 = vsel %vm1897_vm15, %v1901_v7, -inf }
 0x227   : > { %v1908_v3 = vsel %vm151_vm0, %v1904_v14, -inf  ;;  %v1915_v51 = vsel %vm151_vm0, %v1905_v59, -inf  ;;  %v1922_v44 = vsel %vm151_vm0, %v1906_v29, -inf  ;;  %v1929_v58 = vsel %vm151_vm0, %v1907_v8, -inf }
 0x228   : > { %v1909_v38 = vrot.slane %v1908_v3, 4  ;;  %v1916_v62 = vrot.slane %v1915_v51, 4  ;;  %v1923_v24 = vrot.slane %v1922_v44, 4  ;;  %v1930_v21 = vrot.slane %v1929_v58, 4 }
 0x22a   : > { %v1910_v5 = vmax.f32 %v1908_v3, %v1909_v38  ;;  %v1917_v10 = vmax.f32 %v1915_v51, %v1916_v62  ;;  %v1924_v34 = vmax.f32 %v1922_v44, %v1923_v24  ;;  %v1931_v9 = vmax.f32 %v1929_v58, %v1930_v21 }
 0x22c   : > { %v1911_v25 = vrot.slane %v1910_v5, 2  ;;  %v1918_v13 = vrot.slane %v1917_v10, 2  ;;  %v1925_v16 = vrot.slane %v1924_v34, 2  ;;  %v1932_v12 = vrot.slane %v1931_v9, 2 }
 0x22e   : > { %v1912_v28 = vmax.f32 %v1910_v5, %v1911_v25  ;;  %v1919_v18 = vmax.f32 %v1917_v10, %v1918_v13  ;;  %v1926_v46 = vmax.f32 %v1924_v34, %v1925_v16  ;;  %v1933_v31 = vmax.f32 %v1931_v9, %v1932_v12 }
 0x230   : > { %v1913_v30 = vrot.slane %v1912_v28, 1  ;;  %v1920_v37 = vrot.slane %v1919_v18, 1  ;;  %v1927_v50 = vrot.slane %v1926_v46, 1  ;;  %v1934_v32 = vrot.slane %v1933_v31, 1 }
 0x232   : > { %v1914_v27 = vmax.f32 %v1912_v28, %v1913_v30  ;;  %v1921_v11 = vmax.f32 %v1919_v18, %v1920_v37  ;;  %v1928_v60 = vmax.f32 %v1926_v46, %v1927_v50  ;;  %v1935_v35 = vmax.f32 %v1933_v31, %v1934_v32 }
 0x234   : > { %v1942_v23 = vsel %vm1941_vm1, %v1921_v11, %v1914_v27 }
 0x235   : > { %v1944_v39 = vsel %vm1943_vm2, %v1928_v60, %v1942_v23 }
 0x236   : > { %v1946_v40 = vsel %vm1945_vm3, %v1935_v35, %v1944_v39 }
 0x237   : > { %v1948_v57 = vmax.f32 %v1936_v4, %v1946_v40 }
 0x239   : > { %1950 = vst.msk [vmem:[#allocation3] sm:$0xf] %vm1949_vm4, %v1948_v57 }
 0x23a PF: > { %s3680_s14 = sld [smem:[#allocation6 + %s2863_s1]] }
 0x23b   : > { %s3683_s15 = sld [smem:[#allocation7 + %s2863_s1]] }
 0x240   : > { %p1954_p5 = scmp.lt.s32.totalorder %s3680_s14, 8 }
 0x241   : > { %p1953_p4 = scmp.gt.s32.totalorder %s3683_s15, 0 }
 0x243   : > { %p1955_p6 = pnand %p1954_p5, %p1953_p4 }
 0x244   : > { %v1959_v47 = vlaneseq (!%p1955_p6)  ;;  %v1961_v42 = vstv (!%p1955_p6), %s3680_s14  ;;  %v1963_v33 = vstv (!%p1955_p6), %s3683_s15  ;;  %v1966_v45 = vld [vmem:[#allocation2] sm:$0xff] (!%p1955_p6)  ;;  %v1967_v54 = vld [vmem:[#allocation2 + $0x10] sm:$0xff] (!%p1955_p6)  ;;  %vm2009_vm8 = vcmask (!%p1955_p6), 1041409  }
 0x245   : > { %1958 = sbr.rel (%p1955_p6) target bundleno = 606 (0x25e), region = 68  ;;  %v1968_v36 = vld [vmem:[#allocation2 + $0x20] sm:$0xff] (!%p1955_p6)  ;;  %v1969_v20 = vld [vmem:[#allocation2 + $0x30] sm:$0xff] (!%p1955_p6)  ;;  %vm2011_vm9 = vcmask (!%p1955_p6), 1042434   ;;  %vm2013_vm10 = vcmask (!%p1955_p6), 1043459   ;;  %vm2017_vm11 = vcmask (!%p1955_p6), 27648  }
 0x246   : > { %v1960_v43 = vshrl.u32 (!%p1955_p6), %v1959_v47, 7  ;;  %v2004_v10 = vld [vmem:[#allocation3 + $0x4] sm:$0xf] (!%p1955_p6) }
 0x248   : > { %vm1962_vm5 = vcmp.ge.s32.totalorder (!%p1955_p6), %v1960_v43, %v1961_v42  ;;  %vm1964_vm6 = vcmp.lt.s32.totalorder (!%p1955_p6), %v1960_v43, %v1963_v33 }
 0x249   : > { %vm1965_vm7 = vmand (!%p1955_p6), %vm1962_vm5, %vm1964_vm6 }
 0x24a   : > { %v1972_v49 = vsel (!%p1955_p6), %vm1965_vm7, %v1966_v45, -inf  ;;  %v1973_v19 = vsel (!%p1955_p6), %vm1965_vm7, %v1967_v54, -inf  ;;  %v1974_v55 = vsel (!%p1955_p6), %vm1965_vm7, %v1968_v36, -inf  ;;  %v1975_v22 = vsel (!%p1955_p6), %vm1965_vm7, %v1969_v20, -inf }
 0x24b   : > { %v1976_v63 = vsel (!%p1955_p6), %vm151_vm0, %v1972_v49, -inf  ;;  %v1983_v0 = vsel (!%p1955_p6), %vm151_vm0, %v1973_v19, -inf  ;;  %v1990_v61 = vsel (!%p1955_p6), %vm151_vm0, %v1974_v55, -inf  ;;  %v1997_v2 = vsel (!%p1955_p6), %vm151_vm0, %v1975_v22, -inf }
 0x24c   : > { %v1977_v6 = vrot.slane %v1976_v63, 4  ;;  %v1984_v48 = vrot.slane %v1983_v0, 4  ;;  %v1991_v15 = vrot.slane %v1990_v61, 4  ;;  %v1998_v17 = vrot.slane %v1997_v2, 4 }
 0x24e   : > { %v1978_v53 = vmax.f32 %v1976_v63, %v1977_v6  ;;  %v1985_v56 = vmax.f32 %v1983_v0, %v1984_v48  ;;  %v1992_v52 = vmax.f32 %v1990_v61, %v1991_v15  ;;  %v1999_v1 = vmax.f32 %v1997_v2, %v1998_v17 }
 0x250   : > { %v1979_v41 = vrot.slane %v1978_v53, 2  ;;  %v1986_v26 = vrot.slane %v1985_v56, 2  ;;  %v1993_v7 = vrot.slane %v1992_v52, 2  ;;  %v2000_v14 = vrot.slane %v1999_v1, 2 }
 0x252   : > { %v1980_v59 = vmax.f32 %v1978_v53, %v1979_v41  ;;  %v1987_v29 = vmax.f32 %v1985_v56, %v1986_v26  ;;  %v1994_v8 = vmax.f32 %v1992_v52, %v1993_v7  ;;  %v2001_v3 = vmax.f32 %v1999_v1, %v2000_v14 }
 0x254   : > { %v1981_v51 = vrot.slane %v1980_v59, 1  ;;  %v1988_v44 = vrot.slane %v1987_v29, 1  ;;  %v1995_v58 = vrot.slane %v1994_v8, 1  ;;  %v2002_v38 = vrot.slane %v2001_v3, 1 }
 0x256   : > { %v1982_v62 = vmax.f32 %v1980_v59, %v1981_v51  ;;  %v1989_v24 = vmax.f32 %v1987_v29, %v1988_v44  ;;  %v1996_v21 = vmax.f32 %v1994_v8, %v1995_v58  ;;  %v2003_v5 = vmax.f32 %v2001_v3, %v2002_v38 }
 0x258   : > { %v2010_v34 = vsel %vm2009_vm8, %v1989_v24, %v1982_v62 }
 0x259   : > { %v2012_v9 = vsel %vm2011_vm9, %v1996_v21, %v2010_v34 }
 0x25a   : > { %v2014_v25 = vsel %vm2013_vm10, %v2003_v5, %v2012_v9 }
 0x25b   : > { %v2016_v13 = vmax.f32 %v2004_v10, %v2014_v25 }
 0x25d   : > { %2018 = vst.msk [vmem:[#allocation3 + $0x4] sm:$0xf] %vm2017_vm11, %v2016_v13 }
 0x25e PF: > { %p2019_p7 = scmp.gt.s32.totalorder %s3683_s15, 8  ;;  %p2020_p8 = scmp.lt.s32.totalorder %s3680_s14, 16 }
 0x260   : > { %p2021_p9 = pnand %p2020_p8, %p2019_p7 }
 0x261   : > { %v2025_v16 = vlaneseq (!%p2021_p9)  ;;  %v2028_v28 = vstv (!%p2021_p9), %s3680_s14  ;;  %v2030_v18 = vstv (!%p2021_p9), %s3683_s15  ;;  %v2033_v31 = vld [vmem:[#allocation2 + $0x8] sm:$0xff] (!%p2021_p9)  ;;  %v2034_v30 = vld [vmem:[#allocation2 + $0x18] sm:$0xff] (!%p2021_p9)  ;;  %vm2076_vm15 = vcmask (!%p2021_p9), 1041409  }
 0x262   : > { %2024 = sbr.rel (%p2021_p9) target bundleno = 637 (0x27d), region = 72  ;;  %v2035_v37 = vld [vmem:[#allocation2 + $0x28] sm:$0xff] (!%p2021_p9)  ;;  %v2036_v50 = vld [vmem:[#allocation2 + $0x38] sm:$0xff] (!%p2021_p9)  ;;  %vm2078_vm1 = vcmask (!%p2021_p9), 1042434   ;;  %vm2080_vm2 = vcmask (!%p2021_p9), 1043459   ;;  %vm2084_vm3 = vcmask (!%p2021_p9), 27648  }
 0x263   : > { %v2026_v12 = vshrl.u32 (!%p2021_p9), %v2025_v16, 7 }
 0x264   : > { %v2071_v52 = vld [vmem:[#allocation3 + $0x4] sm:$0xf] (!%p2021_p9) }
 0x265   : > { %v2027_v46 = vadd.s32 (!%p2021_p9), 8, %v2026_v12 }
 0x267   : > { %vm2029_vm12 = vcmp.ge.s32.totalorder (!%p2021_p9), %v2027_v46, %v2028_v28  ;;  %vm2031_vm13 = vcmp.lt.s32.totalorder (!%p2021_p9), %v2027_v46, %v2030_v18 }
 0x268   : > { %vm2032_vm14 = vmand (!%p2021_p9), %vm2029_vm12, %vm2031_vm13 }
 0x269   : > { %v2039_v32 = vsel %vm2032_vm14, %v2033_v31, -inf  ;;  %v2040_v27 = vsel %vm2032_vm14, %v2034_v30, -inf  ;;  %v2041_v11 = vsel %vm2032_vm14, %v2035_v37, -inf  ;;  %v2042_v60 = vsel %vm2032_vm14, %v2036_v50, -inf }
 0x26a   : > { %v2043_v35 = vsel %vm151_vm0, %v2039_v32, -inf  ;;  %v2050_v4 = vsel %vm151_vm0, %v2040_v27, -inf  ;;  %v2057_v23 = vsel %vm151_vm0, %v2041_v11, -inf  ;;  %v2064_v39 = vsel %vm151_vm0, %v2042_v60, -inf }
 0x26b   : > { %v2044_v40 = vrot.slane %v2043_v35, 4  ;;  %v2051_v57 = vrot.slane %v2050_v4, 4  ;;  %v2058_v47 = vrot.slane %v2057_v23, 4  ;;  %v2065_v42 = vrot.slane %v2064_v39, 4 }
 0x26d   : > { %v2045_v33 = vmax.f32 %v2043_v35, %v2044_v40  ;;  %v2052_v43 = vmax.f32 %v2050_v4, %v2051_v57  ;;  %v2059_v45 = vmax.f32 %v2057_v23, %v2058_v47  ;;  %v2066_v54 = vmax.f32 %v2064_v39, %v2065_v42 }
 0x26f   : > { %v2046_v36 = vrot.slane %v2045_v33, 2  ;;  %v2053_v20 = vrot.slane %v2052_v43, 2  ;;  %v2060_v49 = vrot.slane %v2059_v45, 2  ;;  %v2067_v19 = vrot.slane %v2066_v54, 2 }
 0x271   : > { %v2047_v55 = vmax.f32 %v2045_v33, %v2046_v36  ;;  %v2054_v22 = vmax.f32 %v2052_v43, %v2053_v20  ;;  %v2061_v63 = vmax.f32 %v2059_v45, %v2060_v49  ;;  %v2068_v0 = vmax.f32 %v2066_v54, %v2067_v19 }
 0x273   : > { %v2048_v61 = vrot.slane %v2047_v55, 1  ;;  %v2055_v2 = vrot.slane %v2054_v22, 1  ;;  %v2062_v6 = vrot.slane %v2061_v63, 1  ;;  %v2069_v48 = vrot.slane %v2068_v0, 1 }
 0x275   : > { %v2049_v15 = vmax.f32 %v2047_v55, %v2048_v61  ;;  %v2056_v17 = vmax.f32 %v2054_v22, %v2055_v2  ;;  %v2063_v53 = vmax.f32 %v2061_v63, %v2062_v6  ;;  %v2070_v56 = vmax.f32 %v2068_v0, %v2069_v48 }
 0x277   : > { %v2077_v1 = vsel %vm2076_vm15, %v2056_v17, %v2049_v15 }
 0x278   : > { %v2079_v41 = vsel %vm2078_vm1, %v2063_v53, %v2077_v1 }
 0x279   : > { %v2081_v26 = vsel %vm2080_vm2, %v2070_v56, %v2079_v41 }
 0x27a   : > { %v2083_v7 = vmax.f32 %v2071_v52, %v2081_v26 }
 0x27c   : > { %2085 = vst.msk [vmem:[#allocation3 + $0x4] sm:$0xf] %vm2084_vm3, %v2083_v7 }
 0x27d PF: > { %s3702_s16 = sld [smem:[#allocation6 + %s3128_s8]] }
 0x27e   : > { %s3705_s17 = sld [smem:[#allocation7 + %s3128_s8]] }
 0x283   : > { %p2089_p11 = scmp.lt.s32.totalorder %s3702_s16, 8 }
 0x284   : > { %p2088_p10 = scmp.gt.s32.totalorder %s3705_s17, 0 }
 0x286   : > { %p2090_p12 = pnand %p2089_p11, %p2088_p10 }
 0x287   : > { %v2094_v14 = vlaneseq (!%p2090_p12)  ;;  %v2096_v59 = vstv (!%p2090_p12), %s3702_s16  ;;  %v2098_v29 = vstv (!%p2090_p12), %s3705_s17  ;;  %v2101_v3 = vld [vmem:[#allocation2] sm:$0xff] (!%p2090_p12)  ;;  %v2102_v51 = vld [vmem:[#allocation2 + $0x10] sm:$0xff] (!%p2090_p12)  ;;  %vm2144_vm7 = vcmask (!%p2090_p12), 1041409   ;;  %v2139_v43 = vld [vmem:[#allocation3 + $0x8] sm:$0xf] (!%p2090_p12) }
 0x288   : > { %2093 = sbr.rel (%p2090_p12) target bundleno = 673 (0x2a1), region = 76  ;;  %v2103_v44 = vld [vmem:[#allocation2 + $0x20] sm:$0xff] (!%p2090_p12)  ;;  %v2104_v58 = vld [vmem:[#allocation2 + $0x30] sm:$0xff] (!%p2090_p12)  ;;  %vm2146_vm8 = vcmask (!%p2090_p12), 1042434   ;;  %vm2148_vm9 = vcmask (!%p2090_p12), 1043459   ;;  %vm2152_vm10 = vcmask (!%p2090_p12), 27648  }
 0x289   : > { %v2095_v8 = vshrl.u32 (!%p2090_p12), %v2094_v14, 7 }
 0x28b   : > { %vm2097_vm4 = vcmp.ge.s32.totalorder (!%p2090_p12), %v2095_v8, %v2096_v59  ;;  %vm2099_vm5 = vcmp.lt.s32.totalorder (!%p2090_p12), %v2095_v8, %v2098_v29 }
 0x28c   : > { %vm2100_vm6 = vmand (!%p2090_p12), %vm2097_vm4, %vm2099_vm5 }
 0x28d   : > { %v2107_v38 = vsel (!%p2090_p12), %vm2100_vm6, %v2101_v3, -inf  ;;  %v2108_v62 = vsel (!%p2090_p12), %vm2100_vm6, %v2102_v51, -inf  ;;  %v2109_v24 = vsel (!%p2090_p12), %vm2100_vm6, %v2103_v44, -inf  ;;  %v2110_v21 = vsel (!%p2090_p12), %vm2100_vm6, %v2104_v58, -inf }
 0x28e   : > { %v2111_v5 = vsel (!%p2090_p12), %vm151_vm0, %v2107_v38, -inf  ;;  %v2118_v10 = vsel (!%p2090_p12), %vm151_vm0, %v2108_v62, -inf  ;;  %v2125_v34 = vsel (!%p2090_p12), %vm151_vm0, %v2109_v24, -inf  ;;  %v2132_v9 = vsel (!%p2090_p12), %vm151_vm0, %v2110_v21, -inf }
 0x28f   : > { %v2112_v25 = vrot.slane %v2111_v5, 4  ;;  %v2119_v13 = vrot.slane %v2118_v10, 4  ;;  %v2126_v16 = vrot.slane %v2125_v34, 4  ;;  %v2133_v12 = vrot.slane %v2132_v9, 4 }
 0x291   : > { %v2113_v28 = vmax.f32 %v2111_v5, %v2112_v25  ;;  %v2120_v18 = vmax.f32 %v2118_v10, %v2119_v13  ;;  %v2127_v46 = vmax.f32 %v2125_v34, %v2126_v16  ;;  %v2134_v31 = vmax.f32 %v2132_v9, %v2133_v12 }
 0x293   : > { %v2114_v30 = vrot.slane %v2113_v28, 2  ;;  %v2121_v37 = vrot.slane %v2120_v18, 2  ;;  %v2128_v50 = vrot.slane %v2127_v46, 2  ;;  %v2135_v32 = vrot.slane %v2134_v31, 2 }
 0x295   : > { %v2115_v27 = vmax.f32 %v2113_v28, %v2114_v30  ;;  %v2122_v11 = vmax.f32 %v2120_v18, %v2121_v37  ;;  %v2129_v60 = vmax.f32 %v2127_v46, %v2128_v50  ;;  %v2136_v35 = vmax.f32 %v2134_v31, %v2135_v32 }
 0x297   : > { %v2116_v4 = vrot.slane %v2115_v27, 1  ;;  %v2123_v23 = vrot.slane %v2122_v11, 1  ;;  %v2130_v39 = vrot.slane %v2129_v60, 1  ;;  %v2137_v40 = vrot.slane %v2136_v35, 1 }
 0x299   : > { %v2117_v57 = vmax.f32 %v2115_v27, %v2116_v4  ;;  %v2124_v47 = vmax.f32 %v2122_v11, %v2123_v23  ;;  %v2131_v42 = vmax.f32 %v2129_v60, %v2130_v39  ;;  %v2138_v33 = vmax.f32 %v2136_v35, %v2137_v40 }
 0x29b   : > { %v2145_v45 = vsel %vm2144_vm7, %v2124_v47, %v2117_v57 }
 0x29c   : > { %v2147_v54 = vsel %vm2146_vm8, %v2131_v42, %v2145_v45 }
 0x29d   : > { %v2149_v36 = vsel %vm2148_vm9, %v2138_v33, %v2147_v54 }
 0x29e   : > { %v2151_v20 = vmax.f32 %v2139_v43, %v2149_v36 }
 0x2a0   : > { %2153 = vst.msk [vmem:[#allocation3 + $0x8] sm:$0xf] %vm2152_vm10, %v2151_v20 }
 0x2a1 PF: > { %p2154_p13 = scmp.gt.s32.totalorder %s3705_s17, 8  ;;  %p2155_p0 = scmp.lt.s32.totalorder %s3702_s16, 16 }
 0x2a3   : > { %p2156_p1 = pnand %p2155_p0, %p2154_p13 }
 0x2a4   : > { %v2160_v49 = vlaneseq (!%p2156_p1)  ;;  %v2163_v55 = vstv (!%p2156_p1), %s3702_s16  ;;  %v2165_v22 = vstv (!%p2156_p1), %s3705_s17  ;;  %v2168_v0 = vld [vmem:[#allocation2 + $0x8] sm:$0xff] (!%p2156_p1)  ;;  %v2169_v61 = vld [vmem:[#allocation2 + $0x18] sm:$0xff] (!%p2156_p1)  ;;  %vm2211_vm14 = vcmask (!%p2156_p1), 1041409  }
 0x2a5   : > { %2159 = sbr.rel (%p2156_p1) target bundleno = 704 (0x2c0), region = 80  ;;  %v2170_v2 = vld [vmem:[#allocation2 + $0x28] sm:$0xff] (!%p2156_p1)  ;;  %v2171_v6 = vld [vmem:[#allocation2 + $0x38] sm:$0xff] (!%p2156_p1)  ;;  %vm2213_vm15 = vcmask (!%p2156_p1), 1042434   ;;  %vm2215_vm1 = vcmask (!%p2156_p1), 1043459   ;;  %vm2219_vm2 = vcmask (!%p2156_p1), 27648  }
 0x2a6   : > { %v2161_v19 = vshrl.u32 (!%p2156_p1), %v2160_v49, 7 }
 0x2a7   : > { %v2206_v46 = vld [vmem:[#allocation3 + $0x8] sm:$0xf] (!%p2156_p1) }
 0x2a8   : > { %v2162_v63 = vadd.s32 (!%p2156_p1), 8, %v2161_v19 }
 0x2aa   : > { %vm2164_vm11 = vcmp.ge.s32.totalorder (!%p2156_p1), %v2162_v63, %v2163_v55  ;;  %vm2166_vm12 = vcmp.lt.s32.totalorder (!%p2156_p1), %v2162_v63, %v2165_v22 }
 0x2ab   : > { %vm2167_vm13 = vmand (!%p2156_p1), %vm2164_vm11, %vm2166_vm12 }
 0x2ac   : > { %v2174_v48 = vsel %vm2167_vm13, %v2168_v0, -inf  ;;  %v2175_v15 = vsel %vm2167_vm13, %v2169_v61, -inf  ;;  %v2176_v17 = vsel %vm2167_vm13, %v2170_v2, -inf  ;;  %v2177_v53 = vsel %vm2167_vm13, %v2171_v6, -inf }
 0x2ad   : > { %v2178_v56 = vsel %vm151_vm0, %v2174_v48, -inf  ;;  %v2185_v52 = vsel %vm151_vm0, %v2175_v15, -inf  ;;  %v2192_v1 = vsel %vm151_vm0, %v2176_v17, -inf  ;;  %v2199_v41 = vsel %vm151_vm0, %v2177_v53, -inf }
 0x2ae   : > { %v2179_v26 = vrot.slane %v2178_v56, 4  ;;  %v2186_v7 = vrot.slane %v2185_v52, 4  ;;  %v2193_v14 = vrot.slane %v2192_v1, 4  ;;  %v2200_v59 = vrot.slane %v2199_v41, 4 }
 0x2b0   : > { %v2180_v29 = vmax.f32 %v2178_v56, %v2179_v26  ;;  %v2187_v8 = vmax.f32 %v2185_v52, %v2186_v7  ;;  %v2194_v3 = vmax.f32 %v2192_v1, %v2193_v14  ;;  %v2201_v51 = vmax.f32 %v2199_v41, %v2200_v59 }
 0x2b2   : > { %v2181_v44 = vrot.slane %v2180_v29, 2  ;;  %v2188_v58 = vrot.slane %v2187_v8, 2  ;;  %v2195_v38 = vrot.slane %v2194_v3, 2  ;;  %v2202_v62 = vrot.slane %v2201_v51, 2 }
 0x2b4   : > { %v2182_v24 = vmax.f32 %v2180_v29, %v2181_v44  ;;  %v2189_v21 = vmax.f32 %v2187_v8, %v2188_v58  ;;  %v2196_v5 = vmax.f32 %v2194_v3, %v2195_v38  ;;  %v2203_v10 = vmax.f32 %v2201_v51, %v2202_v62 }
 0x2b6   : > { %v2183_v34 = vrot.slane %v2182_v24, 1  ;;  %v2190_v9 = vrot.slane %v2189_v21, 1  ;;  %v2197_v25 = vrot.slane %v2196_v5, 1  ;;  %v2204_v13 = vrot.slane %v2203_v10, 1 }
 0x2b8   : > { %v2184_v16 = vmax.f32 %v2182_v24, %v2183_v34  ;;  %v2191_v12 = vmax.f32 %v2189_v21, %v2190_v9  ;;  %v2198_v28 = vmax.f32 %v2196_v5, %v2197_v25  ;;  %v2205_v18 = vmax.f32 %v2203_v10, %v2204_v13 }
 0x2ba   : > { %v2212_v31 = vsel %vm2211_vm14, %v2191_v12, %v2184_v16 }
 0x2bb   : > { %v2214_v30 = vsel %vm2213_vm15, %v2198_v28, %v2212_v31 }
 0x2bc   : > { %v2216_v37 = vsel %vm2215_vm1, %v2205_v18, %v2214_v30 }
 0x2bd   : > { %v2218_v50 = vmax.f32 %v2206_v46, %v2216_v37 }
 0x2bf   : > { %2220 = vst.msk [vmem:[#allocation3 + $0x8] sm:$0xf] %vm2219_vm2, %v2218_v50 }
 0x2c0 PF: > { %s3724_s4 = sld [smem:[#allocation6 + %s3393_s11]] }
 0x2c1   : > { %s3727_s19 = sld [smem:[#allocation7 + %s3393_s11]] }
 0x2c6   : > { %p2224_p3 = scmp.lt.s32.totalorder %s3724_s4, 8 }
 0x2c7   : > { %p2223_p2 = scmp.gt.s32.totalorder %s3727_s19, 0 }
 0x2c9   : > { %p2225_p4 = pnand %p2224_p3, %p2223_p2 }
 0x2ca   : > { %v2229_v32 = vlaneseq (!%p2225_p4)  ;;  %v2231_v27 = vstv (!%p2225_p4), %s3724_s4  ;;  %v2233_v11 = vstv (!%p2225_p4), %s3727_s19  ;;  %v2236_v35 = vld [vmem:[#allocation2] sm:$0xff] (!%p2225_p4)  ;;  %v2237_v4 = vld [vmem:[#allocation2 + $0x10] sm:$0xff] (!%p2225_p4)  ;;  %vm2279_vm6 = vcmask (!%p2225_p4), 1041409   ;;  %v2274_v8 = vld [vmem:[#allocation3 + $0xc] sm:$0xf] (!%p2225_p4) }
 0x2cb   : > { %2228 = sbr.rel (%p2225_p4) target bundleno = 740 (0x2e4), region = 84  ;;  %v2238_v23 = vld [vmem:[#allocation2 + $0x20] sm:$0xff] (!%p2225_p4)  ;;  %v2239_v39 = vld [vmem:[#allocation2 + $0x30] sm:$0xff] (!%p2225_p4)  ;;  %vm2281_vm7 = vcmask (!%p2225_p4), 1042434   ;;  %vm2283_vm8 = vcmask (!%p2225_p4), 1043459   ;;  %vm2287_vm9 = vcmask (!%p2225_p4), 27648  }
 0x2cc   : > { %v2230_v60 = vshrl.u32 (!%p2225_p4), %v2229_v32, 7 }
 0x2ce   : > { %vm2232_vm3 = vcmp.ge.s32.totalorder (!%p2225_p4), %v2230_v60, %v2231_v27  ;;  %vm2234_vm4 = vcmp.lt.s32.totalorder (!%p2225_p4), %v2230_v60, %v2233_v11 }
 0x2cf   : > { %vm2235_vm5 = vmand (!%p2225_p4), %vm2232_vm3, %vm2234_vm4 }
 0x2d0   : > { %v2242_v40 = vsel (!%p2225_p4), %vm2235_vm5, %v2236_v35, -inf  ;;  %v2243_v57 = vsel (!%p2225_p4), %vm2235_vm5, %v2237_v4, -inf  ;;  %v2244_v47 = vsel (!%p2225_p4), %vm2235_vm5, %v2238_v23, -inf  ;;  %v2245_v42 = vsel (!%p2225_p4), %vm2235_vm5, %v2239_v39, -inf }
 0x2d1   : > { %v2246_v33 = vsel (!%p2225_p4), %vm151_vm0, %v2242_v40, -inf  ;;  %v2253_v43 = vsel (!%p2225_p4), %vm151_vm0, %v2243_v57, -inf  ;;  %v2260_v45 = vsel (!%p2225_p4), %vm151_vm0, %v2244_v47, -inf  ;;  %v2267_v54 = vsel (!%p2225_p4), %vm151_vm0, %v2245_v42, -inf }
 0x2d2   : > { %v2247_v36 = vrot.slane %v2246_v33, 4  ;;  %v2254_v20 = vrot.slane %v2253_v43, 4  ;;  %v2261_v49 = vrot.slane %v2260_v45, 4  ;;  %v2268_v19 = vrot.slane %v2267_v54, 4 }
 0x2d4   : > { %v2248_v55 = vmax.f32 %v2246_v33, %v2247_v36  ;;  %v2255_v22 = vmax.f32 %v2253_v43, %v2254_v20  ;;  %v2262_v63 = vmax.f32 %v2260_v45, %v2261_v49  ;;  %v2269_v0 = vmax.f32 %v2267_v54, %v2268_v19 }
 0x2d6   : > { %v2249_v61 = vrot.slane %v2248_v55, 2  ;;  %v2256_v2 = vrot.slane %v2255_v22, 2  ;;  %v2263_v6 = vrot.slane %v2262_v63, 2  ;;  %v2270_v48 = vrot.slane %v2269_v0, 2 }
 0x2d8   : > { %v2250_v15 = vmax.f32 %v2248_v55, %v2249_v61  ;;  %v2257_v17 = vmax.f32 %v2255_v22, %v2256_v2  ;;  %v2264_v53 = vmax.f32 %v2262_v63, %v2263_v6  ;;  %v2271_v56 = vmax.f32 %v2269_v0, %v2270_v48 }
 0x2da   : > { %v2251_v52 = vrot.slane %v2250_v15, 1  ;;  %v2258_v1 = vrot.slane %v2257_v17, 1  ;;  %v2265_v41 = vrot.slane %v2264_v53, 1  ;;  %v2272_v26 = vrot.slane %v2271_v56, 1 }
 0x2dc   : > { %v2252_v7 = vmax.f32 %v2250_v15, %v2251_v52  ;;  %v2259_v14 = vmax.f32 %v2257_v17, %v2258_v1  ;;  %v2266_v59 = vmax.f32 %v2264_v53, %v2265_v41  ;;  %v2273_v29 = vmax.f32 %v2271_v56, %v2272_v26 }
 0x2de   : > { %v2280_v3 = vsel %vm2279_vm6, %v2259_v14, %v2252_v7 }
 0x2df   : > { %v2282_v51 = vsel %vm2281_vm7, %v2266_v59, %v2280_v3 }
 0x2e0   : > { %v2284_v44 = vsel %vm2283_vm8, %v2273_v29, %v2282_v51 }
 0x2e1   : > { %v2286_v58 = vmax.f32 %v2274_v8, %v2284_v44 }
 0x2e3   : > { %2288 = vst.msk [vmem:[#allocation3 + $0xc] sm:$0xf] %vm2287_vm9, %v2286_v58 }
 0x2e4 PF: > { %p2289_p5 = scmp.gt.s32.totalorder %s3727_s19, 8  ;;  %p2290_p6 = scmp.lt.s32.totalorder %s3724_s4, 16 }
 0x2e6   : > { %p2291_p7 = pnand %p2290_p6, %p2289_p5 }
 0x2e7   : > { %v2295_v38 = vlaneseq (!%p2291_p7)  ;;  %v2298_v24 = vstv (!%p2291_p7), %s3724_s4  ;;  %v2300_v21 = vstv (!%p2291_p7), %s3727_s19  ;;  %v2303_v10 = vld [vmem:[#allocation2 + $0x8] sm:$0xff] (!%p2291_p7)  ;;  %v2304_v34 = vld [vmem:[#allocation2 + $0x18] sm:$0xff] (!%p2291_p7)  ;;  %vm2346_vm13 = vcmask (!%p2291_p7), 1041409  }
 0x2e8   : > { %2294 = sbr.rel (%p2291_p7) target bundleno = 771 (0x303), region = 88  ;;  %v2305_v9 = vld [vmem:[#allocation2 + $0x28] sm:$0xff] (!%p2291_p7)  ;;  %v2306_v25 = vld [vmem:[#allocation2 + $0x38] sm:$0xff] (!%p2291_p7)  ;;  %vm2348_vm14 = vcmask (!%p2291_p7), 1042434   ;;  %vm2350_vm15 = vcmask (!%p2291_p7), 1043459   ;;  %vm2354_vm1 = vcmask (!%p2291_p7), 27648  }
 0x2e9   : > { %v2296_v62 = vshrl.u32 (!%p2291_p7), %v2295_v38, 7 }
 0x2ea   : > { %v2341_v63 = vld [vmem:[#allocation3 + $0xc] sm:$0xf] (!%p2291_p7) }
 0x2eb   : > { %v2297_v5 = vadd.s32 (!%p2291_p7), 8, %v2296_v62 }
 0x2ed   : > { %vm2299_vm10 = vcmp.ge.s32.totalorder (!%p2291_p7), %v2297_v5, %v2298_v24  ;;  %vm2301_vm11 = vcmp.lt.s32.totalorder (!%p2291_p7), %v2297_v5, %v2300_v21 }
 0x2ee   : > { %vm2302_vm12 = vmand (!%p2291_p7), %vm2299_vm10, %vm2301_vm11 }
 0x2ef   : > { %v2309_v13 = vsel %vm2302_vm12, %v2303_v10, -inf  ;;  %v2310_v16 = vsel %vm2302_vm12, %v2304_v34, -inf  ;;  %v2311_v12 = vsel %vm2302_vm12, %v2305_v9, -inf  ;;  %v2312_v28 = vsel %vm2302_vm12, %v2306_v25, -inf }
 0x2f0   : > { %v2313_v18 = vsel %vm151_vm0, %v2309_v13, -inf  ;;  %v2320_v46 = vsel %vm151_vm0, %v2310_v16, -inf  ;;  %v2327_v31 = vsel %vm151_vm0, %v2311_v12, -inf  ;;  %v2334_v30 = vsel %vm151_vm0, %v2312_v28, -inf }
 0x2f1   : > { %v2314_v37 = vrot.slane %v2313_v18, 4  ;;  %v2321_v50 = vrot.slane %v2320_v46, 4  ;;  %v2328_v32 = vrot.slane %v2327_v31, 4  ;;  %v2335_v27 = vrot.slane %v2334_v30, 4 }
 0x2f3   : > { %v2315_v11 = vmax.f32 %v2313_v18, %v2314_v37  ;;  %v2322_v60 = vmax.f32 %v2320_v46, %v2321_v50  ;;  %v2329_v35 = vmax.f32 %v2327_v31, %v2328_v32  ;;  %v2336_v4 = vmax.f32 %v2334_v30, %v2335_v27 }
 0x2f5   : > { %v2316_v23 = vrot.slane %v2315_v11, 2  ;;  %v2323_v39 = vrot.slane %v2322_v60, 2  ;;  %v2330_v40 = vrot.slane %v2329_v35, 2  ;;  %v2337_v57 = vrot.slane %v2336_v4, 2 }
 0x2f7   : > { %v2317_v47 = vmax.f32 %v2315_v11, %v2316_v23  ;;  %v2324_v42 = vmax.f32 %v2322_v60, %v2323_v39  ;;  %v2331_v33 = vmax.f32 %v2329_v35, %v2330_v40  ;;  %v2338_v43 = vmax.f32 %v2336_v4, %v2337_v57 }
 0x2f9   : > { %v2318_v45 = vrot.slane %v2317_v47, 1  ;;  %v2325_v54 = vrot.slane %v2324_v42, 1  ;;  %v2332_v36 = vrot.slane %v2331_v33, 1  ;;  %v2339_v20 = vrot.slane %v2338_v43, 1 }
 0x2fb   : > { %v2319_v49 = vmax.f32 %v2317_v47, %v2318_v45  ;;  %v2326_v19 = vmax.f32 %v2324_v42, %v2325_v54  ;;  %v2333_v55 = vmax.f32 %v2331_v33, %v2332_v36  ;;  %v2340_v22 = vmax.f32 %v2338_v43, %v2339_v20 }
 0x2fd   : > { %v2347_v0 = vsel %vm2346_vm13, %v2326_v19, %v2319_v49 }
 0x2fe   : > { %v2349_v61 = vsel %vm2348_vm14, %v2333_v55, %v2347_v0 }
 0x2ff   : > { %v2351_v2 = vsel %vm2350_vm15, %v2340_v22, %v2349_v61 }
 0x300   : > { %v2353_v6 = vmax.f32 %v2341_v63, %v2351_v2 }
 0x302   : > { %2355 = vst.msk [vmem:[#allocation3 + $0xc] sm:$0xf] %vm2354_vm1, %v2353_v6 }
 0x303 PF: > { %v2356_v48 = vld [vmem:[#allocation3] sm:$0xff] }
 0x304   : > { %2358 = vst.msk [vmem:[%s2599_s26] sm:$0xff] %vm151_vm0, %v2356_v48 }
 0x309   : > { %v2357_v15 = vld [vmem:[#allocation3 + $0x8] sm:$0xff] }
 0x30a   : > { %2359 = vst.msk [vmem:[%s2599_s26 + $0x8] sm:$0xff] %vm151_vm0, %v2357_v15 }
 0x30b PF: > { %s38_s18 = sadd.s32 1, %s2511_s18  }
 0x30c   : > { %p35_p8 = scmp.ge.s32.totalorder %s38_s18, 8  }
 0x30e   :  { %37 = sbr.rel (!%p35_p8) target bundleno = 57 (0x39), region = 124 }

</bundles_post_ra>
